<compile_context>
chip_gen: v5e
topology: v5e:2x2
jax: 0.10.0
libtpu: 0.0.40
codegen_flags: <defaults>
</compile_context>

<pallas_src>
import functools

import numpy as np
import jax
import jax.numpy as jnp
from jax.experimental import pallas as pl
from jax.experimental.pallas import tpu as pltpu

F32 = jnp.float32
BF16 = jnp.bfloat16


def _round_up(v, m):
    return ((v + m - 1) // m) * m


def _pool_out(n):
    # MaxPool2d(kernel=3, stride=2, padding=1) output size.
    return (n + 1) // 2


# ----------------------------------------------------------------------------
# Fused kernel (Nb batch elements per grid step, rows = Nb*C)
# ----------------------------------------------------------------------------
def _fused_attention_kernel(x_ref, mask_a_ref, mask_b_ref,
                            dww_ref, dwb_ref, pww_ref, pwb_ref,
                            s2sb_ref, s2w_ref, sub_ref, up_ref,
                            o_ref, *, W, W2, PP, PP2):
    # Static tap shifts for a 3x3 window in flattened (h*W + w) coordinates.
    shifts_a = [(ky - 1) * W + (kx - 1) for ky in range(3) for kx in range(3)]
    shifts_b = [(ky - 1) * W2 + (kx - 1) for ky in range(3) for kx in range(3)]

    def shift_lanes(v, s, pp):
        # shifted[p] = v[p + s]; wrap-around garbage is killed by the masks.
        if s == 0:
            return v
        return pltpu.roll(v, (-s) % pp, axis=1)

    def masked_taps(v, shifts, mask_ref, pp):
        # 9 shifted + validity-masked taps (one XLU roll + one VPU mul each).
        return [shift_lanes(v, shifts[k], pp) * mask_ref[k] for k in range(9)]

    def dw_part(taps, idx):
        # Depthwise 3x3 (stride 1, pad 1); BN scale pre-folded into the tap
        # weights at init.  Bias + ReLU6.
        w = dww_ref[idx]                                    # (R, 9)
        acc = w[:, 0:1] * taps[0]
        for k in range(1, 9):
            acc = acc + w[:, k:k + 1] * taps[k]
        return jnp.clip(acc + dwb_ref[idx], 0.0, 6.0)

    def pw_part(y, idx):
        # Pointwise 1x1 conv as ONE small MXU matmul (block-diagonal over the
        # Nb batch group); BN scale pre-folded.  Bias + ReLU6.
        z = jnp.dot(pww_ref[idx], y, preferred_element_type=F32)
        return jnp.clip(z + pwb_ref[idx], 0.0, 6.0)

    def conv_dw_block(v, idx, shifts, mask_ref, pp):
        return pw_part(dw_part(masked_taps(v, shifts, mask_ref, pp), idx), idx)

    x = x_ref[...]                                          # (R, PP)

    x1 = conv_dw_block(x, 0, shifts_a, mask_a_ref, PP)      # first_residual

    # The 9 masked taps of x1 feed BOTH trunk conv #1 and the maxpool:
    # compute them once (shared XLU rolls / mask multiplies).
    taps1 = masked_taps(x1, shifts_a, mask_a_ref, PP)

    # ---- trunk branch ----
    t = pw_part(dw_part(taps1, 1), 1)                       # trunk_branches[0]
    t = conv_dw_block(t, 2, shifts_a, mask_a_ref, PP)       # trunk_branches[1]

    # ---- mask branch ----
    # MaxPool2d(3, stride=2, padding=1): stride-1 3x3 max over the shared
    # masked taps.  Zero padding == -inf padding here ONLY because x1 is
    # post-ReLU6 (>= 0); revisit if the activation ever changes.  The stride-2
    # subsample is a constant 0/1 selection matmul into the (H2,W2) layout.
    pmax = taps1[0]
    for k in range(1, 9):
        pmax = jnp.maximum(pmax, taps1[k])
    p7 = jnp.dot(pmax.astype(BF16), sub_ref[...],
                 preferred_element_type=F32)                # (R, PP2)

    s1 = conv_dw_block(p7, 3, shifts_b, mask_b_ref, PP2)    # softmax1[0]
    s1 = conv_dw_block(s1, 4, shifts_b, mask_b_ref, PP2)    # softmax1[1]

    # UpsamplingBilinear2d(size=(H, W), align_corners=True) as a matmul with a
    # constant bf16 interpolation matrix; output lane dim = PP (lane dense).
    up = jnp.dot(s1.astype(BF16), up_ref[...],
                 preferred_element_type=F32)                # (R, PP)

    # softmax2_blocks: BN -> ReLU -> 1x1 -> BN -> ReLU -> 1x1 -> Sigmoid
    # (the second BN's scale is folded into the first 1x1 weight).
    y = up + t
    y = jnp.maximum(y * s2sb_ref[0] + s2sb_ref[1], 0.0)
    y = jnp.dot(s2w_ref[0], y, preferred_element_type=F32)
    y = jnp.maximum(y + s2sb_ref[2], 0.0)
    y = jnp.dot(s2w_ref[1], y, preferred_element_type=F32)
    # (1 + sigmoid(y)) * t  ==  (1.5 + 0.5*tanh(0.5*y)) * t   (single EUP op)
    out = (1.5 + 0.5 * jnp.tanh(0.5 * y)) * t

    out = conv_dw_block(out, 5, shifts_a, mask_a_ref, PP)   # last_blocks
    # NOTE: padded lanes [P, PP) carry bias-derived garbage; valid outputs never
    # read them (masks guarantee it) and the wrapper slices them off.
    o_ref[...] = out


# ----------------------------------------------------------------------------
# Wrapper
# ----------------------------------------------------------------------------
def _tensorcores_per_device():
    """Best-effort TensorCores-per-JAX-device (megacore count).  Falling back
    to 1 is always correct (v5e/v6e have a single TensorCore per device)."""
    try:
        d = jax.devices()[0]
    except Exception:
        return 1
    for attr in ("num_cores", "core_count", "num_tensorcores"):
        v = getattr(d, attr, None)
        if isinstance(v, int) and 1 <= v <= 8:
            return v
    kind = str(getattr(d, "device_kind", "")).lower()
    if any(tag in kind for tag in ("v4", "v5p", "v7")):
        return 2
    return 1


def _block_diag(w, nb):
    """(..., C, C) -> (..., nb*C, nb*C) with `w` repeated along the diagonal."""
    if nb == 1:
        return w
    c = w.shape[-1]
    eye = jnp.eye(nb, dtype=w.dtype)
    out = jnp.einsum("ij,...kl->...ikjl", eye, w)
    return out.reshape(w.shape[:-2] + (nb * c, nb * c))


def _tile_rows(v, nb):
    """Repeat the channel (second-to-last) axis nb times: (...,C,k)->(...,nb*C,k)."""
    if nb == 1:
        return v
    return jnp.tile(v, (1,) * (v.ndim - 2) + (nb, 1))


def _const_spec(a):
    nd = a.ndim

    def imap(s):
        return (0,) * nd

    return pl.BlockSpec(a.shape, imap)


def attention_module_stage3(x_nchw, params, *, steps=None):
    N, C, H, W = x_nchw.shape
    H2, W2 = _pool_out(H), _pool_out(W)
    P, P2 = H * W, H2 * W2
    PP, PP2 = _round_up(P, 128), _round_up(P2, 128)

    # One grid step per TensorCore: collapse to a single step on 1-TC chips
    # (fold the whole batch -> batched matmuls), keep 2 parallel steps on
    # megacore chips so neither core idles.
    if steps is None:
        steps = min(N, _tensorcores_per_device())
    steps = max(1, min(int(steps), N))
    nb = -(-N // steps)                       # elements per grid step
    if steps > 1 and (nb * C) % 8 != 0:       # respect the (8,128) sublane rule
        steps, nb = 1, N
    n_pad = steps * nb
    R = nb * C                                # sublane rows per grid step

    # NCHW -> (rows, lanes): flatten spatial to lanes (padded to 128 multiple)
    # and fold (batch, channel) onto sublanes.  Pure XLA reshape/pad glue.
    x_flat = x_nchw.reshape(N, C, P)
    if n_pad != N:
        x_flat = jnp.pad(x_flat, ((0, n_pad - N), (0, 0), (0, 0)))
    x2d = jnp.pad(x_flat, ((0, 0), (0, 0), (0, PP - P))).reshape(n_pad * C, PP)

    # Per-call constant plumbing: tile per-channel vectors over the nb batch
    # group and build block-diagonal 1x1 weights so each channel mix is ONE
    # MXU matmul with M = nb*C rows.  All tiny (< 20 KB).
    dww = _tile_rows(params["dw_w"], nb)        # (6, R, 9)  BN scale folded
    dwb = _tile_rows(params["dw_b"], nb)        # (6, R, 1)
    pww = _block_diag(params["pw_w"], nb)       # (6, R, R)  BN scale folded
    pwb = _tile_rows(params["pw_b"], nb)        # (6, R, 1)
    s2sb = _tile_rows(params["sm2_sb"], nb)     # (3, R, 1)  [s0, b0, b1]
    s2w = _block_diag(params["sm2_w"], nb)      # (2, R, R)  [s1*w1, w2]

    consts = (params["mask_a"], params["mask_b"],
              dww, dwb, pww, pwb, s2sb, s2w,
              params["sub_mat"], params["up_mat"])

    kern = functools.partial(_fused_attention_kernel,
                             W=W, W2=W2, PP=PP, PP2=PP2)

    out2d = pl.pallas_call(
        kern,
        out_shape=jax.ShapeDtypeStruct((n_pad * C, PP), F32),
        grid=(steps,),
        in_specs=[pl.BlockSpec((R, PP), lambda s: (s, 0))]
                 + [_const_spec(a) for a in consts],
        out_specs=pl.BlockSpec((R, PP), lambda s: (s, 0)),
        compiler_params=pltpu.CompilerParams(
            dimension_semantics=("parallel",)),     # megacore batch split
    )(x2d, *consts)

    return out2d[:, :P].reshape(n_pad, C, H, W)[:N]


# ----------------------------------------------------------------------------
# Parameters (deterministic init) and constant matrices
# ----------------------------------------------------------------------------
def _fold_bn(key, c, eps=1e-5):
    kg, kb = jax.random.split(key)
    gamma = 1.0 + 0.1 * jax.random.normal(kg, (c,), F32)
    beta = 0.1 * jax.random.normal(kb, (c,), F32)
    mean = jnp.zeros((c,), F32)             # running stats at init
    var = jnp.ones((c,), F32)
    s = gamma / jnp.sqrt(var + eps)
    b = beta - mean * s
    return s, b


def _init_conv_dw(key, cin, cout):
    k1, k2, k3, k4 = jax.random.split(key, 4)
    dw_w = 0.2 * jax.random.normal(k1, (cin, 9), F32)       # taps: ky*3+kx
    s1, b1 = _fold_bn(k2, cin)
    pw_w = 0.2 * jax.random.normal(k3, (cout, cin), F32)    # out = pw_w @ x
    s2, b2 = _fold_bn(k4, cout)
    # Fold BN scales into the adjacent conv weights (review item): depthwise
    # scale is per input channel (per row); pointwise scale is per output row.
    return dw_w * s1[:, None], b1, pw_w * s2[:, None], b2


def _interp_matrix_1d(n_out, n_in):
    # UpsamplingBilinear2d(align_corners=True) 1-D interpolation weights.
    m = np.zeros((n_out, n_in), np.float32)
    if n_in == 1:
        m[:, 0] = 1.0
        return m
    scale = (n_in - 1) / (n_out - 1) if n_out > 1 else 0.0
    for o in range(n_out):
        s = o * scale
        i0 = min(int(np.floor(s)), n_in - 1)
        f = s - i0
        i1 = min(i0 + 1, n_in - 1)
        m[o, i0] += 1.0 - f
        m[o, i1] += f
    return m


def _dw_masks(H, W, PP):
    """Validity masks (9, 1, PP) for a 3x3 window with zero padding."""
    m = np.zeros((9, 1, PP), np.float32)
    for ky in range(3):
        for kx in range(3):
            k = ky * 3 + kx
            for h in range(H):
                for w in range(W):
                    if 0 <= h + ky - 1 < H and 0 <= w + kx - 1 < W:
                        m[k, 0, h * W + w] = 1.0
    return m


def init_params(key, c, size1):
    H, W = size1
    H2, W2 = _pool_out(H), _pool_out(W)
    P, P2 = H * W, H2 * W2
    PP, PP2 = _round_up(P, 128), _round_up(P2, 128)

    keys = jax.random.split(key, 7)
    blocks = [_init_conv_dw(k, c, c) for k in keys[:6]]
    dw_w = jnp.stack([b[0] for b in blocks])                 # (6, c, 9)
    dw_b = jnp.stack([b[1] for b in blocks])[..., None]      # (6, c, 1)
    pw_w = jnp.stack([b[2] for b in blocks])                 # (6, c, c)
    pw_b = jnp.stack([b[3] for b in blocks])[..., None]      # (6, c, 1)

    k1, k2, k3, k4 = jax.random.split(keys[6], 4)
    s0, b0 = _fold_bn(k1, c)
    s1, b1 = _fold_bn(k2, c)
    w1 = 0.2 * jax.random.normal(k3, (c, c), F32)
    w2 = 0.2 * jax.random.normal(k4, (c, c), F32)
    sm2_sb = jnp.stack([s0, b0, b1])[..., None]              # (3, c, 1)
    sm2_w = jnp.stack([w1 * s1[:, None], w2])                # (2, c, c)

    # stride-2 subsample (maxpool output pick) as a 0/1 selection matrix (bf16)
    sub = np.zeros((PP, PP2), np.float32)
    for q in range(P2):
        oy, ox = q // W2, q % W2
        sub[(2 * oy) * W + (2 * ox), q] = 1.0

    # bilinear upsample (align_corners=True), transposed + lane-padded (bf16)
    M = np.kron(_interp_matrix_1d(H, H2), _interp_matrix_1d(W, W2))  # (P, P2)
    upm = np.zeros((PP2, PP), np.float32)
    upm[:P2, :P] = M.T

    return dict(dw_w=dw_w, dw_b=dw_b, pw_w=pw_w, pw_b=pw_b,
                sm2_sb=sm2_sb, sm2_w=sm2_w,
                mask_a=jnp.asarray(_dw_masks(H, W, PP)),
                mask_b=jnp.asarray(_dw_masks(H2, W2, PP2)),
                sub_mat=jnp.asarray(sub, BF16),
                up_mat=jnp.asarray(upm, BF16))


if __name__ == "__main__":
    key = jax.random.PRNGKey(0)
    N, C, H, W = 2, 8, 14, 14          # size1=(14,14) as in the module default
    k_in, k_p = jax.random.split(key)

    x_nchw = jax.random.normal(k_in, (N, C, H, W), F32)   # PyTorch-style NCHW
    params = init_params(k_p, C, (H, W))

    out_nchw = jax.jit(attention_module_stage3)(x_nchw, params)
    out_nchw = jax.block_until_ready(out_nchw)

    assert out_nchw.shape == (N, C, H, W)
    assert bool(jnp.isfinite(out_nchw).all())
    print("KERNEL_OK")
</pallas_src>

<mosaic_0001>
module attributes {stable_mosaic.version = 11 : i64} {
  func.func @_fused_attention_kernel(%arg0: i32, %arg1: memref<16x256xf32, #tpu.memory_space<vmem>>, %arg2: memref<9x1x256xf32, #tpu.memory_space<vmem>>, %arg3: memref<9x1x128xf32, #tpu.memory_space<vmem>>, %arg4: memref<6x16x9xf32, #tpu.memory_space<vmem>>, %arg5: memref<6x16x1xf32, #tpu.memory_space<vmem>>, %arg6: memref<6x16x16xf32, #tpu.memory_space<vmem>>, %arg7: memref<6x16x1xf32, #tpu.memory_space<vmem>>, %arg8: memref<3x16x1xf32, #tpu.memory_space<vmem>>, %arg9: memref<2x16x16xf32, #tpu.memory_space<vmem>>, %arg10: memref<256x128xbf16, #tpu.memory_space<vmem>>, %arg11: memref<128x256xbf16, #tpu.memory_space<vmem>>, %arg12: memref<16x256xf32, #tpu.memory_space<vmem>>) attributes {dimension_semantics = [#tpu.dimension_semantics<parallel>], iteration_bounds = array<i64: 1>, scalar_prefetch = 0 : i64, scratch_operands = 0 : i64, tpu.core_type = #tpu.core_type<tc>, window_params = [{transform_indices = @transform_0, window_bounds = array<i64: 16, 256>}, {pipeline_mode = #tpu.pipeline_mode<synchronous>, transform_indices = @transform_1, window_bounds = array<i64: 9, 1, 256>}, {pipeline_mode = #tpu.pipeline_mode<synchronous>, transform_indices = @transform_2, window_bounds = array<i64: 9, 1, 128>}, {pipeline_mode = #tpu.pipeline_mode<synchronous>, transform_indices = @transform_3, window_bounds = array<i64: 6, 16, 9>}, {pipeline_mode = #tpu.pipeline_mode<synchronous>, transform_indices = @transform_4, window_bounds = array<i64: 6, 16, 1>}, {pipeline_mode = #tpu.pipeline_mode<synchronous>, transform_indices = @transform_5, window_bounds = array<i64: 6, 16, 16>}, {pipeline_mode = #tpu.pipeline_mode<synchronous>, transform_indices = @transform_6, window_bounds = array<i64: 6, 16, 1>}, {pipeline_mode = #tpu.pipeline_mode<synchronous>, transform_indices = @transform_7, window_bounds = array<i64: 3, 16, 1>}, {pipeline_mode = #tpu.pipeline_mode<synchronous>, transform_indices = @transform_8, window_bounds = array<i64: 2, 16, 16>}, {pipeline_mode = #tpu.pipeline_mode<synchronous>, transform_indices = @transform_9, window_bounds = array<i64: 256, 128>}, {pipeline_mode = #tpu.pipeline_mode<synchronous>, transform_indices = @transform_10, window_bounds = array<i64: 128, 256>}, {transform_indices = @transform_11, window_bounds = array<i64: 16, 256>}]} {
    %c0 = arith.constant 0 : index
    %c0_0 = arith.constant 0 : index
    %0 = vector.load %arg1[%c0, %c0_0] : memref<16x256xf32, #tpu.memory_space<vmem>>, vector<16x256xf32>
    %c15_i32 = arith.constant 15 : i32
    %1 = tpu.dynamic_rotate %0 by %c15_i32 dim 1 : vector<16x256xf32>, i32 -> vector<16x256xf32>
    %c0_1 = arith.constant 0 : index
    %c0_2 = arith.constant 0 : index
    %c0_3 = arith.constant 0 : index
    %2 = vector.load %arg2[%c0_1, %c0_2, %c0_3] : memref<9x1x256xf32, #tpu.memory_space<vmem>>, vector<1x1x256xf32>
    %3 = vector.shape_cast %2 : vector<1x1x256xf32> to vector<1x256xf32>
    %4 = vector.broadcast %3 : vector<1x256xf32> to vector<16x256xf32>
    %5 = arith.mulf %1, %4 : vector<16x256xf32>
    %c14_i32 = arith.constant 14 : i32
    %6 = tpu.dynamic_rotate %0 by %c14_i32 dim 1 : vector<16x256xf32>, i32 -> vector<16x256xf32>
    %c1 = arith.constant 1 : index
    %c0_4 = arith.constant 0 : index
    %c0_5 = arith.constant 0 : index
    %7 = vector.load %arg2[%c1, %c0_4, %c0_5] : memref<9x1x256xf32, #tpu.memory_space<vmem>>, vector<1x1x256xf32>
    %8 = vector.shape_cast %7 : vector<1x1x256xf32> to vector<1x256xf32>
    %9 = vector.broadcast %8 : vector<1x256xf32> to vector<16x256xf32>
    %10 = arith.mulf %6, %9 : vector<16x256xf32>
    %c13_i32 = arith.constant 13 : i32
    %11 = tpu.dynamic_rotate %0 by %c13_i32 dim 1 : vector<16x256xf32>, i32 -> vector<16x256xf32>
    %c2 = arith.constant 2 : index
    %c0_6 = arith.constant 0 : index
    %c0_7 = arith.constant 0 : index
    %12 = vector.load %arg2[%c2, %c0_6, %c0_7] : memref<9x1x256xf32, #tpu.memory_space<vmem>>, vector<1x1x256xf32>
    %13 = vector.shape_cast %12 : vector<1x1x256xf32> to vector<1x256xf32>
    %14 = vector.broadcast %13 : vector<1x256xf32> to vector<16x256xf32>
    %15 = arith.mulf %11, %14 : vector<16x256xf32>
    %c1_i32 = arith.constant 1 : i32
    %16 = tpu.dynamic_rotate %0 by %c1_i32 dim 1 : vector<16x256xf32>, i32 -> vector<16x256xf32>
    %c3 = arith.constant 3 : index
    %c0_8 = arith.constant 0 : index
    %c0_9 = arith.constant 0 : index
    %17 = vector.load %arg2[%c3, %c0_8, %c0_9] : memref<9x1x256xf32, #tpu.memory_space<vmem>>, vector<1x1x256xf32>
    %18 = vector.shape_cast %17 : vector<1x1x256xf32> to vector<1x256xf32>
    %19 = vector.broadcast %18 : vector<1x256xf32> to vector<16x256xf32>
    %20 = arith.mulf %16, %19 : vector<16x256xf32>
    %c4 = arith.constant 4 : index
    %c0_10 = arith.constant 0 : index
    %c0_11 = arith.constant 0 : index
    %21 = vector.load %arg2[%c4, %c0_10, %c0_11] : memref<9x1x256xf32, #tpu.memory_space<vmem>>, vector<1x1x256xf32>
    %22 = vector.shape_cast %21 : vector<1x1x256xf32> to vector<1x256xf32>
    %23 = vector.broadcast %22 : vector<1x256xf32> to vector<16x256xf32>
    %24 = arith.mulf %0, %23 : vector<16x256xf32>
    %c255_i32 = arith.constant 255 : i32
    %25 = tpu.dynamic_rotate %0 by %c255_i32 dim 1 : vector<16x256xf32>, i32 -> vector<16x256xf32>
    %c5 = arith.constant 5 : index
    %c0_12 = arith.constant 0 : index
    %c0_13 = arith.constant 0 : index
    %26 = vector.load %arg2[%c5, %c0_12, %c0_13] : memref<9x1x256xf32, #tpu.memory_space<vmem>>, vector<1x1x256xf32>
    %27 = vector.shape_cast %26 : vector<1x1x256xf32> to vector<1x256xf32>
    %28 = vector.broadcast %27 : vector<1x256xf32> to vector<16x256xf32>
    %29 = arith.mulf %25, %28 : vector<16x256xf32>
    %c243_i32 = arith.constant 243 : i32
    %30 = tpu.dynamic_rotate %0 by %c243_i32 dim 1 : vector<16x256xf32>, i32 -> vector<16x256xf32>
    %c6 = arith.constant 6 : index
    %c0_14 = arith.constant 0 : index
    %c0_15 = arith.constant 0 : index
    %31 = vector.load %arg2[%c6, %c0_14, %c0_15] : memref<9x1x256xf32, #tpu.memory_space<vmem>>, vector<1x1x256xf32>
    %32 = vector.shape_cast %31 : vector<1x1x256xf32> to vector<1x256xf32>
    %33 = vector.broadcast %32 : vector<1x256xf32> to vector<16x256xf32>
    %34 = arith.mulf %30, %33 : vector<16x256xf32>
    %c242_i32 = arith.constant 242 : i32
    %35 = tpu.dynamic_rotate %0 by %c242_i32 dim 1 : vector<16x256xf32>, i32 -> vector<16x256xf32>
    %c7 = arith.constant 7 : index
    %c0_16 = arith.constant 0 : index
    %c0_17 = arith.constant 0 : index
    %36 = vector.load %arg2[%c7, %c0_16, %c0_17] : memref<9x1x256xf32, #tpu.memory_space<vmem>>, vector<1x1x256xf32>
    %37 = vector.shape_cast %36 : vector<1x1x256xf32> to vector<1x256xf32>
    %38 = vector.broadcast %37 : vector<1x256xf32> to vector<16x256xf32>
    %39 = arith.mulf %35, %38 : vector<16x256xf32>
    %c241_i32 = arith.constant 241 : i32
    %40 = tpu.dynamic_rotate %0 by %c241_i32 dim 1 : vector<16x256xf32>, i32 -> vector<16x256xf32>
    %c8 = arith.constant 8 : index
    %c0_18 = arith.constant 0 : index
    %c0_19 = arith.constant 0 : index
    %41 = vector.load %arg2[%c8, %c0_18, %c0_19] : memref<9x1x256xf32, #tpu.memory_space<vmem>>, vector<1x1x256xf32>
    %42 = vector.shape_cast %41 : vector<1x1x256xf32> to vector<1x256xf32>
    %43 = vector.broadcast %42 : vector<1x256xf32> to vector<16x256xf32>
    %44 = arith.mulf %40, %43 : vector<16x256xf32>
    %c0_20 = arith.constant 0 : index
    %c0_21 = arith.constant 0 : index
    %c0_22 = arith.constant 0 : index
    %45 = vector.load %arg4[%c0_20, %c0_21, %c0_22] : memref<6x16x9xf32, #tpu.memory_space<vmem>>, vector<1x16x9xf32>
    %46 = vector.shape_cast %45 : vector<1x16x9xf32> to vector<16x9xf32>
    %47 = vector.extract_strided_slice %46 {offsets = [0, 0], sizes = [16, 1], strides = [1, 1]} : vector<16x9xf32> to vector<16x1xf32>
    %48 = vector.broadcast %47 : vector<16x1xf32> to vector<16x256xf32>
    %49 = arith.mulf %48, %5 : vector<16x256xf32>
    %50 = vector.extract_strided_slice %46 {offsets = [0, 1], sizes = [16, 1], strides = [1, 1]} : vector<16x9xf32> to vector<16x1xf32>
    %51 = vector.broadcast %50 : vector<16x1xf32> to vector<16x256xf32>
    %52 = arith.mulf %51, %10 : vector<16x256xf32>
    %53 = arith.addf %49, %52 : vector<16x256xf32>
    %54 = vector.extract_strided_slice %46 {offsets = [0, 2], sizes = [16, 1], strides = [1, 1]} : vector<16x9xf32> to vector<16x1xf32>
    %55 = vector.broadcast %54 : vector<16x1xf32> to vector<16x256xf32>
    %56 = arith.mulf %55, %15 : vector<16x256xf32>
    %57 = arith.addf %53, %56 : vector<16x256xf32>
    %58 = vector.extract_strided_slice %46 {offsets = [0, 3], sizes = [16, 1], strides = [1, 1]} : vector<16x9xf32> to vector<16x1xf32>
    %59 = vector.broadcast %58 : vector<16x1xf32> to vector<16x256xf32>
    %60 = arith.mulf %59, %20 : vector<16x256xf32>
    %61 = arith.addf %57, %60 : vector<16x256xf32>
    %62 = vector.extract_strided_slice %46 {offsets = [0, 4], sizes = [16, 1], strides = [1, 1]} : vector<16x9xf32> to vector<16x1xf32>
    %63 = vector.broadcast %62 : vector<16x1xf32> to vector<16x256xf32>
    %64 = arith.mulf %63, %24 : vector<16x256xf32>
    %65 = arith.addf %61, %64 : vector<16x256xf32>
    %66 = vector.extract_strided_slice %46 {offsets = [0, 5], sizes = [16, 1], strides = [1, 1]} : vector<16x9xf32> to vector<16x1xf32>
    %67 = vector.broadcast %66 : vector<16x1xf32> to vector<16x256xf32>
    %68 = arith.mulf %67, %29 : vector<16x256xf32>
    %69 = arith.addf %65, %68 : vector<16x256xf32>
    %70 = vector.extract_strided_slice %46 {offsets = [0, 6], sizes = [16, 1], strides = [1, 1]} : vector<16x9xf32> to vector<16x1xf32>
    %71 = vector.broadcast %70 : vector<16x1xf32> to vector<16x256xf32>
    %72 = arith.mulf %71, %34 : vector<16x256xf32>
    %73 = arith.addf %69, %72 : vector<16x256xf32>
    %74 = vector.extract_strided_slice %46 {offsets = [0, 7], sizes = [16, 1], strides = [1, 1]} : vector<16x9xf32> to vector<16x1xf32>
    %75 = vector.broadcast %74 : vector<16x1xf32> to vector<16x256xf32>
    %76 = arith.mulf %75, %39 : vector<16x256xf32>
    %77 = arith.addf %73, %76 : vector<16x256xf32>
    %78 = vector.extract_strided_slice %46 {offsets = [0, 8], sizes = [16, 1], strides = [1, 1]} : vector<16x9xf32> to vector<16x1xf32>
    %79 = vector.broadcast %78 : vector<16x1xf32> to vector<16x256xf32>
    %80 = arith.mulf %79, %44 : vector<16x256xf32>
    %81 = arith.addf %77, %80 : vector<16x256xf32>
    %c0_23 = arith.constant 0 : index
    %c0_24 = arith.constant 0 : index
    %c0_25 = arith.constant 0 : index
    %82 = vector.load %arg5[%c0_23, %c0_24, %c0_25] : memref<6x16x1xf32, #tpu.memory_space<vmem>>, vector<1x16x1xf32>
    %83 = vector.shape_cast %82 : vector<1x16x1xf32> to vector<16x1xf32>
    %84 = vector.broadcast %83 : vector<16x1xf32> to vector<16x256xf32>
    %85 = arith.addf %81, %84 : vector<16x256xf32>
    %cst = arith.constant 0.000000e+00 : f32
    %cst_26 = arith.constant 6.000000e+00 : f32
    %86 = vector.broadcast %cst : f32 to vector<16x256xf32>
    %87 = arith.maximumf %86, %85 : vector<16x256xf32>
    %88 = vector.broadcast %cst_26 : f32 to vector<16x256xf32>
    %89 = arith.minimumf %88, %87 : vector<16x256xf32>
    %c0_27 = arith.constant 0 : index
    %c0_28 = arith.constant 0 : index
    %c0_29 = arith.constant 0 : index
    %90 = vector.load %arg6[%c0_27, %c0_28, %c0_29] : memref<6x16x16xf32, #tpu.memory_space<vmem>>, vector<1x16x16xf32>
    %91 = vector.shape_cast %90 : vector<1x16x16xf32> to vector<16x16xf32>
    %cst_30 = arith.constant dense<0.000000e+00> : vector<16x256xf32>
    %92 = tpu.matmul %91, %89, %cst_30 {dimension_numbers = #tpu.dot_dimension_numbers<[1], [0], [0], [1], [0, 0, 1, 1], [], []>} : vector<16x16xf32>, vector<16x256xf32>, vector<16x256xf32> -> vector<16x256xf32>
    %c0_31 = arith.constant 0 : index
    %c0_32 = arith.constant 0 : index
    %c0_33 = arith.constant 0 : index
    %93 = vector.load %arg7[%c0_31, %c0_32, %c0_33] : memref<6x16x1xf32, #tpu.memory_space<vmem>>, vector<1x16x1xf32>
    %94 = vector.shape_cast %93 : vector<1x16x1xf32> to vector<16x1xf32>
    %95 = vector.broadcast %94 : vector<16x1xf32> to vector<16x256xf32>
    %96 = arith.addf %92, %95 : vector<16x256xf32>
    %cst_34 = arith.constant 0.000000e+00 : f32
    %cst_35 = arith.constant 6.000000e+00 : f32
    %97 = vector.broadcast %cst_34 : f32 to vector<16x256xf32>
    %98 = arith.maximumf %97, %96 : vector<16x256xf32>
    %99 = vector.broadcast %cst_35 : f32 to vector<16x256xf32>
    %100 = arith.minimumf %99, %98 : vector<16x256xf32>
    %c15_i32_36 = arith.constant 15 : i32
    %101 = tpu.dynamic_rotate %100 by %c15_i32_36 dim 1 : vector<16x256xf32>, i32 -> vector<16x256xf32>
    %c0_37 = arith.constant 0 : index
    %c0_38 = arith.constant 0 : index
    %c0_39 = arith.constant 0 : index
    %102 = vector.load %arg2[%c0_37, %c0_38, %c0_39] : memref<9x1x256xf32, #tpu.memory_space<vmem>>, vector<1x1x256xf32>
    %103 = vector.shape_cast %102 : vector<1x1x256xf32> to vector<1x256xf32>
    %104 = vector.broadcast %103 : vector<1x256xf32> to vector<16x256xf32>
    %105 = arith.mulf %101, %104 : vector<16x256xf32>
    %c14_i32_40 = arith.constant 14 : i32
    %106 = tpu.dynamic_rotate %100 by %c14_i32_40 dim 1 : vector<16x256xf32>, i32 -> vector<16x256xf32>
    %c1_41 = arith.constant 1 : index
    %c0_42 = arith.constant 0 : index
    %c0_43 = arith.constant 0 : index
    %107 = vector.load %arg2[%c1_41, %c0_42, %c0_43] : memref<9x1x256xf32, #tpu.memory_space<vmem>>, vector<1x1x256xf32>
    %108 = vector.shape_cast %107 : vector<1x1x256xf32> to vector<1x256xf32>
    %109 = vector.broadcast %108 : vector<1x256xf32> to vector<16x256xf32>
    %110 = arith.mulf %106, %109 : vector<16x256xf32>
    %c13_i32_44 = arith.constant 13 : i32
    %111 = tpu.dynamic_rotate %100 by %c13_i32_44 dim 1 : vector<16x256xf32>, i32 -> vector<16x256xf32>
    %c2_45 = arith.constant 2 : index
    %c0_46 = arith.constant 0 : index
    %c0_47 = arith.constant 0 : index
    %112 = vector.load %arg2[%c2_45, %c0_46, %c0_47] : memref<9x1x256xf32, #tpu.memory_space<vmem>>, vector<1x1x256xf32>
    %113 = vector.shape_cast %112 : vector<1x1x256xf32> to vector<1x256xf32>
    %114 = vector.broadcast %113 : vector<1x256xf32> to vector<16x256xf32>
    %115 = arith.mulf %111, %114 : vector<16x256xf32>
    %c1_i32_48 = arith.constant 1 : i32
    %116 = tpu.dynamic_rotate %100 by %c1_i32_48 dim 1 : vector<16x256xf32>, i32 -> vector<16x256xf32>
    %c3_49 = arith.constant 3 : index
    %c0_50 = arith.constant 0 : index
    %c0_51 = arith.constant 0 : index
    %117 = vector.load %arg2[%c3_49, %c0_50, %c0_51] : memref<9x1x256xf32, #tpu.memory_space<vmem>>, vector<1x1x256xf32>
    %118 = vector.shape_cast %117 : vector<1x1x256xf32> to vector<1x256xf32>
    %119 = vector.broadcast %118 : vector<1x256xf32> to vector<16x256xf32>
    %120 = arith.mulf %116, %119 : vector<16x256xf32>
    %c4_52 = arith.constant 4 : index
    %c0_53 = arith.constant 0 : index
    %c0_54 = arith.constant 0 : index
    %121 = vector.load %arg2[%c4_52, %c0_53, %c0_54] : memref<9x1x256xf32, #tpu.memory_space<vmem>>, vector<1x1x256xf32>
    %122 = vector.shape_cast %121 : vector<1x1x256xf32> to vector<1x256xf32>
    %123 = vector.broadcast %122 : vector<1x256xf32> to vector<16x256xf32>
    %124 = arith.mulf %100, %123 : vector<16x256xf32>
    %c255_i32_55 = arith.constant 255 : i32
    %125 = tpu.dynamic_rotate %100 by %c255_i32_55 dim 1 : vector<16x256xf32>, i32 -> vector<16x256xf32>
    %c5_56 = arith.constant 5 : index
    %c0_57 = arith.constant 0 : index
    %c0_58 = arith.constant 0 : index
    %126 = vector.load %arg2[%c5_56, %c0_57, %c0_58] : memref<9x1x256xf32, #tpu.memory_space<vmem>>, vector<1x1x256xf32>
    %127 = vector.shape_cast %126 : vector<1x1x256xf32> to vector<1x256xf32>
    %128 = vector.broadcast %127 : vector<1x256xf32> to vector<16x256xf32>
    %129 = arith.mulf %125, %128 : vector<16x256xf32>
    %c243_i32_59 = arith.constant 243 : i32
    %130 = tpu.dynamic_rotate %100 by %c243_i32_59 dim 1 : vector<16x256xf32>, i32 -> vector<16x256xf32>
    %c6_60 = arith.constant 6 : index
    %c0_61 = arith.constant 0 : index
    %c0_62 = arith.constant 0 : index
    %131 = vector.load %arg2[%c6_60, %c0_61, %c0_62] : memref<9x1x256xf32, #tpu.memory_space<vmem>>, vector<1x1x256xf32>
    %132 = vector.shape_cast %131 : vector<1x1x256xf32> to vector<1x256xf32>
    %133 = vector.broadcast %132 : vector<1x256xf32> to vector<16x256xf32>
    %134 = arith.mulf %130, %133 : vector<16x256xf32>
    %c242_i32_63 = arith.constant 242 : i32
    %135 = tpu.dynamic_rotate %100 by %c242_i32_63 dim 1 : vector<16x256xf32>, i32 -> vector<16x256xf32>
    %c7_64 = arith.constant 7 : index
    %c0_65 = arith.constant 0 : index
    %c0_66 = arith.constant 0 : index
    %136 = vector.load %arg2[%c7_64, %c0_65, %c0_66] : memref<9x1x256xf32, #tpu.memory_space<vmem>>, vector<1x1x256xf32>
    %137 = vector.shape_cast %136 : vector<1x1x256xf32> to vector<1x256xf32>
    %138 = vector.broadcast %137 : vector<1x256xf32> to vector<16x256xf32>
    %139 = arith.mulf %135, %138 : vector<16x256xf32>
    %c241_i32_67 = arith.constant 241 : i32
    %140 = tpu.dynamic_rotate %100 by %c241_i32_67 dim 1 : vector<16x256xf32>, i32 -> vector<16x256xf32>
    %c8_68 = arith.constant 8 : index
    %c0_69 = arith.constant 0 : index
    %c0_70 = arith.constant 0 : index
    %141 = vector.load %arg2[%c8_68, %c0_69, %c0_70] : memref<9x1x256xf32, #tpu.memory_space<vmem>>, vector<1x1x256xf32>
    %142 = vector.shape_cast %141 : vector<1x1x256xf32> to vector<1x256xf32>
    %143 = vector.broadcast %142 : vector<1x256xf32> to vector<16x256xf32>
    %144 = arith.mulf %140, %143 : vector<16x256xf32>
    %c1_71 = arith.constant 1 : index
    %c0_72 = arith.constant 0 : index
    %c0_73 = arith.constant 0 : index
    %145 = vector.load %arg4[%c1_71, %c0_72, %c0_73] : memref<6x16x9xf32, #tpu.memory_space<vmem>>, vector<1x16x9xf32>
    %146 = vector.shape_cast %145 : vector<1x16x9xf32> to vector<16x9xf32>
    %147 = vector.extract_strided_slice %146 {offsets = [0, 0], sizes = [16, 1], strides = [1, 1]} : vector<16x9xf32> to vector<16x1xf32>
    %148 = vector.broadcast %147 : vector<16x1xf32> to vector<16x256xf32>
    %149 = arith.mulf %148, %105 : vector<16x256xf32>
    %150 = vector.extract_strided_slice %146 {offsets = [0, 1], sizes = [16, 1], strides = [1, 1]} : vector<16x9xf32> to vector<16x1xf32>
    %151 = vector.broadcast %150 : vector<16x1xf32> to vector<16x256xf32>
    %152 = arith.mulf %151, %110 : vector<16x256xf32>
    %153 = arith.addf %149, %152 : vector<16x256xf32>
    %154 = vector.extract_strided_slice %146 {offsets = [0, 2], sizes = [16, 1], strides = [1, 1]} : vector<16x9xf32> to vector<16x1xf32>
    %155 = vector.broadcast %154 : vector<16x1xf32> to vector<16x256xf32>
    %156 = arith.mulf %155, %115 : vector<16x256xf32>
    %157 = arith.addf %153, %156 : vector<16x256xf32>
    %158 = vector.extract_strided_slice %146 {offsets = [0, 3], sizes = [16, 1], strides = [1, 1]} : vector<16x9xf32> to vector<16x1xf32>
    %159 = vector.broadcast %158 : vector<16x1xf32> to vector<16x256xf32>
    %160 = arith.mulf %159, %120 : vector<16x256xf32>
    %161 = arith.addf %157, %160 : vector<16x256xf32>
    %162 = vector.extract_strided_slice %146 {offsets = [0, 4], sizes = [16, 1], strides = [1, 1]} : vector<16x9xf32> to vector<16x1xf32>
    %163 = vector.broadcast %162 : vector<16x1xf32> to vector<16x256xf32>
    %164 = arith.mulf %163, %124 : vector<16x256xf32>
    %165 = arith.addf %161, %164 : vector<16x256xf32>
    %166 = vector.extract_strided_slice %146 {offsets = [0, 5], sizes = [16, 1], strides = [1, 1]} : vector<16x9xf32> to vector<16x1xf32>
    %167 = vector.broadcast %166 : vector<16x1xf32> to vector<16x256xf32>
    %168 = arith.mulf %167, %129 : vector<16x256xf32>
    %169 = arith.addf %165, %168 : vector<16x256xf32>
    %170 = vector.extract_strided_slice %146 {offsets = [0, 6], sizes = [16, 1], strides = [1, 1]} : vector<16x9xf32> to vector<16x1xf32>
    %171 = vector.broadcast %170 : vector<16x1xf32> to vector<16x256xf32>
    %172 = arith.mulf %171, %134 : vector<16x256xf32>
    %173 = arith.addf %169, %172 : vector<16x256xf32>
    %174 = vector.extract_strided_slice %146 {offsets = [0, 7], sizes = [16, 1], strides = [1, 1]} : vector<16x9xf32> to vector<16x1xf32>
    %175 = vector.broadcast %174 : vector<16x1xf32> to vector<16x256xf32>
    %176 = arith.mulf %175, %139 : vector<16x256xf32>
    %177 = arith.addf %173, %176 : vector<16x256xf32>
    %178 = vector.extract_strided_slice %146 {offsets = [0, 8], sizes = [16, 1], strides = [1, 1]} : vector<16x9xf32> to vector<16x1xf32>
    %179 = vector.broadcast %178 : vector<16x1xf32> to vector<16x256xf32>
    %180 = arith.mulf %179, %144 : vector<16x256xf32>
    %181 = arith.addf %177, %180 : vector<16x256xf32>
    %c1_74 = arith.constant 1 : index
    %c0_75 = arith.constant 0 : index
    %c0_76 = arith.constant 0 : index
    %182 = vector.load %arg5[%c1_74, %c0_75, %c0_76] : memref<6x16x1xf32, #tpu.memory_space<vmem>>, vector<1x16x1xf32>
    %183 = vector.shape_cast %182 : vector<1x16x1xf32> to vector<16x1xf32>
    %184 = vector.broadcast %183 : vector<16x1xf32> to vector<16x256xf32>
    %185 = arith.addf %181, %184 : vector<16x256xf32>
    %cst_77 = arith.constant 0.000000e+00 : f32
    %cst_78 = arith.constant 6.000000e+00 : f32
    %186 = vector.broadcast %cst_77 : f32 to vector<16x256xf32>
    %187 = arith.maximumf %186, %185 : vector<16x256xf32>
    %188 = vector.broadcast %cst_78 : f32 to vector<16x256xf32>
    %189 = arith.minimumf %188, %187 : vector<16x256xf32>
    %c1_79 = arith.constant 1 : index
    %c0_80 = arith.constant 0 : index
    %c0_81 = arith.constant 0 : index
    %190 = vector.load %arg6[%c1_79, %c0_80, %c0_81] : memref<6x16x16xf32, #tpu.memory_space<vmem>>, vector<1x16x16xf32>
    %191 = vector.shape_cast %190 : vector<1x16x16xf32> to vector<16x16xf32>
    %cst_82 = arith.constant dense<0.000000e+00> : vector<16x256xf32>
    %192 = tpu.matmul %191, %189, %cst_82 {dimension_numbers = #tpu.dot_dimension_numbers<[1], [0], [0], [1], [0, 0, 1, 1], [], []>} : vector<16x16xf32>, vector<16x256xf32>, vector<16x256xf32> -> vector<16x256xf32>
    %c1_83 = arith.constant 1 : index
    %c0_84 = arith.constant 0 : index
    %c0_85 = arith.constant 0 : index
    %193 = vector.load %arg7[%c1_83, %c0_84, %c0_85] : memref<6x16x1xf32, #tpu.memory_space<vmem>>, vector<1x16x1xf32>
    %194 = vector.shape_cast %193 : vector<1x16x1xf32> to vector<16x1xf32>
    %195 = vector.broadcast %194 : vector<16x1xf32> to vector<16x256xf32>
    %196 = arith.addf %192, %195 : vector<16x256xf32>
    %cst_86 = arith.constant 0.000000e+00 : f32
    %cst_87 = arith.constant 6.000000e+00 : f32
    %197 = vector.broadcast %cst_86 : f32 to vector<16x256xf32>
    %198 = arith.maximumf %197, %196 : vector<16x256xf32>
    %199 = vector.broadcast %cst_87 : f32 to vector<16x256xf32>
    %200 = arith.minimumf %199, %198 : vector<16x256xf32>
    %c15_i32_88 = arith.constant 15 : i32
    %201 = tpu.dynamic_rotate %200 by %c15_i32_88 dim 1 : vector<16x256xf32>, i32 -> vector<16x256xf32>
    %c0_89 = arith.constant 0 : index
    %c0_90 = arith.constant 0 : index
    %c0_91 = arith.constant 0 : index
    %202 = vector.load %arg2[%c0_89, %c0_90, %c0_91] : memref<9x1x256xf32, #tpu.memory_space<vmem>>, vector<1x1x256xf32>
    %203 = vector.shape_cast %202 : vector<1x1x256xf32> to vector<1x256xf32>
    %204 = vector.broadcast %203 : vector<1x256xf32> to vector<16x256xf32>
    %205 = arith.mulf %201, %204 : vector<16x256xf32>
    %c14_i32_92 = arith.constant 14 : i32
    %206 = tpu.dynamic_rotate %200 by %c14_i32_92 dim 1 : vector<16x256xf32>, i32 -> vector<16x256xf32>
    %c1_93 = arith.constant 1 : index
    %c0_94 = arith.constant 0 : index
    %c0_95 = arith.constant 0 : index
    %207 = vector.load %arg2[%c1_93, %c0_94, %c0_95] : memref<9x1x256xf32, #tpu.memory_space<vmem>>, vector<1x1x256xf32>
    %208 = vector.shape_cast %207 : vector<1x1x256xf32> to vector<1x256xf32>
    %209 = vector.broadcast %208 : vector<1x256xf32> to vector<16x256xf32>
    %210 = arith.mulf %206, %209 : vector<16x256xf32>
    %c13_i32_96 = arith.constant 13 : i32
    %211 = tpu.dynamic_rotate %200 by %c13_i32_96 dim 1 : vector<16x256xf32>, i32 -> vector<16x256xf32>
    %c2_97 = arith.constant 2 : index
    %c0_98 = arith.constant 0 : index
    %c0_99 = arith.constant 0 : index
    %212 = vector.load %arg2[%c2_97, %c0_98, %c0_99] : memref<9x1x256xf32, #tpu.memory_space<vmem>>, vector<1x1x256xf32>
    %213 = vector.shape_cast %212 : vector<1x1x256xf32> to vector<1x256xf32>
    %214 = vector.broadcast %213 : vector<1x256xf32> to vector<16x256xf32>
    %215 = arith.mulf %211, %214 : vector<16x256xf32>
    %c1_i32_100 = arith.constant 1 : i32
    %216 = tpu.dynamic_rotate %200 by %c1_i32_100 dim 1 : vector<16x256xf32>, i32 -> vector<16x256xf32>
    %c3_101 = arith.constant 3 : index
    %c0_102 = arith.constant 0 : index
    %c0_103 = arith.constant 0 : index
    %217 = vector.load %arg2[%c3_101, %c0_102, %c0_103] : memref<9x1x256xf32, #tpu.memory_space<vmem>>, vector<1x1x256xf32>
    %218 = vector.shape_cast %217 : vector<1x1x256xf32> to vector<1x256xf32>
    %219 = vector.broadcast %218 : vector<1x256xf32> to vector<16x256xf32>
    %220 = arith.mulf %216, %219 : vector<16x256xf32>
    %c4_104 = arith.constant 4 : index
    %c0_105 = arith.constant 0 : index
    %c0_106 = arith.constant 0 : index
    %221 = vector.load %arg2[%c4_104, %c0_105, %c0_106] : memref<9x1x256xf32, #tpu.memory_space<vmem>>, vector<1x1x256xf32>
    %222 = vector.shape_cast %221 : vector<1x1x256xf32> to vector<1x256xf32>
    %223 = vector.broadcast %222 : vector<1x256xf32> to vector<16x256xf32>
    %224 = arith.mulf %200, %223 : vector<16x256xf32>
    %c255_i32_107 = arith.constant 255 : i32
    %225 = tpu.dynamic_rotate %200 by %c255_i32_107 dim 1 : vector<16x256xf32>, i32 -> vector<16x256xf32>
    %c5_108 = arith.constant 5 : index
    %c0_109 = arith.constant 0 : index
    %c0_110 = arith.constant 0 : index
    %226 = vector.load %arg2[%c5_108, %c0_109, %c0_110] : memref<9x1x256xf32, #tpu.memory_space<vmem>>, vector<1x1x256xf32>
    %227 = vector.shape_cast %226 : vector<1x1x256xf32> to vector<1x256xf32>
    %228 = vector.broadcast %227 : vector<1x256xf32> to vector<16x256xf32>
    %229 = arith.mulf %225, %228 : vector<16x256xf32>
    %c243_i32_111 = arith.constant 243 : i32
    %230 = tpu.dynamic_rotate %200 by %c243_i32_111 dim 1 : vector<16x256xf32>, i32 -> vector<16x256xf32>
    %c6_112 = arith.constant 6 : index
    %c0_113 = arith.constant 0 : index
    %c0_114 = arith.constant 0 : index
    %231 = vector.load %arg2[%c6_112, %c0_113, %c0_114] : memref<9x1x256xf32, #tpu.memory_space<vmem>>, vector<1x1x256xf32>
    %232 = vector.shape_cast %231 : vector<1x1x256xf32> to vector<1x256xf32>
    %233 = vector.broadcast %232 : vector<1x256xf32> to vector<16x256xf32>
    %234 = arith.mulf %230, %233 : vector<16x256xf32>
    %c242_i32_115 = arith.constant 242 : i32
    %235 = tpu.dynamic_rotate %200 by %c242_i32_115 dim 1 : vector<16x256xf32>, i32 -> vector<16x256xf32>
    %c7_116 = arith.constant 7 : index
    %c0_117 = arith.constant 0 : index
    %c0_118 = arith.constant 0 : index
    %236 = vector.load %arg2[%c7_116, %c0_117, %c0_118] : memref<9x1x256xf32, #tpu.memory_space<vmem>>, vector<1x1x256xf32>
    %237 = vector.shape_cast %236 : vector<1x1x256xf32> to vector<1x256xf32>
    %238 = vector.broadcast %237 : vector<1x256xf32> to vector<16x256xf32>
    %239 = arith.mulf %235, %238 : vector<16x256xf32>
    %c241_i32_119 = arith.constant 241 : i32
    %240 = tpu.dynamic_rotate %200 by %c241_i32_119 dim 1 : vector<16x256xf32>, i32 -> vector<16x256xf32>
    %c8_120 = arith.constant 8 : index
    %c0_121 = arith.constant 0 : index
    %c0_122 = arith.constant 0 : index
    %241 = vector.load %arg2[%c8_120, %c0_121, %c0_122] : memref<9x1x256xf32, #tpu.memory_space<vmem>>, vector<1x1x256xf32>
    %242 = vector.shape_cast %241 : vector<1x1x256xf32> to vector<1x256xf32>
    %243 = vector.broadcast %242 : vector<1x256xf32> to vector<16x256xf32>
    %244 = arith.mulf %240, %243 : vector<16x256xf32>
    %c2_123 = arith.constant 2 : index
    %c0_124 = arith.constant 0 : index
    %c0_125 = arith.constant 0 : index
    %245 = vector.load %arg4[%c2_123, %c0_124, %c0_125] : memref<6x16x9xf32, #tpu.memory_space<vmem>>, vector<1x16x9xf32>
    %246 = vector.shape_cast %245 : vector<1x16x9xf32> to vector<16x9xf32>
    %247 = vector.extract_strided_slice %246 {offsets = [0, 0], sizes = [16, 1], strides = [1, 1]} : vector<16x9xf32> to vector<16x1xf32>
    %248 = vector.broadcast %247 : vector<16x1xf32> to vector<16x256xf32>
    %249 = arith.mulf %248, %205 : vector<16x256xf32>
    %250 = vector.extract_strided_slice %246 {offsets = [0, 1], sizes = [16, 1], strides = [1, 1]} : vector<16x9xf32> to vector<16x1xf32>
    %251 = vector.broadcast %250 : vector<16x1xf32> to vector<16x256xf32>
    %252 = arith.mulf %251, %210 : vector<16x256xf32>
    %253 = arith.addf %249, %252 : vector<16x256xf32>
    %254 = vector.extract_strided_slice %246 {offsets = [0, 2], sizes = [16, 1], strides = [1, 1]} : vector<16x9xf32> to vector<16x1xf32>
    %255 = vector.broadcast %254 : vector<16x1xf32> to vector<16x256xf32>
    %256 = arith.mulf %255, %215 : vector<16x256xf32>
    %257 = arith.addf %253, %256 : vector<16x256xf32>
    %258 = vector.extract_strided_slice %246 {offsets = [0, 3], sizes = [16, 1], strides = [1, 1]} : vector<16x9xf32> to vector<16x1xf32>
    %259 = vector.broadcast %258 : vector<16x1xf32> to vector<16x256xf32>
    %260 = arith.mulf %259, %220 : vector<16x256xf32>
    %261 = arith.addf %257, %260 : vector<16x256xf32>
    %262 = vector.extract_strided_slice %246 {offsets = [0, 4], sizes = [16, 1], strides = [1, 1]} : vector<16x9xf32> to vector<16x1xf32>
    %263 = vector.broadcast %262 : vector<16x1xf32> to vector<16x256xf32>
    %264 = arith.mulf %263, %224 : vector<16x256xf32>
    %265 = arith.addf %261, %264 : vector<16x256xf32>
    %266 = vector.extract_strided_slice %246 {offsets = [0, 5], sizes = [16, 1], strides = [1, 1]} : vector<16x9xf32> to vector<16x1xf32>
    %267 = vector.broadcast %266 : vector<16x1xf32> to vector<16x256xf32>
    %268 = arith.mulf %267, %229 : vector<16x256xf32>
    %269 = arith.addf %265, %268 : vector<16x256xf32>
    %270 = vector.extract_strided_slice %246 {offsets = [0, 6], sizes = [16, 1], strides = [1, 1]} : vector<16x9xf32> to vector<16x1xf32>
    %271 = vector.broadcast %270 : vector<16x1xf32> to vector<16x256xf32>
    %272 = arith.mulf %271, %234 : vector<16x256xf32>
    %273 = arith.addf %269, %272 : vector<16x256xf32>
    %274 = vector.extract_strided_slice %246 {offsets = [0, 7], sizes = [16, 1], strides = [1, 1]} : vector<16x9xf32> to vector<16x1xf32>
    %275 = vector.broadcast %274 : vector<16x1xf32> to vector<16x256xf32>
    %276 = arith.mulf %275, %239 : vector<16x256xf32>
    %277 = arith.addf %273, %276 : vector<16x256xf32>
    %278 = vector.extract_strided_slice %246 {offsets = [0, 8], sizes = [16, 1], strides = [1, 1]} : vector<16x9xf32> to vector<16x1xf32>
    %279 = vector.broadcast %278 : vector<16x1xf32> to vector<16x256xf32>
    %280 = arith.mulf %279, %244 : vector<16x256xf32>
    %281 = arith.addf %277, %280 : vector<16x256xf32>
    %c2_126 = arith.constant 2 : index
    %c0_127 = arith.constant 0 : index
    %c0_128 = arith.constant 0 : index
    %282 = vector.load %arg5[%c2_126, %c0_127, %c0_128] : memref<6x16x1xf32, #tpu.memory_space<vmem>>, vector<1x16x1xf32>
    %283 = vector.shape_cast %282 : vector<1x16x1xf32> to vector<16x1xf32>
    %284 = vector.broadcast %283 : vector<16x1xf32> to vector<16x256xf32>
    %285 = arith.addf %281, %284 : vector<16x256xf32>
    %cst_129 = arith.constant 0.000000e+00 : f32
    %cst_130 = arith.constant 6.000000e+00 : f32
    %286 = vector.broadcast %cst_129 : f32 to vector<16x256xf32>
    %287 = arith.maximumf %286, %285 : vector<16x256xf32>
    %288 = vector.broadcast %cst_130 : f32 to vector<16x256xf32>
    %289 = arith.minimumf %288, %287 : vector<16x256xf32>
    %c2_131 = arith.constant 2 : index
    %c0_132 = arith.constant 0 : index
    %c0_133 = arith.constant 0 : index
    %290 = vector.load %arg6[%c2_131, %c0_132, %c0_133] : memref<6x16x16xf32, #tpu.memory_space<vmem>>, vector<1x16x16xf32>
    %291 = vector.shape_cast %290 : vector<1x16x16xf32> to vector<16x16xf32>
    %cst_134 = arith.constant dense<0.000000e+00> : vector<16x256xf32>
    %292 = tpu.matmul %291, %289, %cst_134 {dimension_numbers = #tpu.dot_dimension_numbers<[1], [0], [0], [1], [0, 0, 1, 1], [], []>} : vector<16x16xf32>, vector<16x256xf32>, vector<16x256xf32> -> vector<16x256xf32>
    %c2_135 = arith.constant 2 : index
    %c0_136 = arith.constant 0 : index
    %c0_137 = arith.constant 0 : index
    %293 = vector.load %arg7[%c2_135, %c0_136, %c0_137] : memref<6x16x1xf32, #tpu.memory_space<vmem>>, vector<1x16x1xf32>
    %294 = vector.shape_cast %293 : vector<1x16x1xf32> to vector<16x1xf32>
    %295 = vector.broadcast %294 : vector<16x1xf32> to vector<16x256xf32>
    %296 = arith.addf %292, %295 : vector<16x256xf32>
    %cst_138 = arith.constant 0.000000e+00 : f32
    %cst_139 = arith.constant 6.000000e+00 : f32
    %297 = vector.broadcast %cst_138 : f32 to vector<16x256xf32>
    %298 = arith.maximumf %297, %296 : vector<16x256xf32>
    %299 = vector.broadcast %cst_139 : f32 to vector<16x256xf32>
    %300 = arith.minimumf %299, %298 : vector<16x256xf32>
    %301 = arith.maximumf %105, %110 : vector<16x256xf32>
    %302 = arith.maximumf %301, %115 : vector<16x256xf32>
    %303 = arith.maximumf %302, %120 : vector<16x256xf32>
    %304 = arith.maximumf %303, %124 : vector<16x256xf32>
    %305 = arith.maximumf %304, %129 : vector<16x256xf32>
    %306 = arith.maximumf %305, %134 : vector<16x256xf32>
    %307 = arith.maximumf %306, %139 : vector<16x256xf32>
    %308 = arith.maximumf %307, %144 : vector<16x256xf32>
    %309 = arith.truncf %308 : vector<16x256xf32> to vector<16x256xbf16>
    %c0_140 = arith.constant 0 : index
    %c0_141 = arith.constant 0 : index
    %310 = vector.load %arg10[%c0_140, %c0_141] : memref<256x128xbf16, #tpu.memory_space<vmem>>, vector<256x128xbf16>
    %cst_142 = arith.constant dense<0.000000e+00> : vector<16x128xf32>
    %311 = tpu.matmul %309, %310, %cst_142 {dimension_numbers = #tpu.dot_dimension_numbers<[1], [0], [0], [1], [0, 0, 1, 1], [], []>} : vector<16x256xbf16>, vector<256x128xbf16>, vector<16x128xf32> -> vector<16x128xf32>
    %c8_i32 = arith.constant 8 : i32
    %312 = tpu.dynamic_rotate %311 by %c8_i32 dim 1 : vector<16x128xf32>, i32 -> vector<16x128xf32>
    %c0_143 = arith.constant 0 : index
    %c0_144 = arith.constant 0 : index
    %c0_145 = arith.constant 0 : index
    %313 = vector.load %arg3[%c0_143, %c0_144, %c0_145] : memref<9x1x128xf32, #tpu.memory_space<vmem>>, vector<1x1x128xf32>
    %314 = vector.shape_cast %313 : vector<1x1x128xf32> to vector<1x128xf32>
    %315 = vector.broadcast %314 : vector<1x128xf32> to vector<16x128xf32>
    %316 = arith.mulf %312, %315 : vector<16x128xf32>
    %c7_i32 = arith.constant 7 : i32
    %317 = tpu.dynamic_rotate %311 by %c7_i32 dim 1 : vector<16x128xf32>, i32 -> vector<16x128xf32>
    %c1_146 = arith.constant 1 : index
    %c0_147 = arith.constant 0 : index
    %c0_148 = arith.constant 0 : index
    %318 = vector.load %arg3[%c1_146, %c0_147, %c0_148] : memref<9x1x128xf32, #tpu.memory_space<vmem>>, vector<1x1x128xf32>
    %319 = vector.shape_cast %318 : vector<1x1x128xf32> to vector<1x128xf32>
    %320 = vector.broadcast %319 : vector<1x128xf32> to vector<16x128xf32>
    %321 = arith.mulf %317, %320 : vector<16x128xf32>
    %c6_i32 = arith.constant 6 : i32
    %322 = tpu.dynamic_rotate %311 by %c6_i32 dim 1 : vector<16x128xf32>, i32 -> vector<16x128xf32>
    %c2_149 = arith.constant 2 : index
    %c0_150 = arith.constant 0 : index
    %c0_151 = arith.constant 0 : index
    %323 = vector.load %arg3[%c2_149, %c0_150, %c0_151] : memref<9x1x128xf32, #tpu.memory_space<vmem>>, vector<1x1x128xf32>
    %324 = vector.shape_cast %323 : vector<1x1x128xf32> to vector<1x128xf32>
    %325 = vector.broadcast %324 : vector<1x128xf32> to vector<16x128xf32>
    %326 = arith.mulf %322, %325 : vector<16x128xf32>
    %c1_i32_152 = arith.constant 1 : i32
    %327 = tpu.dynamic_rotate %311 by %c1_i32_152 dim 1 : vector<16x128xf32>, i32 -> vector<16x128xf32>
    %c3_153 = arith.constant 3 : index
    %c0_154 = arith.constant 0 : index
    %c0_155 = arith.constant 0 : index
    %328 = vector.load %arg3[%c3_153, %c0_154, %c0_155] : memref<9x1x128xf32, #tpu.memory_space<vmem>>, vector<1x1x128xf32>
    %329 = vector.shape_cast %328 : vector<1x1x128xf32> to vector<1x128xf32>
    %330 = vector.broadcast %329 : vector<1x128xf32> to vector<16x128xf32>
    %331 = arith.mulf %327, %330 : vector<16x128xf32>
    %c4_156 = arith.constant 4 : index
    %c0_157 = arith.constant 0 : index
    %c0_158 = arith.constant 0 : index
    %332 = vector.load %arg3[%c4_156, %c0_157, %c0_158] : memref<9x1x128xf32, #tpu.memory_space<vmem>>, vector<1x1x128xf32>
    %333 = vector.shape_cast %332 : vector<1x1x128xf32> to vector<1x128xf32>
    %334 = vector.broadcast %333 : vector<1x128xf32> to vector<16x128xf32>
    %335 = arith.mulf %311, %334 : vector<16x128xf32>
    %c127_i32 = arith.constant 127 : i32
    %336 = tpu.dynamic_rotate %311 by %c127_i32 dim 1 : vector<16x128xf32>, i32 -> vector<16x128xf32>
    %c5_159 = arith.constant 5 : index
    %c0_160 = arith.constant 0 : index
    %c0_161 = arith.constant 0 : index
    %337 = vector.load %arg3[%c5_159, %c0_160, %c0_161] : memref<9x1x128xf32, #tpu.memory_space<vmem>>, vector<1x1x128xf32>
    %338 = vector.shape_cast %337 : vector<1x1x128xf32> to vector<1x128xf32>
    %339 = vector.broadcast %338 : vector<1x128xf32> to vector<16x128xf32>
    %340 = arith.mulf %336, %339 : vector<16x128xf32>
    %c122_i32 = arith.constant 122 : i32
    %341 = tpu.dynamic_rotate %311 by %c122_i32 dim 1 : vector<16x128xf32>, i32 -> vector<16x128xf32>
    %c6_162 = arith.constant 6 : index
    %c0_163 = arith.constant 0 : index
    %c0_164 = arith.constant 0 : index
    %342 = vector.load %arg3[%c6_162, %c0_163, %c0_164] : memref<9x1x128xf32, #tpu.memory_space<vmem>>, vector<1x1x128xf32>
    %343 = vector.shape_cast %342 : vector<1x1x128xf32> to vector<1x128xf32>
    %344 = vector.broadcast %343 : vector<1x128xf32> to vector<16x128xf32>
    %345 = arith.mulf %341, %344 : vector<16x128xf32>
    %c121_i32 = arith.constant 121 : i32
    %346 = tpu.dynamic_rotate %311 by %c121_i32 dim 1 : vector<16x128xf32>, i32 -> vector<16x128xf32>
    %c7_165 = arith.constant 7 : index
    %c0_166 = arith.constant 0 : index
    %c0_167 = arith.constant 0 : index
    %347 = vector.load %arg3[%c7_165, %c0_166, %c0_167] : memref<9x1x128xf32, #tpu.memory_space<vmem>>, vector<1x1x128xf32>
    %348 = vector.shape_cast %347 : vector<1x1x128xf32> to vector<1x128xf32>
    %349 = vector.broadcast %348 : vector<1x128xf32> to vector<16x128xf32>
    %350 = arith.mulf %346, %349 : vector<16x128xf32>
    %c120_i32 = arith.constant 120 : i32
    %351 = tpu.dynamic_rotate %311 by %c120_i32 dim 1 : vector<16x128xf32>, i32 -> vector<16x128xf32>
    %c8_168 = arith.constant 8 : index
    %c0_169 = arith.constant 0 : index
    %c0_170 = arith.constant 0 : index
    %352 = vector.load %arg3[%c8_168, %c0_169, %c0_170] : memref<9x1x128xf32, #tpu.memory_space<vmem>>, vector<1x1x128xf32>
    %353 = vector.shape_cast %352 : vector<1x1x128xf32> to vector<1x128xf32>
    %354 = vector.broadcast %353 : vector<1x128xf32> to vector<16x128xf32>
    %355 = arith.mulf %351, %354 : vector<16x128xf32>
    %c3_171 = arith.constant 3 : index
    %c0_172 = arith.constant 0 : index
    %c0_173 = arith.constant 0 : index
    %356 = vector.load %arg4[%c3_171, %c0_172, %c0_173] : memref<6x16x9xf32, #tpu.memory_space<vmem>>, vector<1x16x9xf32>
    %357 = vector.shape_cast %356 : vector<1x16x9xf32> to vector<16x9xf32>
    %358 = vector.extract_strided_slice %357 {offsets = [0, 0], sizes = [16, 1], strides = [1, 1]} : vector<16x9xf32> to vector<16x1xf32>
    %359 = vector.broadcast %358 : vector<16x1xf32> to vector<16x128xf32>
    %360 = arith.mulf %359, %316 : vector<16x128xf32>
    %361 = vector.extract_strided_slice %357 {offsets = [0, 1], sizes = [16, 1], strides = [1, 1]} : vector<16x9xf32> to vector<16x1xf32>
    %362 = vector.broadcast %361 : vector<16x1xf32> to vector<16x128xf32>
    %363 = arith.mulf %362, %321 : vector<16x128xf32>
    %364 = arith.addf %360, %363 : vector<16x128xf32>
    %365 = vector.extract_strided_slice %357 {offsets = [0, 2], sizes = [16, 1], strides = [1, 1]} : vector<16x9xf32> to vector<16x1xf32>
    %366 = vector.broadcast %365 : vector<16x1xf32> to vector<16x128xf32>
    %367 = arith.mulf %366, %326 : vector<16x128xf32>
    %368 = arith.addf %364, %367 : vector<16x128xf32>
    %369 = vector.extract_strided_slice %357 {offsets = [0, 3], sizes = [16, 1], strides = [1, 1]} : vector<16x9xf32> to vector<16x1xf32>
    %370 = vector.broadcast %369 : vector<16x1xf32> to vector<16x128xf32>
    %371 = arith.mulf %370, %331 : vector<16x128xf32>
    %372 = arith.addf %368, %371 : vector<16x128xf32>
    %373 = vector.extract_strided_slice %357 {offsets = [0, 4], sizes = [16, 1], strides = [1, 1]} : vector<16x9xf32> to vector<16x1xf32>
    %374 = vector.broadcast %373 : vector<16x1xf32> to vector<16x128xf32>
    %375 = arith.mulf %374, %335 : vector<16x128xf32>
    %376 = arith.addf %372, %375 : vector<16x128xf32>
    %377 = vector.extract_strided_slice %357 {offsets = [0, 5], sizes = [16, 1], strides = [1, 1]} : vector<16x9xf32> to vector<16x1xf32>
    %378 = vector.broadcast %377 : vector<16x1xf32> to vector<16x128xf32>
    %379 = arith.mulf %378, %340 : vector<16x128xf32>
    %380 = arith.addf %376, %379 : vector<16x128xf32>
    %381 = vector.extract_strided_slice %357 {offsets = [0, 6], sizes = [16, 1], strides = [1, 1]} : vector<16x9xf32> to vector<16x1xf32>
    %382 = vector.broadcast %381 : vector<16x1xf32> to vector<16x128xf32>
    %383 = arith.mulf %382, %345 : vector<16x128xf32>
    %384 = arith.addf %380, %383 : vector<16x128xf32>
    %385 = vector.extract_strided_slice %357 {offsets = [0, 7], sizes = [16, 1], strides = [1, 1]} : vector<16x9xf32> to vector<16x1xf32>
    %386 = vector.broadcast %385 : vector<16x1xf32> to vector<16x128xf32>
    %387 = arith.mulf %386, %350 : vector<16x128xf32>
    %388 = arith.addf %384, %387 : vector<16x128xf32>
    %389 = vector.extract_strided_slice %357 {offsets = [0, 8], sizes = [16, 1], strides = [1, 1]} : vector<16x9xf32> to vector<16x1xf32>
    %390 = vector.broadcast %389 : vector<16x1xf32> to vector<16x128xf32>
    %391 = arith.mulf %390, %355 : vector<16x128xf32>
    %392 = arith.addf %388, %391 : vector<16x128xf32>
    %c3_174 = arith.constant 3 : index
    %c0_175 = arith.constant 0 : index
    %c0_176 = arith.constant 0 : index
    %393 = vector.load %arg5[%c3_174, %c0_175, %c0_176] : memref<6x16x1xf32, #tpu.memory_space<vmem>>, vector<1x16x1xf32>
    %394 = vector.shape_cast %393 : vector<1x16x1xf32> to vector<16x1xf32>
    %395 = vector.broadcast %394 : vector<16x1xf32> to vector<16x128xf32>
    %396 = arith.addf %392, %395 : vector<16x128xf32>
    %cst_177 = arith.constant 0.000000e+00 : f32
    %cst_178 = arith.constant 6.000000e+00 : f32
    %397 = vector.broadcast %cst_177 : f32 to vector<16x128xf32>
    %398 = arith.maximumf %397, %396 : vector<16x128xf32>
    %399 = vector.broadcast %cst_178 : f32 to vector<16x128xf32>
    %400 = arith.minimumf %399, %398 : vector<16x128xf32>
    %c3_179 = arith.constant 3 : index
    %c0_180 = arith.constant 0 : index
    %c0_181 = arith.constant 0 : index
    %401 = vector.load %arg6[%c3_179, %c0_180, %c0_181] : memref<6x16x16xf32, #tpu.memory_space<vmem>>, vector<1x16x16xf32>
    %402 = vector.shape_cast %401 : vector<1x16x16xf32> to vector<16x16xf32>
    %cst_182 = arith.constant dense<0.000000e+00> : vector<16x128xf32>
    %403 = tpu.matmul %402, %400, %cst_182 {dimension_numbers = #tpu.dot_dimension_numbers<[1], [0], [0], [1], [0, 0, 1, 1], [], []>} : vector<16x16xf32>, vector<16x128xf32>, vector<16x128xf32> -> vector<16x128xf32>
    %c3_183 = arith.constant 3 : index
    %c0_184 = arith.constant 0 : index
    %c0_185 = arith.constant 0 : index
    %404 = vector.load %arg7[%c3_183, %c0_184, %c0_185] : memref<6x16x1xf32, #tpu.memory_space<vmem>>, vector<1x16x1xf32>
    %405 = vector.shape_cast %404 : vector<1x16x1xf32> to vector<16x1xf32>
    %406 = vector.broadcast %405 : vector<16x1xf32> to vector<16x128xf32>
    %407 = arith.addf %403, %406 : vector<16x128xf32>
    %cst_186 = arith.constant 0.000000e+00 : f32
    %cst_187 = arith.constant 6.000000e+00 : f32
    %408 = vector.broadcast %cst_186 : f32 to vector<16x128xf32>
    %409 = arith.maximumf %408, %407 : vector<16x128xf32>
    %410 = vector.broadcast %cst_187 : f32 to vector<16x128xf32>
    %411 = arith.minimumf %410, %409 : vector<16x128xf32>
    %c8_i32_188 = arith.constant 8 : i32
    %412 = tpu.dynamic_rotate %411 by %c8_i32_188 dim 1 : vector<16x128xf32>, i32 -> vector<16x128xf32>
    %c0_189 = arith.constant 0 : index
    %c0_190 = arith.constant 0 : index
    %c0_191 = arith.constant 0 : index
    %413 = vector.load %arg3[%c0_189, %c0_190, %c0_191] : memref<9x1x128xf32, #tpu.memory_space<vmem>>, vector<1x1x128xf32>
    %414 = vector.shape_cast %413 : vector<1x1x128xf32> to vector<1x128xf32>
    %415 = vector.broadcast %414 : vector<1x128xf32> to vector<16x128xf32>
    %416 = arith.mulf %412, %415 : vector<16x128xf32>
    %c7_i32_192 = arith.constant 7 : i32
    %417 = tpu.dynamic_rotate %411 by %c7_i32_192 dim 1 : vector<16x128xf32>, i32 -> vector<16x128xf32>
    %c1_193 = arith.constant 1 : index
    %c0_194 = arith.constant 0 : index
    %c0_195 = arith.constant 0 : index
    %418 = vector.load %arg3[%c1_193, %c0_194, %c0_195] : memref<9x1x128xf32, #tpu.memory_space<vmem>>, vector<1x1x128xf32>
    %419 = vector.shape_cast %418 : vector<1x1x128xf32> to vector<1x128xf32>
    %420 = vector.broadcast %419 : vector<1x128xf32> to vector<16x128xf32>
    %421 = arith.mulf %417, %420 : vector<16x128xf32>
    %c6_i32_196 = arith.constant 6 : i32
    %422 = tpu.dynamic_rotate %411 by %c6_i32_196 dim 1 : vector<16x128xf32>, i32 -> vector<16x128xf32>
    %c2_197 = arith.constant 2 : index
    %c0_198 = arith.constant 0 : index
    %c0_199 = arith.constant 0 : index
    %423 = vector.load %arg3[%c2_197, %c0_198, %c0_199] : memref<9x1x128xf32, #tpu.memory_space<vmem>>, vector<1x1x128xf32>
    %424 = vector.shape_cast %423 : vector<1x1x128xf32> to vector<1x128xf32>
    %425 = vector.broadcast %424 : vector<1x128xf32> to vector<16x128xf32>
    %426 = arith.mulf %422, %425 : vector<16x128xf32>
    %c1_i32_200 = arith.constant 1 : i32
    %427 = tpu.dynamic_rotate %411 by %c1_i32_200 dim 1 : vector<16x128xf32>, i32 -> vector<16x128xf32>
    %c3_201 = arith.constant 3 : index
    %c0_202 = arith.constant 0 : index
    %c0_203 = arith.constant 0 : index
    %428 = vector.load %arg3[%c3_201, %c0_202, %c0_203] : memref<9x1x128xf32, #tpu.memory_space<vmem>>, vector<1x1x128xf32>
    %429 = vector.shape_cast %428 : vector<1x1x128xf32> to vector<1x128xf32>
    %430 = vector.broadcast %429 : vector<1x128xf32> to vector<16x128xf32>
    %431 = arith.mulf %427, %430 : vector<16x128xf32>
    %c4_204 = arith.constant 4 : index
    %c0_205 = arith.constant 0 : index
    %c0_206 = arith.constant 0 : index
    %432 = vector.load %arg3[%c4_204, %c0_205, %c0_206] : memref<9x1x128xf32, #tpu.memory_space<vmem>>, vector<1x1x128xf32>
    %433 = vector.shape_cast %432 : vector<1x1x128xf32> to vector<1x128xf32>
    %434 = vector.broadcast %433 : vector<1x128xf32> to vector<16x128xf32>
    %435 = arith.mulf %411, %434 : vector<16x128xf32>
    %c127_i32_207 = arith.constant 127 : i32
    %436 = tpu.dynamic_rotate %411 by %c127_i32_207 dim 1 : vector<16x128xf32>, i32 -> vector<16x128xf32>
    %c5_208 = arith.constant 5 : index
    %c0_209 = arith.constant 0 : index
    %c0_210 = arith.constant 0 : index
    %437 = vector.load %arg3[%c5_208, %c0_209, %c0_210] : memref<9x1x128xf32, #tpu.memory_space<vmem>>, vector<1x1x128xf32>
    %438 = vector.shape_cast %437 : vector<1x1x128xf32> to vector<1x128xf32>
    %439 = vector.broadcast %438 : vector<1x128xf32> to vector<16x128xf32>
    %440 = arith.mulf %436, %439 : vector<16x128xf32>
    %c122_i32_211 = arith.constant 122 : i32
    %441 = tpu.dynamic_rotate %411 by %c122_i32_211 dim 1 : vector<16x128xf32>, i32 -> vector<16x128xf32>
    %c6_212 = arith.constant 6 : index
    %c0_213 = arith.constant 0 : index
    %c0_214 = arith.constant 0 : index
    %442 = vector.load %arg3[%c6_212, %c0_213, %c0_214] : memref<9x1x128xf32, #tpu.memory_space<vmem>>, vector<1x1x128xf32>
    %443 = vector.shape_cast %442 : vector<1x1x128xf32> to vector<1x128xf32>
    %444 = vector.broadcast %443 : vector<1x128xf32> to vector<16x128xf32>
    %445 = arith.mulf %441, %444 : vector<16x128xf32>
    %c121_i32_215 = arith.constant 121 : i32
    %446 = tpu.dynamic_rotate %411 by %c121_i32_215 dim 1 : vector<16x128xf32>, i32 -> vector<16x128xf32>
    %c7_216 = arith.constant 7 : index
    %c0_217 = arith.constant 0 : index
    %c0_218 = arith.constant 0 : index
    %447 = vector.load %arg3[%c7_216, %c0_217, %c0_218] : memref<9x1x128xf32, #tpu.memory_space<vmem>>, vector<1x1x128xf32>
    %448 = vector.shape_cast %447 : vector<1x1x128xf32> to vector<1x128xf32>
    %449 = vector.broadcast %448 : vector<1x128xf32> to vector<16x128xf32>
    %450 = arith.mulf %446, %449 : vector<16x128xf32>
    %c120_i32_219 = arith.constant 120 : i32
    %451 = tpu.dynamic_rotate %411 by %c120_i32_219 dim 1 : vector<16x128xf32>, i32 -> vector<16x128xf32>
    %c8_220 = arith.constant 8 : index
    %c0_221 = arith.constant 0 : index
    %c0_222 = arith.constant 0 : index
    %452 = vector.load %arg3[%c8_220, %c0_221, %c0_222] : memref<9x1x128xf32, #tpu.memory_space<vmem>>, vector<1x1x128xf32>
    %453 = vector.shape_cast %452 : vector<1x1x128xf32> to vector<1x128xf32>
    %454 = vector.broadcast %453 : vector<1x128xf32> to vector<16x128xf32>
    %455 = arith.mulf %451, %454 : vector<16x128xf32>
    %c4_223 = arith.constant 4 : index
    %c0_224 = arith.constant 0 : index
    %c0_225 = arith.constant 0 : index
    %456 = vector.load %arg4[%c4_223, %c0_224, %c0_225] : memref<6x16x9xf32, #tpu.memory_space<vmem>>, vector<1x16x9xf32>
    %457 = vector.shape_cast %456 : vector<1x16x9xf32> to vector<16x9xf32>
    %458 = vector.extract_strided_slice %457 {offsets = [0, 0], sizes = [16, 1], strides = [1, 1]} : vector<16x9xf32> to vector<16x1xf32>
    %459 = vector.broadcast %458 : vector<16x1xf32> to vector<16x128xf32>
    %460 = arith.mulf %459, %416 : vector<16x128xf32>
    %461 = vector.extract_strided_slice %457 {offsets = [0, 1], sizes = [16, 1], strides = [1, 1]} : vector<16x9xf32> to vector<16x1xf32>
    %462 = vector.broadcast %461 : vector<16x1xf32> to vector<16x128xf32>
    %463 = arith.mulf %462, %421 : vector<16x128xf32>
    %464 = arith.addf %460, %463 : vector<16x128xf32>
    %465 = vector.extract_strided_slice %457 {offsets = [0, 2], sizes = [16, 1], strides = [1, 1]} : vector<16x9xf32> to vector<16x1xf32>
    %466 = vector.broadcast %465 : vector<16x1xf32> to vector<16x128xf32>
    %467 = arith.mulf %466, %426 : vector<16x128xf32>
    %468 = arith.addf %464, %467 : vector<16x128xf32>
    %469 = vector.extract_strided_slice %457 {offsets = [0, 3], sizes = [16, 1], strides = [1, 1]} : vector<16x9xf32> to vector<16x1xf32>
    %470 = vector.broadcast %469 : vector<16x1xf32> to vector<16x128xf32>
    %471 = arith.mulf %470, %431 : vector<16x128xf32>
    %472 = arith.addf %468, %471 : vector<16x128xf32>
    %473 = vector.extract_strided_slice %457 {offsets = [0, 4], sizes = [16, 1], strides = [1, 1]} : vector<16x9xf32> to vector<16x1xf32>
    %474 = vector.broadcast %473 : vector<16x1xf32> to vector<16x128xf32>
    %475 = arith.mulf %474, %435 : vector<16x128xf32>
    %476 = arith.addf %472, %475 : vector<16x128xf32>
    %477 = vector.extract_strided_slice %457 {offsets = [0, 5], sizes = [16, 1], strides = [1, 1]} : vector<16x9xf32> to vector<16x1xf32>
    %478 = vector.broadcast %477 : vector<16x1xf32> to vector<16x128xf32>
    %479 = arith.mulf %478, %440 : vector<16x128xf32>
    %480 = arith.addf %476, %479 : vector<16x128xf32>
    %481 = vector.extract_strided_slice %457 {offsets = [0, 6], sizes = [16, 1], strides = [1, 1]} : vector<16x9xf32> to vector<16x1xf32>
    %482 = vector.broadcast %481 : vector<16x1xf32> to vector<16x128xf32>
    %483 = arith.mulf %482, %445 : vector<16x128xf32>
    %484 = arith.addf %480, %483 : vector<16x128xf32>
    %485 = vector.extract_strided_slice %457 {offsets = [0, 7], sizes = [16, 1], strides = [1, 1]} : vector<16x9xf32> to vector<16x1xf32>
    %486 = vector.broadcast %485 : vector<16x1xf32> to vector<16x128xf32>
    %487 = arith.mulf %486, %450 : vector<16x128xf32>
    %488 = arith.addf %484, %487 : vector<16x128xf32>
    %489 = vector.extract_strided_slice %457 {offsets = [0, 8], sizes = [16, 1], strides = [1, 1]} : vector<16x9xf32> to vector<16x1xf32>
    %490 = vector.broadcast %489 : vector<16x1xf32> to vector<16x128xf32>
    %491 = arith.mulf %490, %455 : vector<16x128xf32>
    %492 = arith.addf %488, %491 : vector<16x128xf32>
    %c4_226 = arith.constant 4 : index
    %c0_227 = arith.constant 0 : index
    %c0_228 = arith.constant 0 : index
    %493 = vector.load %arg5[%c4_226, %c0_227, %c0_228] : memref<6x16x1xf32, #tpu.memory_space<vmem>>, vector<1x16x1xf32>
    %494 = vector.shape_cast %493 : vector<1x16x1xf32> to vector<16x1xf32>
    %495 = vector.broadcast %494 : vector<16x1xf32> to vector<16x128xf32>
    %496 = arith.addf %492, %495 : vector<16x128xf32>
    %cst_229 = arith.constant 0.000000e+00 : f32
    %cst_230 = arith.constant 6.000000e+00 : f32
    %497 = vector.broadcast %cst_229 : f32 to vector<16x128xf32>
    %498 = arith.maximumf %497, %496 : vector<16x128xf32>
    %499 = vector.broadcast %cst_230 : f32 to vector<16x128xf32>
    %500 = arith.minimumf %499, %498 : vector<16x128xf32>
    %c4_231 = arith.constant 4 : index
    %c0_232 = arith.constant 0 : index
    %c0_233 = arith.constant 0 : index
    %501 = vector.load %arg6[%c4_231, %c0_232, %c0_233] : memref<6x16x16xf32, #tpu.memory_space<vmem>>, vector<1x16x16xf32>
    %502 = vector.shape_cast %501 : vector<1x16x16xf32> to vector<16x16xf32>
    %cst_234 = arith.constant dense<0.000000e+00> : vector<16x128xf32>
    %503 = tpu.matmul %502, %500, %cst_234 {dimension_numbers = #tpu.dot_dimension_numbers<[1], [0], [0], [1], [0, 0, 1, 1], [], []>} : vector<16x16xf32>, vector<16x128xf32>, vector<16x128xf32> -> vector<16x128xf32>
    %c4_235 = arith.constant 4 : index
    %c0_236 = arith.constant 0 : index
    %c0_237 = arith.constant 0 : index
    %504 = vector.load %arg7[%c4_235, %c0_236, %c0_237] : memref<6x16x1xf32, #tpu.memory_space<vmem>>, vector<1x16x1xf32>
    %505 = vector.shape_cast %504 : vector<1x16x1xf32> to vector<16x1xf32>
    %506 = vector.broadcast %505 : vector<16x1xf32> to vector<16x128xf32>
    %507 = arith.addf %503, %506 : vector<16x128xf32>
    %cst_238 = arith.constant 0.000000e+00 : f32
    %cst_239 = arith.constant 6.000000e+00 : f32
    %508 = vector.broadcast %cst_238 : f32 to vector<16x128xf32>
    %509 = arith.maximumf %508, %507 : vector<16x128xf32>
    %510 = vector.broadcast %cst_239 : f32 to vector<16x128xf32>
    %511 = arith.minimumf %510, %509 : vector<16x128xf32>
    %512 = arith.truncf %511 : vector<16x128xf32> to vector<16x128xbf16>
    %c0_240 = arith.constant 0 : index
    %c0_241 = arith.constant 0 : index
    %513 = vector.load %arg11[%c0_240, %c0_241] : memref<128x256xbf16, #tpu.memory_space<vmem>>, vector<128x256xbf16>
    %cst_242 = arith.constant dense<0.000000e+00> : vector<16x256xf32>
    %514 = tpu.matmul %512, %513, %cst_242 {dimension_numbers = #tpu.dot_dimension_numbers<[1], [0], [0], [1], [0, 0, 1, 1], [], []>} : vector<16x128xbf16>, vector<128x256xbf16>, vector<16x256xf32> -> vector<16x256xf32>
    %515 = arith.addf %514, %300 : vector<16x256xf32>
    %c0_243 = arith.constant 0 : index
    %c0_244 = arith.constant 0 : index
    %c0_245 = arith.constant 0 : index
    %516 = vector.load %arg8[%c0_243, %c0_244, %c0_245] : memref<3x16x1xf32, #tpu.memory_space<vmem>>, vector<1x16x1xf32>
    %517 = vector.shape_cast %516 : vector<1x16x1xf32> to vector<16x1xf32>
    %518 = vector.broadcast %517 : vector<16x1xf32> to vector<16x256xf32>
    %519 = arith.mulf %515, %518 : vector<16x256xf32>
    %c1_246 = arith.constant 1 : index
    %c0_247 = arith.constant 0 : index
    %c0_248 = arith.constant 0 : index
    %520 = vector.load %arg8[%c1_246, %c0_247, %c0_248] : memref<3x16x1xf32, #tpu.memory_space<vmem>>, vector<1x16x1xf32>
    %521 = vector.shape_cast %520 : vector<1x16x1xf32> to vector<16x1xf32>
    %522 = vector.broadcast %521 : vector<16x1xf32> to vector<16x256xf32>
    %523 = arith.addf %519, %522 : vector<16x256xf32>
    %cst_249 = arith.constant 0.000000e+00 : f32
    %524 = vector.broadcast %cst_249 : f32 to vector<16x256xf32>
    %525 = arith.maximumf %523, %524 : vector<16x256xf32>
    %c0_250 = arith.constant 0 : index
    %c0_251 = arith.constant 0 : index
    %c0_252 = arith.constant 0 : index
    %526 = vector.load %arg9[%c0_250, %c0_251, %c0_252] : memref<2x16x16xf32, #tpu.memory_space<vmem>>, vector<1x16x16xf32>
    %527 = vector.shape_cast %526 : vector<1x16x16xf32> to vector<16x16xf32>
    %cst_253 = arith.constant dense<0.000000e+00> : vector<16x256xf32>
    %528 = tpu.matmul %527, %525, %cst_253 {dimension_numbers = #tpu.dot_dimension_numbers<[1], [0], [0], [1], [0, 0, 1, 1], [], []>} : vector<16x16xf32>, vector<16x256xf32>, vector<16x256xf32> -> vector<16x256xf32>
    %c2_254 = arith.constant 2 : index
    %c0_255 = arith.constant 0 : index
    %c0_256 = arith.constant 0 : index
    %529 = vector.load %arg8[%c2_254, %c0_255, %c0_256] : memref<3x16x1xf32, #tpu.memory_space<vmem>>, vector<1x16x1xf32>
    %530 = vector.shape_cast %529 : vector<1x16x1xf32> to vector<16x1xf32>
    %531 = vector.broadcast %530 : vector<16x1xf32> to vector<16x256xf32>
    %532 = arith.addf %528, %531 : vector<16x256xf32>
    %cst_257 = arith.constant 0.000000e+00 : f32
    %533 = vector.broadcast %cst_257 : f32 to vector<16x256xf32>
    %534 = arith.maximumf %532, %533 : vector<16x256xf32>
    %c1_258 = arith.constant 1 : index
    %c0_259 = arith.constant 0 : index
    %c0_260 = arith.constant 0 : index
    %535 = vector.load %arg9[%c1_258, %c0_259, %c0_260] : memref<2x16x16xf32, #tpu.memory_space<vmem>>, vector<1x16x16xf32>
    %536 = vector.shape_cast %535 : vector<1x16x16xf32> to vector<16x16xf32>
    %cst_261 = arith.constant dense<0.000000e+00> : vector<16x256xf32>
    %537 = tpu.matmul %536, %534, %cst_261 {dimension_numbers = #tpu.dot_dimension_numbers<[1], [0], [0], [1], [0, 0, 1, 1], [], []>} : vector<16x16xf32>, vector<16x256xf32>, vector<16x256xf32> -> vector<16x256xf32>
    %cst_262 = arith.constant 5.000000e-01 : f32
    %538 = vector.broadcast %cst_262 : f32 to vector<16x256xf32>
    %539 = arith.mulf %538, %537 : vector<16x256xf32>
    %540 = math.tanh %539 : vector<16x256xf32>
    %cst_263 = arith.constant 5.000000e-01 : f32
    %541 = vector.broadcast %cst_263 : f32 to vector<16x256xf32>
    %542 = arith.mulf %541, %540 : vector<16x256xf32>
    %cst_264 = arith.constant 1.500000e+00 : f32
    %543 = vector.broadcast %cst_264 : f32 to vector<16x256xf32>
    %544 = arith.addf %543, %542 : vector<16x256xf32>
    %545 = arith.mulf %544, %300 : vector<16x256xf32>
    %c15_i32_265 = arith.constant 15 : i32
    %546 = tpu.dynamic_rotate %545 by %c15_i32_265 dim 1 : vector<16x256xf32>, i32 -> vector<16x256xf32>
    %c0_266 = arith.constant 0 : index
    %c0_267 = arith.constant 0 : index
    %c0_268 = arith.constant 0 : index
    %547 = vector.load %arg2[%c0_266, %c0_267, %c0_268] : memref<9x1x256xf32, #tpu.memory_space<vmem>>, vector<1x1x256xf32>
    %548 = vector.shape_cast %547 : vector<1x1x256xf32> to vector<1x256xf32>
    %549 = vector.broadcast %548 : vector<1x256xf32> to vector<16x256xf32>
    %550 = arith.mulf %546, %549 : vector<16x256xf32>
    %c14_i32_269 = arith.constant 14 : i32
    %551 = tpu.dynamic_rotate %545 by %c14_i32_269 dim 1 : vector<16x256xf32>, i32 -> vector<16x256xf32>
    %c1_270 = arith.constant 1 : index
    %c0_271 = arith.constant 0 : index
    %c0_272 = arith.constant 0 : index
    %552 = vector.load %arg2[%c1_270, %c0_271, %c0_272] : memref<9x1x256xf32, #tpu.memory_space<vmem>>, vector<1x1x256xf32>
    %553 = vector.shape_cast %552 : vector<1x1x256xf32> to vector<1x256xf32>
    %554 = vector.broadcast %553 : vector<1x256xf32> to vector<16x256xf32>
    %555 = arith.mulf %551, %554 : vector<16x256xf32>
    %c13_i32_273 = arith.constant 13 : i32
    %556 = tpu.dynamic_rotate %545 by %c13_i32_273 dim 1 : vector<16x256xf32>, i32 -> vector<16x256xf32>
    %c2_274 = arith.constant 2 : index
    %c0_275 = arith.constant 0 : index
    %c0_276 = arith.constant 0 : index
    %557 = vector.load %arg2[%c2_274, %c0_275, %c0_276] : memref<9x1x256xf32, #tpu.memory_space<vmem>>, vector<1x1x256xf32>
    %558 = vector.shape_cast %557 : vector<1x1x256xf32> to vector<1x256xf32>
    %559 = vector.broadcast %558 : vector<1x256xf32> to vector<16x256xf32>
    %560 = arith.mulf %556, %559 : vector<16x256xf32>
    %c1_i32_277 = arith.constant 1 : i32
    %561 = tpu.dynamic_rotate %545 by %c1_i32_277 dim 1 : vector<16x256xf32>, i32 -> vector<16x256xf32>
    %c3_278 = arith.constant 3 : index
    %c0_279 = arith.constant 0 : index
    %c0_280 = arith.constant 0 : index
    %562 = vector.load %arg2[%c3_278, %c0_279, %c0_280] : memref<9x1x256xf32, #tpu.memory_space<vmem>>, vector<1x1x256xf32>
    %563 = vector.shape_cast %562 : vector<1x1x256xf32> to vector<1x256xf32>
    %564 = vector.broadcast %563 : vector<1x256xf32> to vector<16x256xf32>
    %565 = arith.mulf %561, %564 : vector<16x256xf32>
    %c4_281 = arith.constant 4 : index
    %c0_282 = arith.constant 0 : index
    %c0_283 = arith.constant 0 : index
    %566 = vector.load %arg2[%c4_281, %c0_282, %c0_283] : memref<9x1x256xf32, #tpu.memory_space<vmem>>, vector<1x1x256xf32>
    %567 = vector.shape_cast %566 : vector<1x1x256xf32> to vector<1x256xf32>
    %568 = vector.broadcast %567 : vector<1x256xf32> to vector<16x256xf32>
    %569 = arith.mulf %545, %568 : vector<16x256xf32>
    %c255_i32_284 = arith.constant 255 : i32
    %570 = tpu.dynamic_rotate %545 by %c255_i32_284 dim 1 : vector<16x256xf32>, i32 -> vector<16x256xf32>
    %c5_285 = arith.constant 5 : index
    %c0_286 = arith.constant 0 : index
    %c0_287 = arith.constant 0 : index
    %571 = vector.load %arg2[%c5_285, %c0_286, %c0_287] : memref<9x1x256xf32, #tpu.memory_space<vmem>>, vector<1x1x256xf32>
    %572 = vector.shape_cast %571 : vector<1x1x256xf32> to vector<1x256xf32>
    %573 = vector.broadcast %572 : vector<1x256xf32> to vector<16x256xf32>
    %574 = arith.mulf %570, %573 : vector<16x256xf32>
    %c243_i32_288 = arith.constant 243 : i32
    %575 = tpu.dynamic_rotate %545 by %c243_i32_288 dim 1 : vector<16x256xf32>, i32 -> vector<16x256xf32>
    %c6_289 = arith.constant 6 : index
    %c0_290 = arith.constant 0 : index
    %c0_291 = arith.constant 0 : index
    %576 = vector.load %arg2[%c6_289, %c0_290, %c0_291] : memref<9x1x256xf32, #tpu.memory_space<vmem>>, vector<1x1x256xf32>
    %577 = vector.shape_cast %576 : vector<1x1x256xf32> to vector<1x256xf32>
    %578 = vector.broadcast %577 : vector<1x256xf32> to vector<16x256xf32>
    %579 = arith.mulf %575, %578 : vector<16x256xf32>
    %c242_i32_292 = arith.constant 242 : i32
    %580 = tpu.dynamic_rotate %545 by %c242_i32_292 dim 1 : vector<16x256xf32>, i32 -> vector<16x256xf32>
    %c7_293 = arith.constant 7 : index
    %c0_294 = arith.constant 0 : index
    %c0_295 = arith.constant 0 : index
    %581 = vector.load %arg2[%c7_293, %c0_294, %c0_295] : memref<9x1x256xf32, #tpu.memory_space<vmem>>, vector<1x1x256xf32>
    %582 = vector.shape_cast %581 : vector<1x1x256xf32> to vector<1x256xf32>
    %583 = vector.broadcast %582 : vector<1x256xf32> to vector<16x256xf32>
    %584 = arith.mulf %580, %583 : vector<16x256xf32>
    %c241_i32_296 = arith.constant 241 : i32
    %585 = tpu.dynamic_rotate %545 by %c241_i32_296 dim 1 : vector<16x256xf32>, i32 -> vector<16x256xf32>
    %c8_297 = arith.constant 8 : index
    %c0_298 = arith.constant 0 : index
    %c0_299 = arith.constant 0 : index
    %586 = vector.load %arg2[%c8_297, %c0_298, %c0_299] : memref<9x1x256xf32, #tpu.memory_space<vmem>>, vector<1x1x256xf32>
    %587 = vector.shape_cast %586 : vector<1x1x256xf32> to vector<1x256xf32>
    %588 = vector.broadcast %587 : vector<1x256xf32> to vector<16x256xf32>
    %589 = arith.mulf %585, %588 : vector<16x256xf32>
    %c5_300 = arith.constant 5 : index
    %c0_301 = arith.constant 0 : index
    %c0_302 = arith.constant 0 : index
    %590 = vector.load %arg4[%c5_300, %c0_301, %c0_302] : memref<6x16x9xf32, #tpu.memory_space<vmem>>, vector<1x16x9xf32>
    %591 = vector.shape_cast %590 : vector<1x16x9xf32> to vector<16x9xf32>
    %592 = vector.extract_strided_slice %591 {offsets = [0, 0], sizes = [16, 1], strides = [1, 1]} : vector<16x9xf32> to vector<16x1xf32>
    %593 = vector.broadcast %592 : vector<16x1xf32> to vector<16x256xf32>
    %594 = arith.mulf %593, %550 : vector<16x256xf32>
    %595 = vector.extract_strided_slice %591 {offsets = [0, 1], sizes = [16, 1], strides = [1, 1]} : vector<16x9xf32> to vector<16x1xf32>
    %596 = vector.broadcast %595 : vector<16x1xf32> to vector<16x256xf32>
    %597 = arith.mulf %596, %555 : vector<16x256xf32>
    %598 = arith.addf %594, %597 : vector<16x256xf32>
    %599 = vector.extract_strided_slice %591 {offsets = [0, 2], sizes = [16, 1], strides = [1, 1]} : vector<16x9xf32> to vector<16x1xf32>
    %600 = vector.broadcast %599 : vector<16x1xf32> to vector<16x256xf32>
    %601 = arith.mulf %600, %560 : vector<16x256xf32>
    %602 = arith.addf %598, %601 : vector<16x256xf32>
    %603 = vector.extract_strided_slice %591 {offsets = [0, 3], sizes = [16, 1], strides = [1, 1]} : vector<16x9xf32> to vector<16x1xf32>
    %604 = vector.broadcast %603 : vector<16x1xf32> to vector<16x256xf32>
    %605 = arith.mulf %604, %565 : vector<16x256xf32>
    %606 = arith.addf %602, %605 : vector<16x256xf32>
    %607 = vector.extract_strided_slice %591 {offsets = [0, 4], sizes = [16, 1], strides = [1, 1]} : vector<16x9xf32> to vector<16x1xf32>
    %608 = vector.broadcast %607 : vector<16x1xf32> to vector<16x256xf32>
    %609 = arith.mulf %608, %569 : vector<16x256xf32>
    %610 = arith.addf %606, %609 : vector<16x256xf32>
    %611 = vector.extract_strided_slice %591 {offsets = [0, 5], sizes = [16, 1], strides = [1, 1]} : vector<16x9xf32> to vector<16x1xf32>
    %612 = vector.broadcast %611 : vector<16x1xf32> to vector<16x256xf32>
    %613 = arith.mulf %612, %574 : vector<16x256xf32>
    %614 = arith.addf %610, %613 : vector<16x256xf32>
    %615 = vector.extract_strided_slice %591 {offsets = [0, 6], sizes = [16, 1], strides = [1, 1]} : vector<16x9xf32> to vector<16x1xf32>
    %616 = vector.broadcast %615 : vector<16x1xf32> to vector<16x256xf32>
    %617 = arith.mulf %616, %579 : vector<16x256xf32>
    %618 = arith.addf %614, %617 : vector<16x256xf32>
    %619 = vector.extract_strided_slice %591 {offsets = [0, 7], sizes = [16, 1], strides = [1, 1]} : vector<16x9xf32> to vector<16x1xf32>
    %620 = vector.broadcast %619 : vector<16x1xf32> to vector<16x256xf32>
    %621 = arith.mulf %620, %584 : vector<16x256xf32>
    %622 = arith.addf %618, %621 : vector<16x256xf32>
    %623 = vector.extract_strided_slice %591 {offsets = [0, 8], sizes = [16, 1], strides = [1, 1]} : vector<16x9xf32> to vector<16x1xf32>
    %624 = vector.broadcast %623 : vector<16x1xf32> to vector<16x256xf32>
    %625 = arith.mulf %624, %589 : vector<16x256xf32>
    %626 = arith.addf %622, %625 : vector<16x256xf32>
    %c5_303 = arith.constant 5 : index
    %c0_304 = arith.constant 0 : index
    %c0_305 = arith.constant 0 : index
    %627 = vector.load %arg5[%c5_303, %c0_304, %c0_305] : memref<6x16x1xf32, #tpu.memory_space<vmem>>, vector<1x16x1xf32>
    %628 = vector.shape_cast %627 : vector<1x16x1xf32> to vector<16x1xf32>
    %629 = vector.broadcast %628 : vector<16x1xf32> to vector<16x256xf32>
    %630 = arith.addf %626, %629 : vector<16x256xf32>
    %cst_306 = arith.constant 0.000000e+00 : f32
    %cst_307 = arith.constant 6.000000e+00 : f32
    %631 = vector.broadcast %cst_306 : f32 to vector<16x256xf32>
    %632 = arith.maximumf %631, %630 : vector<16x256xf32>
    %633 = vector.broadcast %cst_307 : f32 to vector<16x256xf32>
    %634 = arith.minimumf %633, %632 : vector<16x256xf32>
    %c5_308 = arith.constant 5 : index
    %c0_309 = arith.constant 0 : index
    %c0_310 = arith.constant 0 : index
    %635 = vector.load %arg6[%c5_308, %c0_309, %c0_310] : memref<6x16x16xf32, #tpu.memory_space<vmem>>, vector<1x16x16xf32>
    %636 = vector.shape_cast %635 : vector<1x16x16xf32> to vector<16x16xf32>
    %cst_311 = arith.constant dense<0.000000e+00> : vector<16x256xf32>
    %637 = tpu.matmul %636, %634, %cst_311 {dimension_numbers = #tpu.dot_dimension_numbers<[1], [0], [0], [1], [0, 0, 1, 1], [], []>} : vector<16x16xf32>, vector<16x256xf32>, vector<16x256xf32> -> vector<16x256xf32>
    %c5_312 = arith.constant 5 : index
    %c0_313 = arith.constant 0 : index
    %c0_314 = arith.constant 0 : index
    %638 = vector.load %arg7[%c5_312, %c0_313, %c0_314] : memref<6x16x1xf32, #tpu.memory_space<vmem>>, vector<1x16x1xf32>
    %639 = vector.shape_cast %638 : vector<1x16x1xf32> to vector<16x1xf32>
    %640 = vector.broadcast %639 : vector<16x1xf32> to vector<16x256xf32>
    %641 = arith.addf %637, %640 : vector<16x256xf32>
    %cst_315 = arith.constant 0.000000e+00 : f32
    %cst_316 = arith.constant 6.000000e+00 : f32
    %642 = vector.broadcast %cst_315 : f32 to vector<16x256xf32>
    %643 = arith.maximumf %642, %641 : vector<16x256xf32>
    %644 = vector.broadcast %cst_316 : f32 to vector<16x256xf32>
    %645 = arith.minimumf %644, %643 : vector<16x256xf32>
    %c0_317 = arith.constant 0 : index
    %c0_318 = arith.constant 0 : index
    %646 = vector.load %arg12[%c0_317, %c0_318] : memref<16x256xf32, #tpu.memory_space<vmem>>, vector<16x256xf32>
    tpu.vector_store %arg12[%c0_317, %c0_318], %645 {strides = array<i32>} : memref<16x256xf32, #tpu.memory_space<vmem>>, vector<16x256xf32>,
    return
  }
  func.func @transform_0(%arg0: i32) -> (i32, i32) {
    %c0_i32 = arith.constant 0 : i32
    %c0_i32_0 = arith.constant 0 : i32
    return %arg0, %c0_i32 : i32, i32
  }
  func.func @transform_1(%arg0: i32) -> (i32, i32, i32) {
    %c0_i32 = arith.constant 0 : i32
    %c0_i32_0 = arith.constant 0 : i32
    %c0_i32_1 = arith.constant 0 : i32
    %c0_i32_2 = arith.constant 0 : i32
    return %c0_i32, %c0_i32_0, %c0_i32_1 : i32, i32, i32
  }
  func.func @transform_2(%arg0: i32) -> (i32, i32, i32) {
    %c0_i32 = arith.constant 0 : i32
    %c0_i32_0 = arith.constant 0 : i32
    %c0_i32_1 = arith.constant 0 : i32
    %c0_i32_2 = arith.constant 0 : i32
    return %c0_i32, %c0_i32_0, %c0_i32_1 : i32, i32, i32
  }
  func.func @transform_3(%arg0: i32) -> (i32, i32, i32) {
    %c0_i32 = arith.constant 0 : i32
    %c0_i32_0 = arith.constant 0 : i32
    %c0_i32_1 = arith.constant 0 : i32
    %c0_i32_2 = arith.constant 0 : i32
    return %c0_i32, %c0_i32_0, %c0_i32_1 : i32, i32, i32
  }
  func.func @transform_4(%arg0: i32) -> (i32, i32, i32) {
    %c0_i32 = arith.constant 0 : i32
    %c0_i32_0 = arith.constant 0 : i32
    %c0_i32_1 = arith.constant 0 : i32
    %c0_i32_2 = arith.constant 0 : i32
    return %c0_i32, %c0_i32_0, %c0_i32_1 : i32, i32, i32
  }
  func.func @transform_5(%arg0: i32) -> (i32, i32, i32) {
    %c0_i32 = arith.constant 0 : i32
    %c0_i32_0 = arith.constant 0 : i32
    %c0_i32_1 = arith.constant 0 : i32
    %c0_i32_2 = arith.constant 0 : i32
    return %c0_i32, %c0_i32_0, %c0_i32_1 : i32, i32, i32
  }
  func.func @transform_6(%arg0: i32) -> (i32, i32, i32) {
    %c0_i32 = arith.constant 0 : i32
    %c0_i32_0 = arith.constant 0 : i32
    %c0_i32_1 = arith.constant 0 : i32
    %c0_i32_2 = arith.constant 0 : i32
    return %c0_i32, %c0_i32_0, %c0_i32_1 : i32, i32, i32
  }
  func.func @transform_7(%arg0: i32) -> (i32, i32, i32) {
    %c0_i32 = arith.constant 0 : i32
    %c0_i32_0 = arith.constant 0 : i32
    %c0_i32_1 = arith.constant 0 : i32
    %c0_i32_2 = arith.constant 0 : i32
    return %c0_i32, %c0_i32_0, %c0_i32_1 : i32, i32, i32
  }
  func.func @transform_8(%arg0: i32) -> (i32, i32, i32) {
    %c0_i32 = arith.constant 0 : i32
    %c0_i32_0 = arith.constant 0 : i32
    %c0_i32_1 = arith.constant 0 : i32
    %c0_i32_2 = arith.constant 0 : i32
    return %c0_i32, %c0_i32_0, %c0_i32_1 : i32, i32, i32
  }
  func.func @transform_9(%arg0: i32) -> (i32, i32) {
    %c0_i32 = arith.constant 0 : i32
    %c0_i32_0 = arith.constant 0 : i32
    %c0_i32_1 = arith.constant 0 : i32
    return %c0_i32, %c0_i32_0 : i32, i32
  }
  func.func @transform_10(%arg0: i32) -> (i32, i32) {
    %c0_i32 = arith.constant 0 : i32
    %c0_i32_0 = arith.constant 0 : i32
    %c0_i32_1 = arith.constant 0 : i32
    return %c0_i32, %c0_i32_0 : i32, i32
  }
  func.func @transform_11(%arg0: i32) -> (i32, i32) {
    %c0_i32 = arith.constant 0 : i32
    %c0_i32_0 = arith.constant 0 : i32
    return %arg0, %c0_i32 : i32, i32
  }
}

</mosaic_0001>

<bundles_post_ra>
// kernel: attention_module_stage3.1
= control target key start
LH: loop header
LB: loop body
LE: loop exit
PB: predicated region body
PF: predicated region fallthrough
CT: control target
= control target key end

     0   :  { %v5318_v2 = vmov 0   ;;  %v5308_v3 = vmov 1   ;;  %s3021_s21 = smov 14   ;;  %s3022_s22 = smov 15   ;;  %v5306_v6 = vmov 2   ;;  %v5320_v9 = vmov 3   ;;  %s5294_s0 = inlined_call_operand.vmem [shape: f32[16,256], index: 0, kind: input, shape index: {}]   ;;  %s5295_s3 = inlined_call_operand.vmem [shape: f32[6,16,9], index: 3, kind: input, shape index: {}]   ;;  %s5296_s4 = inlined_call_operand.vmem [shape: f32[6,16,1], index: 4, kind: input, shape index: {}]   ;;  %s5297_s6 = inlined_call_operand.vmem [shape: f32[6,16,1], index: 6, kind: input, shape index: {}]   ;;  %s5298_s1 = inlined_call_operand.vmem [shape: f32[9,1,256], index: 1, kind: input, shape index: {}]   ;;  %s5299_s5 = inlined_call_operand.vmem [shape: f32[6,16,16], index: 5, kind: input, shape index: {}]   ;;  %s5300_s9 = inlined_call_operand.vmem [shape: bf16[256,128], index: 9, kind: input, shape index: {}]   ;;  %s5301_s2 = inlined_call_operand.vmem [shape: f32[9,1,128], index: 2, kind: input, shape index: {}]   ;;  %s5302_s7 = inlined_call_operand.vmem [shape: f32[3,16,1], index: 7, kind: input, shape index: {}]   ;;  %s5303_s10 = inlined_call_operand.vmem [shape: bf16[128,256], index: 10, kind: input, shape index: {}]   ;;  %s5304_s8 = inlined_call_operand.vmem [shape: f32[2,16,16], index: 8, kind: input, shape index: {}]   ;;  %s5305_s11 = inlined_call_operand.vmem [shape: f32[16,256], index: 11, kind: output, shape index: {}]  }
   0x1   :  { %v3105_v0 = vld [vmem:[%s5294_s0 + $0x10] sm:$0xff]  ;;  %v3110_v1 = vld [vmem:[%s5294_s0] sm:$0xff]  ;;  %2908 = vset.pattern.permute.xlu1 %v5318_v2  ;;  %2909 = vset.pattern.permute.xlu2 %v5308_v3  ;;  %v3123_v4 = vld [vmem:[%s5294_s0 + $0x18] sm:$0xff]  ;;  %s3025_s29 = smov 1   ;;  %s3027_s13 = smov 127   ;;  %v5316_v10 = vmov 4   ;;  %v50_v51 = vlaneseq }
   0x2   :  { %69 = vrot.lane.b32.xlu1 %v3105_v0, %s3021_s21  ;;  %44 = vrot.lane.b32.xlu0 %v3105_v0, %s3022_s22  ;;  %v3128_v5 = vld [vmem:[%s5294_s0 + $0x8] sm:$0xff]  ;;  %s3024_s0 = smov 13   ;;  %v3161_v8 = vld [vmem:[%s5295_s3] sm:$0xff]  ;;  %v5314_v11 = vmov 5   ;;  %s3030_s14 = smov 115   ;;  %v5310_v12 = vmov 7  }
   0x3   :  { %42 = vrot.lane.b32.xlu2 %v3110_v1, %s3022_s22  ;;  %2910 = vset.pattern.permute.xlu0 %v5306_v6  ;;  %v3146_v7 = vld [vmem:[%s5295_s3 + $0x8] sm:$0xff]  ;;  %s3032_s15 = smov 114   ;;  %s3033_s16 = smov 113   ;;  %v5312_v14 = vmov 6   ;;  %v5322_v15 = vmov 8   ;;  %v390_v31 = vld [vmem:[%s5296_s4] sm:$0xff] }
   0x4   :  { %v391_v27 = vld [vmem:[%s5296_s4 + $0x8] sm:$0xff]  ;;  %v3296_v52 = vand.u32 127, %v50_v51  ;;  %v57_v56 = vld [vmem:[%s5298_s1] sm:$0x3]  ;;  %v2631_v57 = vld [vmem:[%s5298_s1 + $0x2] sm:$0x3] }
   0x5   :  { %v417_v32 = vld [vmem:[%s5297_s6 + $0x8] sm:$0xff]  ;;  %v2632_v58 = vld [vmem:[%s5298_s1 + $0x4] sm:$0x3]  ;;  %v3319_v61 = vperm.slane %v57_v56, 0  ;;  %v3321_v62 = vperm.slane %v57_v56, 1  ;;  %v3323_v63 = vperm.slane %v2631_v57, 0 }
   0x6   :  { %vm52_vm0 = vcmp.lt.s32.totalorder %v3296_v52, 15  ;;  %vm75_vm1 = vcmp.lt.s32.totalorder %v3296_v52, 14  ;;  %vm99_vm2 = vcmp.lt.s32.totalorder %v3296_v52, 13  ;;  %v2633_v51 = vld [vmem:[%s5298_s1 + $0x6] sm:$0x3]  ;;  %vm123_vm3 = vcmp.lt.s32.totalorder %v3296_v52, 1 }
   0x7   :  { %5399 = vst [vmem:[#allocation3_spill] sm:$0xff] %v3319_v61  ;;  %vm158_vm4 = vcmp.lt.s32.totalorder %v3296_v52, 127  ;;  %vm182_vm5 = vcmp.lt.s32.totalorder %v3296_v52, 115  ;;  %vm206_vm6 = vcmp.lt.s32.totalorder %v3296_v52, 114  ;;  %vm230_vm7 = vcmp.lt.s32.totalorder %v3296_v52, 113  ;;  %s3037_s17 = smov 122  }
   0x8   :  { %5400 = vst [vmem:[#allocation4_spill] sm:$0xff] %v3321_v62  ;;  %vm428_vm8 = vcmask 130048   ;;  %s3038_s18 = smov 6   ;;  %s3039_s19 = smov 7  }
   0x9   :  { %5401 = vst [vmem:[#allocation5_spill] sm:$0xff] %v3323_v63  ;;  %s3040_s20 = smov 121   ;;  %s3041_s23 = smov 120  }
   0xa   :  { %73 = vrot.lane.b32.xlu1 %v3123_v4, %s3021_s21  ;;  %48 = vrot.lane.b32.xlu0 %v3123_v4, %s3022_s22 }
   0xb   :  { %46 = vrot.lane.b32.xlu2 %v3128_v5, %s3022_s22 }
  0x12   :  { %71 = vrot.lane.b32.xlu1 %v3128_v5, %s3021_s21  ;;  %67 = vrot.lane.b32.xlu0 %v3110_v1, %s3021_s21 }
  0x13   :  { %93 = vrot.lane.b32.xlu2 %v3105_v0, %s3024_s0 }
  0x1a   :  { %255 = vperm.xlu1 %2908, %v3146_v7   ;;  %97 = vrot.lane.b32.xlu0 %v3123_v4, %s3024_s0 }
  0x1b   :  { %267 = vperm.xlu2 %2909, %v3146_v7  }
  0x22   :  { %95 = vrot.lane.b32.xlu1 %v3128_v5, %s3024_s0  ;;  %91 = vrot.lane.b32.xlu0 %v3110_v1, %s3024_s0 }
  0x23   :  { %117 = vrot.lane.b32.xlu2 %v3105_v0, %s3025_s29 }
  0x2a   :  { %250 = vperm.xlu1 %2908, %v3161_v8   ;;  %121 = vrot.lane.b32.xlu0 %v3123_v4, %s3025_s29 }
  0x2b   :  { %263 = vperm.xlu2 %2909, %v3161_v8  }
  0x32   :  { %115 = vrot.lane.b32.xlu1 %v3110_v1, %s3025_s29  ;;  %283 = vperm.xlu0 %2910, %v3146_v7  }
  0x33   :  { %119 = vrot.lane.b32.xlu2 %v3128_v5, %s3025_s29  ;;  %2911 = vset.pattern.permute.xlu1 %v5306_v6 }
  0x34   :  { %2912 = vset.pattern.permute.xlu2 %v5320_v9 }
  0x3a   :  { %279 = vperm.xlu1 %2911, %v3161_v8   ;;  %152 = vrot.lane.b32.xlu0 %v3105_v0, %s3027_s13 }
  0x3b   :  { %299 = vperm.xlu2 %2912, %v3146_v7   ;;  %2913 = vset.pattern.permute.xlu0 %v5316_v10 }
  0x42   :  { %156 = vrot.lane.b32.xlu1 %v3123_v4, %s3027_s13  ;;  %315 = vperm.xlu0 %2913, %v3146_v7  }
  0x43   :  { %295 = vperm.xlu2 %2912, %v3161_v8   ;;  %2914 = vset.pattern.permute.xlu1 %v5314_v11 }
  0x4a   :  { %150 = vrot.lane.b32.xlu1 %v3110_v1, %s3027_s13  ;;  %311 = vperm.xlu0 %2913, %v3161_v8  }
  0x4b   :  { %154 = vrot.lane.b32.xlu2 %v3128_v5, %s3027_s13 }
  0x4c   :  { %2917 = vset.pattern.permute.xlu2 %v5310_v12  ;;  %v3363_v12 = vperm.slane %v2633_v51, 1 }
  0x4e   :  { %5407 = vst [vmem:[#allocation11_spill] sm:$0xff] %v3363_v12 }
  0x52   :  { %176 = vrot.lane.b32.xlu1 %v3105_v0, %s3030_s14  ;;  %178 = vrot.lane.b32.xlu0 %v3128_v5, %s3030_s14 }
  0x53   :  { %180 = vrot.lane.b32.xlu2 %v3123_v4, %s3030_s14  ;;  %2915 = vset.pattern.permute.xlu0 %v5314_v11 }
  0x5a   :  { %331 = vperm.xlu1 %2914, %v3146_v7   ;;  %327 = vperm.xlu0 %2915, %v3161_v8  }
  0x5b   :  { %174 = vrot.lane.b32.xlu2 %v3110_v1, %s3030_s14 }
  0x5d   :  { %v3201_v13 = vpop.permute.xlu2 %42 }
  0x62   :  { %200 = vrot.lane.b32.xlu1 %v3105_v0, %s3032_s15  ;;  %228 = vrot.lane.b32.xlu0 %v3123_v4, %s3033_s16 }
  0x63   :  { %204 = vrot.lane.b32.xlu2 %v3123_v4, %s3032_s15  ;;  %2916 = vset.pattern.permute.xlu1 %v5312_v14 }
  0x64   :  { %2918 = vset.pattern.permute.xlu0 %v5322_v15 }
  0x65   :  { %v3211_v16 = vpop.permute.xlu2 %46 }
  0x6a   :  { %347 = vperm.xlu1 %2916, %v3146_v7   ;;  %222 = vrot.lane.b32.xlu0 %v3110_v1, %s3033_s16 }
  0x6b   :  { %198 = vrot.lane.b32.xlu2 %v3110_v1, %s3032_s15 }
  0x6d   :  { %v3218_v17 = vpop.permute.xlu2 %93 }
  0x72   :  { %202 = vrot.lane.b32.xlu1 %v3128_v5, %s3032_s15  ;;  %379 = vperm.xlu0 %2918, %v3146_v7  }
  0x73   :  { %224 = vrot.lane.b32.xlu2 %v3105_v0, %s3033_s16 }
  0x74   :  { %v3225_v18 = vpop.permute.xlu1 %69  ;;  %v45_v19 = vpop.permute.xlu0 %44 }
  0x75   :  { %v3227_v20 = vpop.permute.xlu2 %267 }
  0x7a   :  { %343 = vperm.xlu1 %2916, %v3161_v8   ;;  %2924 = vset.pattern.permute.xlu0 %v5320_v9 }
  0x7b   :  { %363 = vperm.xlu2 %2917, %v3146_v7   ;;  %v3326_v7 = vperm.slane %v2631_v57, 1 }
  0x7c   :  { %v3232_v21 = vpop.permute.xlu1 %73  ;;  %v49_v22 = vpop.permute.xlu0 %48 }
  0x7d   :  { %v3234_v23 = vpop.permute.xlu2 %117  ;;  %v54_v59 = vsel %vm52_vm0, %v45_v19, %v49_v22  ;;  %v56_v60 = vsel %vm52_vm0, %v49_v22, %v45_v19  ;;  %5402 = vst [vmem:[#allocation6_spill] sm:$0xff] %v3326_v7  ;;  %v77_v19 = vsel %vm75_vm1, %v3225_v18, %v3232_v21 }
  0x7e   :  { %v65_v22 = vmul.f32 %v3319_v61, %v56_v60  ;;  %v90_v60 = vmul.f32 %v3326_v7, %v77_v19 }
  0x82   :  { %226 = vrot.lane.b32.xlu1 %v3128_v5, %s3033_s16 }
  0x83   :  { %359 = vperm.xlu2 %2917, %v3161_v8   ;;  %2919 = vset.pattern.permute.xlu1 %v5322_v15 }
  0x84   :  { %v3240_v24 = vpop.permute.xlu1 %71  ;;  %v3242_v25 = vpop.permute.xlu0 %67 }
  0x85   :  { %v3244_v26 = vpop.permute.xlu2 %263 }
  0x8a   :  { %375 = vperm.xlu1 %2919, %v3161_v8   ;;  %v79_v8 = vsel %vm75_vm1, %v3232_v21, %v3225_v18 }
  0x8b   :  { %2920 = vset.pattern.permute.xlu2 %v5318_v2  ;;  %v89_v21 = vmul.f32 %v3323_v63, %v79_v8 }
  0x8c   :  { %v3251_v28 = vpop.permute.xlu1 %255  ;;  %v98_v29 = vpop.permute.xlu0 %97  ;;  %399 = vperm.xlu2 %2920, %v391_v27   ;;  %v3332_v27 = vperm.slane %v2632_v58, 0 }
  0x8d   :  { %v3253_v30 = vpop.permute.xlu2 %119  ;;  %v101_v56 = vsel %vm99_vm2, %v3218_v17, %v98_v29  ;;  %v103_v57 = vsel %vm99_vm2, %v98_v29, %v3218_v17  ;;  %v260_v17 = vmul.f32 %v3251_v28, %v65_v22  ;;  %v272_v22 = vmul.f32 %v3227_v20, %v89_v21 }
  0x8e   :  { %5403 = vst [vmem:[#allocation7_spill] sm:$0xff] %v3332_v27  ;;  %v113_v8 = vmul.f32 %v3332_v27, %v103_v57 }
  0x8f   :  { %v276_v57 = vadd.f32 %v272_v22, %v260_v17 }
  0x92   :  { %2921 = vset.pattern.permute.xlu1 %v5318_v2 }
  0x93   :  { %394 = vperm.xlu1 %2921, %v390_v31   ;;  %v66_v31 = vmul.f32 %v3321_v62, %v54_v59 }
  0x94   :  { %v3262_v33 = vpop.permute.xlu1 %95  ;;  %v3264_v34 = vpop.permute.xlu0 %91  ;;  %425 = vperm.xlu2 %2920, %v417_v32   ;;  %v3340_v32 = vperm.slane %v2632_v58, 1  ;;  %v2634_v58 = vld [vmem:[%s5298_s1 + $0x8] sm:$0x3] }
  0x95   :  { %v3266_v35 = vpop.permute.xlu2 %299  ;;  %v261_v29 = vmul.f32 %v3251_v28, %v66_v31  ;;  %v3375_v10 = vperm.slane %v2634_v58, 0  ;;  %v273_v28 = vmul.f32 %v3227_v20, %v90_v60 }
  0x96   :  { %5404 = vst [vmem:[#allocation8_spill] sm:$0xff] %v3340_v32  ;;  %v114_v14 = vmul.f32 %v3340_v32, %v101_v56  ;;  %v2635_v56 = vld [vmem:[%s5298_s1 + $0xa] sm:$0x3] }
  0x97   :  { %5408 = vst [vmem:[#allocation12_spill] sm:$0xff] %v3375_v10  ;;  %v3394_v60 = vperm.slane %v2635_v56, 0  ;;  %v3396_v17 = vperm.slane %v2635_v56, 1 }
  0x99   :  { %5410 = vst [vmem:[#allocation14_spill] sm:$0xff] %v3394_v60 }
  0x9a   :  { %5411 = vst [vmem:[#allocation15_spill] sm:$0xff] %v3396_v17 }
  0x9b   :  { %2922 = vset.pattern.permute.xlu1 %v5308_v3  ;;  %v3361_v3 = vperm.slane %v2633_v51, 0  ;;  %v3377_v51 = vperm.slane %v2634_v58, 1 }
  0x9c   :  { %v3269_v36 = vpop.permute.xlu1 %250  ;;  %v122_v37 = vpop.permute.xlu0 %121  ;;  %2923 = vset.pattern.permute.xlu2 %v5306_v6 }
  0x9d   :  { %v3272_v38 = vpop.permute.xlu2 %295  ;;  %5406 = vst [vmem:[#allocation10_spill] sm:$0xff] %v3361_v3  ;;  %v125_v11 = vsel %vm123_vm3, %v3234_v23, %v122_v37  ;;  %v127_v19 = vsel %vm123_vm3, %v122_v37, %v3234_v23  ;;  %v277_v23 = vadd.f32 %v273_v28, %v261_v29  ;;  %v148_v37 = vmul.f32 %v3375_v10, %v3105_v0  ;;  %v2637_v28 = vld [vmem:[%s5298_s1 + $0xe] sm:$0x3] }
  0x9e   :  { %5409 = vst [vmem:[#allocation13_spill] sm:$0xff] %v3377_v51  ;;  %v137_v9 = vmul.f32 %v3361_v3, %v127_v19  ;;  %v138_v15 = vmul.f32 %v3363_v12, %v125_v11  ;;  %v149_v21 = vmul.f32 %v3377_v51, %v3123_v4 }
  0xa4   :  { %v3274_v39 = vpop.permute.xlu1 %115  ;;  %v284_v40 = vpop.permute.xlu0 %283 }
  0xa5   :  { %v3276_v41 = vpop.permute.xlu2 %154  ;;  %v288_v2 = vmul.f32 %v284_v40, %v113_v8  ;;  %v289_v31 = vmul.f32 %v284_v40, %v114_v14  ;;  %v2636_v14 = vld [vmem:[%s5298_s1 + $0xc] sm:$0x3]  ;;  %v305_v8 = vmul.f32 %v3266_v35, %v138_v15 }
  0xa6   :  { %v3409_v19 = vperm.slane %v2636_v14, 0  ;;  %v3411_v22 = vperm.slane %v2636_v14, 1 }
  0xa7   :  { %v292_v58 = vadd.f32 %v288_v2, %v276_v57  ;;  %v293_v29 = vadd.f32 %v289_v31, %v277_v23  ;;  %v304_v2 = vmul.f32 %v3266_v35, %v137_v9  ;;  %v3429_v23 = vperm.slane %v2637_v28, 0 }
  0xa8   :  { %5412 = vst [vmem:[#allocation16_spill] sm:$0xff] %v3411_v22 }
  0xa9   :  { %v309_v57 = vadd.f32 %v305_v8, %v293_v29  ;;  %5413 = vst [vmem:[#allocation17_spill] sm:$0xff] %v3429_v23 }
  0xac   :  { %v3278_v42 = vpop.permute.xlu1 %279  ;;  %v3280_v43 = vpop.permute.xlu0 %152 }
  0xad   :  { %v3282_v44 = vpop.permute.xlu2 %180 }
  0xb4   :  { %v3284_v45 = vpop.permute.xlu1 %156  ;;  %v3286_v46 = vpop.permute.xlu0 %315 }
  0xb5   :  { %v3288_v47 = vpop.permute.xlu2 %174  ;;  %v160_v0 = vsel %vm158_vm4, %v3280_v43, %v3284_v45  ;;  %v162_v4 = vsel %vm158_vm4, %v3284_v45, %v3280_v43  ;;  %v320_v31 = vmul.f32 %v3286_v46, %v148_v37  ;;  %v321_v56 = vmul.f32 %v3286_v46, %v149_v21  ;;  %v2638_v37 = vld [vmem:[%s5298_s1 + $0x10] sm:$0x3] }
  0xb6   :  { %v172_v15 = vmul.f32 %v3394_v60, %v160_v0  ;;  %v173_v35 = vmul.f32 %v3396_v17, %v162_v4  ;;  %v308_v45 = vadd.f32 %v304_v2, %v292_v58  ;;  %v3431_v46 = vperm.slane %v2637_v28, 1 }
  0xb7   :  { %v325_v0 = vadd.f32 %v321_v56, %v309_v57  ;;  %v3447_v28 = vperm.slane %v2638_v37, 0 }
  0xb8   :  { %5414 = vst [vmem:[#allocation18_spill] sm:$0xff] %v3431_v46  ;;  %v324_v58 = vadd.f32 %v320_v31, %v308_v45 }
  0xb9   :  { %5416 = vst [vmem:[#allocation20_spill] sm:$0xff] %v3447_v28 }
  0xbc   :  { %v3290_v48 = vpop.permute.xlu1 %150  ;;  %v3292_v49 = vpop.permute.xlu0 %311 }
  0xbd   :  { %v3294_v50 = vpop.permute.xlu2 %204 }
  0xc4   :  { %v3298_v53 = vpop.permute.xlu1 %176  ;;  %v3300_v54 = vpop.permute.xlu0 %178 }
  0xc5   :  { %v3302_v55 = vpop.permute.xlu2 %198  ;;  %v184_v43 = vsel %vm182_vm5, %v3298_v53, %v3282_v44  ;;  %v186_v9 = vsel %vm182_vm5, %v3282_v44, %v3298_v53 }
  0xc6   :  { %5398 = vst [vmem:[#allocation2_spill] sm:$0xff] %v3302_v55  ;;  %v196_v44 = vmul.f32 %v3409_v19, %v184_v43  ;;  %v197_v53 = vmul.f32 %v3411_v22, %v186_v9  ;;  %v3449_v43 = vperm.slane %v2638_v37, 1 }
  0xc8   :  { %5417 = vst [vmem:[#allocation21_spill] sm:$0xff] %v3449_v43 }
  0xcc   :  { %v332_v6 = vpop.permute.xlu1 %331  ;;  %v3351_v18 = vpop.permute.xlu0 %327 }
  0xcd   :  { %5405 = vst [vmem:[#allocation9_spill] sm:$0xff] %v3351_v18  ;;  %v3358_v59 = vpop.permute.xlu2 %224  ;;  %v336_v21 = vmul.f32 %v332_v6, %v172_v15  ;;  %v337_v14 = vmul.f32 %v332_v6, %v173_v35 }
  0xd4   :  { %v201_v20 = vpop.permute.xlu1 %200  ;;  %v229_v40 = vpop.permute.xlu0 %228 }
  0xd5   :  { %v364_v11 = vpop.permute.xlu2 %363  ;;  %v208_v29 = vsel %vm206_vm6, %v201_v20, %v3294_v50  ;;  %v210_v4 = vsel %vm206_vm6, %v3294_v50, %v201_v20  ;;  %v232_v31 = vsel %vm230_vm7, %v3358_v59, %v229_v40  ;;  %v234_v56 = vsel %vm230_vm7, %v229_v40, %v3358_v59 }
  0xd6   :  { %v340_v50 = vadd.f32 %v336_v21, %v324_v58  ;;  %v341_v20 = vadd.f32 %v337_v14, %v325_v0  ;;  %v220_v35 = vmul.f32 %v3429_v23, %v208_v29  ;;  %v221_v45 = vmul.f32 %v3431_v46, %v210_v4  ;;  %v3468_v21 = vld [vmem:[%s5295_s3 + $0x18] sm:$0xff] }
  0xd7   :  { %v244_v57 = vmul.f32 %v3447_v28, %v232_v31  ;;  %v245_v37 = vmul.f32 %v3449_v43, %v234_v56  ;;  %643 = vperm.xlu1 %2922, %v3468_v21   ;;  %675 = vperm.xlu0 %2924, %v3468_v21   ;;  %v53_v29 = vsel %vm52_vm0, %v3201_v13, %v3211_v16 }
  0xd8   :  { %659 = vperm.xlu2 %2923, %v3468_v21   ;;  %v76_v4 = vsel %vm75_vm1, %v3242_v25, %v3240_v24 }
  0xdc   :  { %v348_v2 = vpop.permute.xlu1 %347  ;;  %v3445_v8 = vpop.permute.xlu0 %222 }
  0xdd   :  { %5415 = vst [vmem:[#allocation19_spill] sm:$0xff] %v3445_v8  ;;  %v352_v9 = vmul.f32 %v348_v2, %v196_v44  ;;  %v353_v15 = vmul.f32 %v348_v2, %v197_v53  ;;  %v3451_v6 = vpop.permute.xlu2 %359  ;;  %v368_v2 = vmul.f32 %v364_v11, %v220_v35 }
  0xde   :  { %5418 = vst [vmem:[#allocation22_spill] sm:$0xff] %v3451_v6  ;;  %v369_v6 = vmul.f32 %v364_v11, %v221_v45  ;;  %v55_v11 = vsel %vm52_vm0, %v3211_v16, %v3201_v13  ;;  %v64_v16 = vmul.f32 %v3321_v62, %v53_v29 }
  0xdf   :  { %v356_v44 = vadd.f32 %v352_v9, %v340_v50  ;;  %v357_v53 = vadd.f32 %v353_v15, %v341_v20  ;;  %v100_v9 = vsel %vm99_vm2, %v3264_v34, %v3262_v33 }
  0xe0   :  { %v112_v50 = vmul.f32 %v3340_v32, %v100_v9 }
  0xe1   :  { %v372_v59 = vadd.f32 %v368_v2, %v356_v44  ;;  %v373_v40 = vadd.f32 %v369_v6, %v357_v53  ;;  %v63_v6 = vmul.f32 %v3319_v61, %v55_v11  ;;  %v124_v44 = vsel %vm123_vm3, %v3274_v39, %v3253_v30 }
  0xe2   :  { %v5419_v53 = vmov 8   ;;  %v136_v11 = vmul.f32 %v3363_v12, %v124_v44 }
  0xe3   :  { %v258_v20 = vmul.f32 %v3269_v36, %v63_v6  ;;  %2933 = vset.pattern.permute.xlu0 %v5419_v53 }
  0xe4   :  { %v3463_v8 = vpop.permute.xlu1 %202  ;;  %v380_v55 = vpop.permute.xlu0 %379  ;;  %755 = vperm.xlu0 %2933, %v3468_v21   ;;  %v303_v9 = vmul.f32 %v3272_v38, %v136_v11  ;;  %v5425_v44 = vld [vmem:[#allocation19_spill] sm:$0xff] }
  0xe5   :  { %v384_v18 = vmul.f32 %v380_v55, %v244_v57  ;;  %v385_v22 = vmul.f32 %v380_v55, %v245_v37  ;;  %v78_v55 = vsel %vm75_vm1, %v3240_v24, %v3242_v25  ;;  %v88_v24 = vmul.f32 %v3326_v7, %v76_v4 }
  0xe6   :  { %v400_v14 = vpop.permute.xlu2 %399  ;;  %v87_v13 = vmul.f32 %v3323_v63, %v78_v55 }
  0xe7   :  { %v388_v58 = vadd.f32 %v384_v18, %v372_v59  ;;  %v389_v0 = vadd.f32 %v385_v22, %v373_v40  ;;  %v102_v18 = vsel %vm99_vm2, %v3262_v33, %v3264_v34  ;;  %v259_v33 = vmul.f32 %v3269_v36, %v64_v16  ;;  %v3521_v40 = vld [vmem:[%s5295_s3 + $0x10] sm:$0xff] }
  0xe8   :  { %v111_v56 = vmul.f32 %v3332_v27, %v102_v18  ;;  %v126_v34 = vsel %vm123_vm3, %v3253_v30, %v3274_v39  ;;  %v270_v37 = vmul.f32 %v3244_v26, %v87_v13  ;;  %v271_v2 = vmul.f32 %v3244_v26, %v88_v24  ;;  %639 = vperm.xlu1 %2922, %v3521_v40   ;;  %v416_v13 = vld [vmem:[%s5297_s6] sm:$0xff]  ;;  %v5420_v24 = vld [vmem:[#allocation16_spill] sm:$0xff] }
  0xe9   :  { %v404_v22 = vadd.f32 %v400_v14, %v388_v58  ;;  %v405_v15 = vadd.f32 %v400_v14, %v389_v0  ;;  %v287_v59 = vmul.f32 %v3278_v42, %v112_v50  ;;  %v135_v14 = vmul.f32 %v3361_v3, %v126_v34  ;;  %655 = vperm.xlu2 %2923, %v3521_v40   ;;  %v5422_v50 = vld [vmem:[#allocation2_spill] sm:$0xff] }
  0xea   :  { %v286_v36 = vmul.f32 %v3278_v42, %v111_v56  ;;  %v146_v30 = vmul.f32 %v3375_v10, %v3110_v1  ;;  %v274_v39 = vadd.f32 %v270_v37, %v258_v20  ;;  %v275_v26 = vadd.f32 %v271_v2, %v259_v33 }
  0xeb   :  { %v408_v25 = vmax.f32 %v404_v22, 0.0  ;;  %v409_v31 = vmax.f32 %v405_v15, 0.0  ;;  %v147_v42 = vmul.f32 %v3377_v51, %v3128_v5  ;;  %v159_v1 = vsel %vm158_vm4, %v3290_v48, %v3276_v41 }
  0xec   :  { %v344_v35 = vpop.permute.xlu1 %343  ;;  %v290_v55 = vadd.f32 %v286_v36, %v274_v39  ;;  %v291_v58 = vadd.f32 %v287_v59, %v275_v26  ;;  %v161_v0 = vsel %vm158_vm4, %v3276_v41, %v3290_v48  ;;  %v302_v29 = vmul.f32 %v3272_v38, %v135_v14 }
  0xed   :  { %v412_v45 = vmin.f32 %v408_v25, 6.0  ;;  %v413_v57 = vmin.f32 %v409_v31, 6.0  ;;  %v318_v5 = vmul.f32 %v3292_v49, %v146_v30  ;;  %v183_v18 = vsel %vm182_vm5, %v3288_v47, %v3300_v54  ;;  %v5421_v31 = vld [vmem:[#allocation9_spill] sm:$0xff] }
  0xee   :  { %v185_v22 = vsel %vm182_vm5, %v3300_v54, %v3288_v47  ;;  %v170_v15 = vmul.f32 %v3394_v60, %v159_v1  ;;  %v171_v41 = vmul.f32 %v3396_v17, %v161_v0  ;;  %v319_v48 = vmul.f32 %v3292_v49, %v147_v42 }
  0xef   :  { %449 = vmatpush.msra.mxu0 %v412_v45  ;;  %2881 = vmatpush.msra.mxu2 %v412_v45  ;;  %v306_v6 = vadd.f32 %v302_v29, %v290_v55  ;;  %v307_v38 = vadd.f32 %v303_v9, %v291_v58  ;;  %v194_v16 = vmul.f32 %v3409_v19, %v183_v18  ;;  %v5423_v33 = vmov 3   ;;  %v5427_v58 = vld [vmem:[#allocation22_spill] sm:$0xff] }
  0xf0   :  { %472 = vmatpush.msra.mxu1 %v413_v57  ;;  %2883 = vmatpush.msra.mxu3 %v413_v57  ;;  %v195_v25 = vmul.f32 %v5420_v24, %v185_v22  ;;  %v334_v56 = vmul.f32 %v5421_v31, %v170_v15  ;;  %v335_v47 = vmul.f32 %v5421_v31, %v171_v41  ;;  %v5424_v34 = vmov 0   ;;  %v414_v31 = vld [vmem:[%s5299_s5] sm:$0xff] }
  0xf1   :  { %v322_v54 = vadd.f32 %v318_v5, %v306_v6  ;;  %v207_v49 = vsel %vm206_vm6, %v5422_v50, %v3463_v8  ;;  %v209_v20 = vsel %vm206_vm6, %v3463_v8, %v5422_v50  ;;  %2925 = vset.pattern.permute.xlu1 %v5423_v33  ;;  %2934 = vset.pattern.permute.xlu0 %v5424_v34  ;;  %v5426_v59 = vmov 4  }
  0xf2   :  { %v323_v45 = vadd.f32 %v319_v48, %v307_v38  ;;  %v350_v57 = vmul.f32 %v344_v35, %v194_v16  ;;  %v351_v37 = vmul.f32 %v344_v35, %v195_v25  ;;  %671 = vperm.xlu1 %2925, %v3521_v40   ;;  %420 = vperm.xlu0 %2934, %v416_v13   ;;  %v5428_v15 = vmov 5  }
  0xf3   :  { %2926 = vset.pattern.permute.xlu2 %v5426_v59  ;;  %v338_v8 = vadd.f32 %v334_v56, %v322_v54  ;;  %v218_v30 = vmul.f32 %v3429_v23, %v207_v49  ;;  %v219_v39 = vmul.f32 %v3431_v46, %v209_v20  ;;  %v415_v56 = vld [vmem:[%s5299_s5 + $0x8] sm:$0xff]  ;;  %v5430_v54 = vmov 7  }
  0xf4   :  { %v227_v4 = vpop.permute.xlu1 %226  ;;  %v339_v14 = vadd.f32 %v335_v47, %v323_v45  ;;  %691 = vperm.xlu2 %2926, %v3468_v21   ;;  %v5429_v47 = vmov 6  }
  0xf5   :  { %v231_v2 = vsel %vm230_vm7, %v5425_v44, %v227_v4  ;;  %v233_v36 = vsel %vm230_vm7, %v227_v4, %v5425_v44  ;;  %v354_v26 = vadd.f32 %v350_v57, %v338_v8  ;;  %v366_v1 = vmul.f32 %v5427_v58, %v218_v30 }
  0xf6   :  { %v355_v11 = vadd.f32 %v351_v37, %v339_v14  ;;  %v242_v42 = vmul.f32 %v3447_v28, %v231_v2  ;;  %v243_v55 = vmul.f32 %v3449_v43, %v233_v36  ;;  %v367_v0 = vmul.f32 %v5427_v58, %v219_v39  ;;  %v426_v39 = vpop.permute.xlu2 %425 }
  0xf7   :  { %v370_v9 = vadd.f32 %v366_v1, %v354_v26 }
  0xf8   :  { %v371_v5 = vadd.f32 %v367_v0, %v355_v11 }
  0xfa   :  { %2927 = vset.pattern.permute.xlu1 %v5426_v59 }
  0xfb   :  { %687 = vperm.xlu1 %2927, %v3521_v40  }
  0xfc   :  { %v376_v35 = vpop.permute.xlu1 %375  ;;  %2928 = vset.pattern.permute.xlu2 %v5428_v15 }
  0xfd   :  { %v382_v29 = vmul.f32 %v376_v35, %v242_v42  ;;  %v383_v4 = vmul.f32 %v376_v35, %v243_v55  ;;  %707 = vperm.xlu2 %2928, %v3468_v21  }
  0xff   :  { %v386_v18 = vadd.f32 %v382_v29, %v370_v9  ;;  %v387_v22 = vadd.f32 %v383_v4, %v371_v5 }
 0x103   :  { %2929 = vset.pattern.permute.xlu1 %v5428_v15 }
 0x104   :  { %703 = vperm.xlu1 %2929, %v3521_v40  }
 0x105   :  { %v395_v41 = vpop.permute.xlu1 %394  ;;  %2930 = vset.pattern.permute.xlu2 %v5429_v47 }
 0x106   :  { %v402_v48 = vadd.f32 %v395_v41, %v386_v18  ;;  %v403_v6 = vadd.f32 %v395_v41, %v387_v22  ;;  %723 = vperm.xlu2 %2930, %v3468_v21  }
 0x108   :  { %v406_v38 = vmax.f32 %v402_v48, 0.0  ;;  %v407_v13 = vmax.f32 %v403_v6, 0.0  ;;  %v2646_v6 = vld [vmem:[%s5296_s4 + $0x18] sm:$0xff] }
 0x10a   :  { %v410_v16 = vmin.f32 %v406_v38, 6.0  ;;  %v411_v25 = vmin.f32 %v407_v13, 6.0  ;;  %v2645_v13 = vld [vmem:[%s5296_s4 + $0x10] sm:$0xff] }
 0x10c   :  { %450 = vmatpush.msra.mxu0 %v410_v16  ;;  %2882 = vmatpush.msra.mxu2 %v410_v16 }
 0x10d   :  { %473 = vmatpush.msra.mxu1 %v411_v25  ;;  %2884 = vmatpush.msra.mxu3 %v411_v25  ;;  %v2650_v25 = vld [vmem:[%s5297_s6 + $0x18] sm:$0xff] }
 0x10e   :  { %2639 = vmatmul.msk.f32.vlgmr.msra.gmra.mxu0 %vm428_vm8, %v414_v31  ;;  %2640 = vmatmul.msk.f32.vlgmr.msra.gmra.mxu2 %vm428_vm8, %v415_v56 }
 0x10f   :  { %2641 = vmatmul.msk.f32.vlgmr.msra.gmra.mxu1 %vm428_vm8, %v414_v31  ;;  %2642 = vmatmul.msk.f32.vlgmr.msra.gmra.mxu3 %vm428_vm8, %v415_v56  ;;  %v5434_v56 = vmov 1  }
 0x110   :  { %2931 = vset.pattern.permute.xlu1 %v5429_v47  ;;  %2932 = vset.pattern.permute.xlu2 %v5430_v54 }
 0x111   :  { %719 = vperm.xlu1 %2931, %v3521_v40   ;;  %739 = vperm.xlu2 %2932, %v3468_v21  }
 0x119   :  { %2935 = vset.pattern.permute.xlu1 %v5419_v53  ;;  %735 = vperm.xlu2 %2932, %v3521_v40  }
 0x121   :  { %2936 = vset.pattern.permute.xlu2 %v5424_v34 }
 0x132   :  { %v3665_v0 = vpop.permute.xlu2 %659 }
 0x143   :  { %v3675_v4 = vpop.permute.xlu2 %655 }
 0x149   :  { %v3611_v50 = vpop.permute.xlu0 %675  ;;  %v3671_v29 = vpop.permute.xlu1 %643 }
 0x14e   :  { %v3685_v5 = vpop.permute.xlu2 %691 }
 0x156   :  { %v3613_v49 = vpop.permute.xlu0 %755 }
 0x157   :  { %5431 = vst [vmem:[#allocation16_spill] sm:$0xff] %v3613_v49  ;;  %v3695_v22 = vpop.permute.xlu2 %707 }
 0x15a   :  { %v3683_v9 = vpop.permute.xlu1 %639 }
 0x160   :  { %v3703_v48 = vpop.permute.xlu2 %723 }
 0x164   :  { %v421_v20 = vpop.permute.xlu0 %420  ;;  %v3693_v18 = vpop.permute.xlu1 %671 }
 0x16b   :  { %v3717_v16 = vpop.permute.xlu2 %739 }
 0x16c   :  { %5432 = vst [vmem:[#allocation9_spill] sm:$0xff] %v3717_v16 }
 0x16d   :  { %v3701_v41 = vpop.permute.xlu1 %687 }
 0x176   :  { %v3710_v38 = vpop.permute.xlu1 %703 }
 0x183   :  { %v3725_v31 = vpop.permute.xlu1 %719 }
 0x184   :  { %5433 = vst [vmem:[#allocation2_spill] sm:$0xff] %v3725_v31 }
 0x18b   :  { %v452_v45 = vpop.f32.mrf.mxu0 }
 0x18c   :  { %v453_v57 = vadd.f32 %v452_v45, %v421_v20  ;;  %v475_v37 = vpop.f32.mrf.mxu1  ;;  %v5436_v45 = vmov 2  }
 0x18d   :  { %v476_v44 = vadd.f32 %v475_v37, %v421_v20  ;;  %v3731_v20 = vpop.permute.xlu2 %735  ;;  %v2655_v37 = vld [vmem:[%s5295_s3 + $0x20] sm:$0xff] }
 0x18e   :  { %v481_v2 = vmax.f32 %v453_v57, 0.0  ;;  %5435 = vst [vmem:[#allocation19_spill] sm:$0xff] %v3731_v20 }
 0x18f   :  { %v482_v36 = vmax.f32 %v476_v44, 0.0 }
 0x190   :  { %v3615_v8 = vmin.f32 %v481_v2, 6.0 }
 0x191   :  { %v3617_v14 = vmin.f32 %v482_v36, 6.0  ;;  %v455_v42 = vpop.f32.mrf.mxu2 }
 0x192   :  { %505 = vrot.lane.b32.xlu2 %v3615_v8, %s3021_s21  ;;  %489 = vrot.lane.b32.xlu0 %v3615_v8, %s3022_s22  ;;  %v478_v30 = vpop.f32.mrf.mxu3  ;;  %v456_v55 = vadd.f32 %v455_v42, %v426_v39 }
 0x193   :  { %493 = vrot.lane.b32.xlu1 %v3617_v14, %s3022_s22  ;;  %v479_v35 = vadd.f32 %v478_v30, %v426_v39  ;;  %v3787_v49 = vmul.f32 %v3617_v14, %v3377_v51 }
 0x194   :  { %v483_v58 = vmax.f32 %v456_v55, 0.0 }
 0x195   :  { %v484_v26 = vmax.f32 %v479_v35, 0.0  ;;  %5442 = vst [vmem:[#allocation27_spill] sm:$0xff] %v3787_v49 }
 0x196   :  { %v3657_v1 = vmin.f32 %v483_v58, 6.0 }
 0x197   :  { %v3631_v11 = vmin.f32 %v484_v26, 6.0 }
 0x199   :  { %v3795_v16 = vmul.f32 %v3631_v11, %v3377_v51 }
 0x19a   :  { %521 = vrot.lane.b32.xlu2 %v3615_v8, %s3024_s0  ;;  %509 = vrot.lane.b32.xlu0 %v3617_v14, %s3021_s21 }
 0x19b   :  { %541 = vrot.lane.b32.xlu1 %v3617_v14, %s3025_s29  ;;  %5443 = vst [vmem:[#allocation28_spill] sm:$0xff] %v3795_v16 }
 0x1a2   :  { %495 = vrot.lane.b32.xlu2 %v3631_v11, %s3022_s22  ;;  %525 = vrot.lane.b32.xlu0 %v3617_v14, %s3024_s0 }
 0x1a3   :  { %561 = vrot.lane.b32.xlu1 %v3617_v14, %s3027_s13 }
 0x1aa   :  { %511 = vrot.lane.b32.xlu2 %v3631_v11, %s3021_s21  ;;  %537 = vrot.lane.b32.xlu0 %v3615_v8, %s3025_s29 }
 0x1ab   :  { %577 = vrot.lane.b32.xlu1 %v3617_v14, %s3030_s14 }
 0x1b2   :  { %527 = vrot.lane.b32.xlu2 %v3631_v11, %s3024_s0  ;;  %557 = vrot.lane.b32.xlu0 %v3615_v8, %s3027_s13 }
 0x1b3   :  { %593 = vrot.lane.b32.xlu1 %v3617_v14, %s3032_s15 }
 0x1ba   :  { %543 = vrot.lane.b32.xlu2 %v3631_v11, %s3025_s29  ;;  %573 = vrot.lane.b32.xlu0 %v3615_v8, %s3030_s14 }
 0x1bb   :  { %609 = vrot.lane.b32.xlu1 %v3617_v14, %s3033_s16 }
 0x1c2   :  { %563 = vrot.lane.b32.xlu2 %v3631_v11, %s3027_s13  ;;  %589 = vrot.lane.b32.xlu0 %v3615_v8, %s3032_s15 }
 0x1c3   :  { %491 = vrot.lane.b32.xlu1 %v3657_v1, %s3022_s22 }
 0x1ca   :  { %575 = vrot.lane.b32.xlu2 %v3657_v1, %s3030_s14  ;;  %605 = vrot.lane.b32.xlu0 %v3615_v8, %s3033_s16 }
 0x1cb   :  { %507 = vrot.lane.b32.xlu1 %v3657_v1, %s3021_s21 }
 0x1d2   :  { %591 = vrot.lane.b32.xlu2 %v3657_v1, %s3032_s15  ;;  %579 = vrot.lane.b32.xlu0 %v3631_v11, %s3030_s14 }
 0x1d3   :  { %523 = vrot.lane.b32.xlu1 %v3657_v1, %s3024_s0 }
 0x1da   :  { %607 = vrot.lane.b32.xlu2 %v3657_v1, %s3033_s16  ;;  %595 = vrot.lane.b32.xlu0 %v3631_v11, %s3032_s15 }
 0x1db   :  { %539 = vrot.lane.b32.xlu1 %v3657_v1, %s3025_s29 }
 0x1e2   :  { %611 = vrot.lane.b32.xlu0 %v3631_v11, %s3033_s16  ;;  %776 = vperm.xlu2 %2936, %v2646_v6  }
 0x1e3   :  { %559 = vrot.lane.b32.xlu1 %v3657_v1, %s3027_s13 }
 0x1ea   :  { %631 = vperm.xlu0 %2934, %v3468_v21   ;;  %v2649_v21 = vld [vmem:[%s5297_s6 + $0x10] sm:$0xff]  ;;  %804 = vperm.xlu2 %2936, %v2650_v25  }
 0x1eb   :  { %751 = vperm.xlu1 %2935, %v3521_v40  }
 0x1ec   :  { %v506_v2 = vpop.permute.xlu2 %505 }
 0x1f2   :  { %626 = vperm.xlu0 %2934, %v3521_v40   ;;  %v2656_v40 = vld [vmem:[%s5295_s3 + $0x28] sm:$0xff]  ;;  %2939 = vset.pattern.permute.xlu2 %v5436_v45 }
 0x1f3   :  { %2937 = vset.pattern.permute.xlu1 %v5424_v34  ;;  %1037 = vperm.xlu2 %2939, %v2656_v40  }
 0x1f4   :  { %771 = vperm.xlu1 %2937, %v2645_v13   ;;  %v522_v39 = vpop.permute.xlu2 %521 }
 0x1fa   :  { %799 = vperm.xlu0 %2934, %v2649_v21  }
 0x1fb   :  { %1033 = vperm.xlu2 %2939, %v2655_v37  }
 0x1fc   :  { %2938 = vset.pattern.permute.xlu1 %v5434_v56  ;;  %v3751_v42 = vpop.permute.xlu2 %495 }
 0x1fd   :  { %1021 = vperm.xlu1 %2938, %v2656_v40  }
 0x202   :  { %1009 = vperm.xlu0 %2934, %v2656_v40  }
 0x203   :  { %2942 = vset.pattern.permute.xlu2 %v5426_v59 }
 0x204   :  { %v3734_v57 = vpop.permute.xlu0 %489  ;;  %1069 = vperm.xlu2 %2942, %v2656_v40   ;;  %v512_v21 = vpop.permute.xlu2 %511 }
 0x205   :  { %v3739_v44 = vpop.permute.xlu1 %493  ;;  %1017 = vperm.xlu1 %2938, %v2655_v37  }
 0x206   :  { %v497_v14 = vsel %vm52_vm0, %v3734_v57, %v3739_v44 }
 0x20a   :  { %1004 = vperm.xlu0 %2934, %v2655_v37  }
 0x20c   :  { %v510_v36 = vpop.permute.xlu0 %509  ;;  %2944 = vset.pattern.permute.xlu2 %v5428_v15 }
 0x20d   :  { %v3741_v30 = vpop.permute.xlu1 %541  ;;  %2941 = vset.pattern.permute.xlu1 %v5423_v33  ;;  %1085 = vperm.xlu2 %2944, %v2656_v40  }
 0x20e   :  { %1049 = vperm.xlu1 %2941, %v2655_v37  }
 0x212   :  { %2940 = vset.pattern.permute.xlu0 %v5423_v33  ;;  %v528_v33 = vpop.permute.xlu2 %527 }
 0x213   :  { %1053 = vperm.xlu0 %2940, %v2656_v40  }
 0x214   :  { %v526_v35 = vpop.permute.xlu0 %525 }
 0x215   :  { %v3746_v26 = vpop.permute.xlu1 %561  ;;  %2946 = vset.pattern.permute.xlu2 %v5429_v47 }
 0x216   :  { %2943 = vset.pattern.permute.xlu1 %v5426_v59  ;;  %1101 = vperm.xlu2 %2946, %v2656_v40  }
 0x217   :  { %1065 = vperm.xlu1 %2943, %v2655_v37  }
 0x21b   :  { %2949 = vset.pattern.permute.xlu0 %v5419_v53 }
 0x21c   :  { %v538_v55 = vpop.permute.xlu0 %537  ;;  %1133 = vperm.xlu0 %2949, %v2656_v40  }
 0x21d   :  { %v3753_v58 = vpop.permute.xlu1 %577 }
 0x21e   :  { %2948 = vset.pattern.permute.xlu2 %v5430_v54 }
 0x21f   :  { %2945 = vset.pattern.permute.xlu1 %v5428_v15  ;;  %1117 = vperm.xlu2 %2948, %v2656_v40   ;;  %v544_v15 = vpop.permute.xlu2 %543 }
 0x220   :  { %1081 = vperm.xlu1 %2945, %v2655_v37  }
 0x224   :  { %v558_v6 = vpop.permute.xlu0 %557  ;;  %2952 = vset.pattern.permute.xlu0 %v5434_v56 }
 0x225   :  { %v3758_v13 = vpop.permute.xlu1 %593 }
 0x226   :  { %5437 = vst [vmem:[#allocation22_spill] sm:$0xff] %v3758_v13  ;;  %v499_v13 = vsel %vm52_vm0, %v3739_v44, %v3734_v57  ;;  %v3839_v44 = vmul.f32 %v3685_v5, %v3795_v16 }
 0x227   :  { %1113 = vperm.xlu2 %2948, %v2655_v37   ;;  %v3773_v31 = vpop.permute.xlu2 %563 }
 0x228   :  { %2947 = vset.pattern.permute.xlu1 %v5429_v47 }
 0x229   :  { %1097 = vperm.xlu1 %2947, %v2655_v37  }
 0x22c   :  { %v3761_v25 = vpop.permute.xlu0 %573 }
 0x22d   :  { %v3763_v59 = vpop.permute.xlu1 %609 }
 0x22e   :  { %5438 = vst [vmem:[#allocation23_spill] sm:$0xff] %v3763_v59 }
 0x22f   :  { %2951 = vset.pattern.permute.xlu2 %v5424_v34 }
 0x231   :  { %2950 = vset.pattern.permute.xlu1 %v5419_v53  ;;  %v3779_v53 = vpop.permute.xlu2 %575 }
 0x232   :  { %1129 = vperm.xlu1 %2950, %v2655_v37   ;;  %v3783_v37 = vmul.f32 %v3615_v8, %v3375_v10 }
 0x234   :  { %v3767_v45 = vpop.permute.xlu0 %589  ;;  %5441 = vst [vmem:[#allocation26_spill] sm:$0xff] %v3783_v37  ;;  %v3821_v51 = vmul.f32 %v3701_v41, %v3783_v37 }
 0x235   :  { %5439 = vst [vmem:[#allocation24_spill] sm:$0xff] %v3767_v45  ;;  %v492_v56 = vpop.permute.xlu1 %491  ;;  %v3799_v45 = vmul.f32 %v3657_v1, %v3375_v10  ;;  %v529_v1 = vsel %vm99_vm2, %v522_v39, %v526_v35  ;;  %v3825_v10 = vmul.f32 %v3701_v41, %v3787_v49  ;;  %v3845_v41 = vmul.f32 %v497_v14, %v3321_v62 }
 0x236   :  { %v565_v49 = vsel %vm158_vm4, %v558_v6, %v3746_v26 }
 0x237   :  { %5444 = vst [vmem:[#allocation29_spill] sm:$0xff] %v3799_v45  ;;  %v3835_v57 = vmul.f32 %v3685_v5, %v3799_v45 }
 0x23a   :  { %2953 = vset.pattern.permute.xlu1 %v5424_v34  ;;  %v513_v34 = vsel %vm75_vm1, %v506_v2, %v510_v36 }
 0x23b   :  { %v3813_v11 = vmul.f32 %v513_v34, %v3326_v7  ;;  %v547_v34 = vsel %vm123_vm3, %v3741_v30, %v538_v55 }
 0x23c   :  { %v3770_v47 = vpop.permute.xlu0 %605 }
 0x23d   :  { %5440 = vst [vmem:[#allocation25_spill] sm:$0xff] %v3770_v47  ;;  %v508_v20 = vpop.permute.xlu1 %507  ;;  %v515_v47 = vsel %vm75_vm1, %v510_v36, %v506_v2  ;;  %v531_v36 = vsel %vm99_vm2, %v526_v35, %v522_v39  ;;  %v3842_v39 = vmul.f32 %v499_v13, %v3319_v61  ;;  %v3865_v14 = vmul.f32 %v3683_v9, %v3813_v11 }
 0x23e   :  { %v3810_v2 = vmul.f32 %v515_v47, %v3323_v63  ;;  %v545_v47 = vsel %vm123_vm3, %v538_v55, %v3741_v30  ;;  %v3850_v37 = vmul.f32 %v531_v36, %v3332_v27  ;;  %v3853_v30 = vmul.f32 %v529_v1, %v3340_v32 }
 0x23f   :  { %v514_v55 = vsel %vm75_vm1, %v508_v20, %v512_v21  ;;  %v516_v5 = vsel %vm75_vm1, %v512_v21, %v508_v20  ;;  %v3868_v36 = vmul.f32 %v547_v34, %v3361_v3  ;;  %v3871_v1 = vmul.f32 %v545_v47, %v3363_v12  ;;  %v592_v34 = vpop.permute.xlu2 %591 }
 0x240   :  { %v3861_v13 = vmul.f32 %v3683_v9, %v3810_v2  ;;  %v567_v20 = vsel %vm158_vm4, %v3746_v26, %v558_v6  ;;  %v498_v21 = vsel %vm52_vm0, %v492_v56, %v3751_v42  ;;  %v500_v9 = vsel %vm52_vm0, %v3751_v42, %v492_v56 }
 0x241   :  { %5445 = vst [vmem:[#allocation30_spill] sm:$0xff] %v3868_v36  ;;  %v3886_v47 = vmul.f32 %v516_v5, %v3323_v63  ;;  %v3889_v16 = vmul.f32 %v514_v55, %v3326_v7  ;;  %v3897_v6 = vmul.f32 %v3675_v4, %v3850_v37  ;;  %v3901_v56 = vmul.f32 %v3675_v4, %v3853_v30 }
 0x242   :  { %v3909_v5 = vmul.f32 %v3693_v18, %v3868_v36  ;;  %v3919_v4 = vmul.f32 %v567_v20, %v3396_v17  ;;  %v3922_v63 = vmul.f32 %v500_v9, %v3319_v61 }
 0x244   :  { %v3775_v54 = vpop.permute.xlu0 %579 }
 0x245   :  { %v524_v40 = vpop.permute.xlu1 %523 }
 0x246   :  { %v530_v45 = vsel %vm99_vm2, %v524_v40, %v528_v33  ;;  %v532_v26 = vsel %vm99_vm2, %v528_v33, %v524_v40  ;;  %v3913_v33 = vmul.f32 %v3693_v18, %v3871_v1  ;;  %v3916_v40 = vmul.f32 %v565_v49, %v3394_v60 }
 0x247   :  { %v3931_v36 = vmul.f32 %v530_v45, %v3340_v32  ;;  %v648_v49 = vmul.f32 %v3671_v29, %v3886_v47  ;;  %v649_v18 = vmul.f32 %v3671_v29, %v3889_v16 }
 0x248   :  { %v3953_v29 = vmul.f32 %v3710_v38, %v3916_v40 }
 0x24c   :  { %v3777_v59 = vpop.permute.xlu0 %595 }
 0x24d   :  { %v540_v8 = vpop.permute.xlu1 %539 }
 0x24e   :  { %v546_v42 = vsel %vm123_vm3, %v540_v8, %v544_v15  ;;  %v548_v55 = vsel %vm123_vm3, %v544_v15, %v540_v8  ;;  %v3925_v15 = vmul.f32 %v498_v21, %v3321_v62  ;;  %v3928_v8 = vmul.f32 %v532_v26, %v3332_v27 }
 0x24f   :  { %v3938_v20 = vmul.f32 %v548_v55, %v3361_v3  ;;  %v3941_v9 = vmul.f32 %v546_v42, %v3363_v12  ;;  %v3957_v42 = vmul.f32 %v3710_v38, %v3919_v4  ;;  %v582_v55 = vsel %vm182_vm5, %v3779_v53, %v3775_v54 }
 0x250   :  { %v598_v38 = vsel %vm206_vm6, %v592_v34, %v3777_v59  ;;  %v600_v62 = vsel %vm206_vm6, %v3777_v59, %v592_v34  ;;  %v583_v59 = vsel %vm182_vm5, %v3753_v58, %v3761_v25  ;;  %v608_v34 = vpop.permute.xlu2 %607 }
 0x254   :  { %v3847_v35 = vpop.permute.xlu0 %611 }
 0x255   :  { %v560_v7 = vpop.permute.xlu1 %559 }
 0x256   :  { %v566_v26 = vsel %vm158_vm4, %v560_v7, %v3773_v31  ;;  %v568_v45 = vsel %vm158_vm4, %v3773_v31, %v560_v7  ;;  %v584_v7 = vsel %vm182_vm5, %v3775_v54, %v3779_v53  ;;  %v664_v31 = vmul.f32 %v3665_v0, %v3928_v8 }
 0x257   :  { %v3978_v61 = vmul.f32 %v566_v26, %v3394_v60  ;;  %v3981_v53 = vmul.f32 %v568_v45, %v3396_v17  ;;  %v680_v54 = vmul.f32 %v3611_v50, %v3938_v20  ;;  %v3999_v26 = vmul.f32 %v584_v7, %v5420_v24 }
 0x25c   :  { %v632_v21 = vpop.permute.xlu0 %631 }
 0x25d   :  { %v636_v32 = vmul.f32 %v632_v21, %v3922_v63  ;;  %v637_v27 = vmul.f32 %v632_v21, %v3925_v15  ;;  %v665_v21 = vmul.f32 %v3665_v0, %v3931_v36 }
 0x25f   :  { %v652_v12 = vadd.f32 %v648_v49, %v636_v32  ;;  %v653_v3 = vadd.f32 %v649_v18, %v637_v27  ;;  %v681_v27 = vmul.f32 %v3611_v50, %v3941_v9  ;;  %v581_v49 = vsel %vm182_vm5, %v3761_v25, %v3753_v58 }
 0x260   :  { %v3996_v18 = vmul.f32 %v582_v55, %v3409_v19  ;;  %v4011_v58 = vmul.f32 %v600_v62, %v3431_v46  ;;  %v712_v25 = vmul.f32 %v3695_v22, %v3978_v61  ;;  %v713_v55 = vmul.f32 %v3695_v22, %v3981_v53 }
 0x261   :  { %v668_v32 = vadd.f32 %v664_v31, %v652_v12  ;;  %v669_v0 = vadd.f32 %v665_v21, %v653_v3  ;;  %v614_v3 = vsel %vm230_vm7, %v608_v34, %v3847_v35  ;;  %v616_v12 = vsel %vm230_vm7, %v3847_v35, %v608_v34  ;;  %v5446_v34 = vld [vmem:[#allocation22_spill] sm:$0xff] }
 0x262   :  { %v4008_v31 = vmul.f32 %v598_v38, %v3429_v23  ;;  %v728_v38 = vmul.f32 %v3703_v48, %v3996_v18  ;;  %v729_v62 = vmul.f32 %v3703_v48, %v3999_v26  ;;  %v4029_v22 = vmul.f32 %v616_v12, %v3449_v43 }
 0x263   :  { %v684_v50 = vadd.f32 %v680_v54, %v668_v32  ;;  %v685_v45 = vadd.f32 %v681_v27, %v669_v0  ;;  %v4026_v27 = vmul.f32 %v614_v3, %v3447_v28  ;;  %v5448_v3 = vld [vmem:[#allocation9_spill] sm:$0xff] }
 0x264   :  { %v627_v7 = vpop.permute.xlu0 %626  ;;  %v744_v12 = vmul.f32 %v5448_v3, %v4008_v31 }
 0x265   :  { %v700_v21 = vadd.f32 %v3835_v57, %v684_v50  ;;  %v701_v17 = vadd.f32 %v3839_v44, %v685_v45  ;;  %v634_v35 = vmul.f32 %v627_v7, %v3842_v39  ;;  %v635_v54 = vmul.f32 %v627_v7, %v3845_v41  ;;  %v5447_v50 = vld [vmem:[#allocation24_spill] sm:$0xff] }
 0x266   :  { %v597_v45 = vsel %vm206_vm6, %v5447_v50, %v5446_v34  ;;  %v599_v48 = vsel %vm206_vm6, %v5446_v34, %v5447_v50  ;;  %v4048_v7 = vmul.f32 %v581_v49, %v3409_v19 }
 0x267   :  { %v650_v57 = vadd.f32 %v3861_v13, %v634_v35  ;;  %v651_v44 = vadd.f32 %v3865_v14, %v635_v54  ;;  %v716_v32 = vadd.f32 %v712_v25, %v700_v21  ;;  %v717_v0 = vadd.f32 %v713_v55, %v701_v17  ;;  %v5449_v35 = vld [vmem:[#allocation16_spill] sm:$0xff] }
 0x268   :  { %v745_v13 = vmul.f32 %v5448_v3, %v4011_v58  ;;  %v4051_v21 = vmul.f32 %v583_v59, %v5420_v24  ;;  %v760_v54 = vmul.f32 %v5449_v35, %v4026_v27  ;;  %v761_v34 = vmul.f32 %v5449_v35, %v4029_v22  ;;  %v5450_v59 = vld [vmem:[#allocation23_spill] sm:$0xff] }
 0x269   :  { %v666_v14 = vadd.f32 %v3897_v6, %v650_v57  ;;  %v667_v17 = vadd.f32 %v3901_v56, %v651_v44  ;;  %v732_v25 = vadd.f32 %v728_v38, %v716_v32  ;;  %v733_v55 = vadd.f32 %v729_v62, %v717_v0  ;;  %v5451_v62 = vld [vmem:[#allocation25_spill] sm:$0xff]  ;;  %v752_v32 = vpop.permute.xlu1 %751 }
 0x26a   :  { %v4060_v38 = vmul.f32 %v597_v45, %v3429_v23  ;;  %v4063_v49 = vmul.f32 %v599_v48, %v3431_v46  ;;  %v613_v44 = vsel %vm230_vm7, %v5451_v62, %v5450_v59  ;;  %v5452_v48 = vld [vmem:[#allocation2_spill] sm:$0xff] }
 0x26b   :  { %v682_v50 = vadd.f32 %v3909_v5, %v666_v14  ;;  %v683_v6 = vadd.f32 %v3913_v33, %v667_v17  ;;  %v748_v57 = vadd.f32 %v744_v12, %v732_v25  ;;  %v749_v56 = vadd.f32 %v745_v13, %v733_v55  ;;  %v777_v14 = vpop.permute.xlu2 %776 }
 0x26c   :  { %v615_v5 = vsel %vm230_vm7, %v5450_v59, %v5451_v62  ;;  %v726_v12 = vmul.f32 %v5452_v48, %v4048_v7  ;;  %v727_v13 = vmul.f32 %v5452_v48, %v4051_v21  ;;  %v5453_v59 = vld [vmem:[#allocation19_spill] sm:$0xff] }
 0x26d   :  { %v698_v33 = vadd.f32 %v3821_v51, %v682_v50  ;;  %v699_v0 = vadd.f32 %v3825_v10, %v683_v6  ;;  %v764_v45 = vadd.f32 %v760_v54, %v748_v57  ;;  %v765_v3 = vadd.f32 %v761_v34, %v749_v56 }
 0x26e   :  { %v742_v51 = vmul.f32 %v5453_v59, %v4060_v38  ;;  %v743_v10 = vmul.f32 %v5453_v59, %v4063_v49  ;;  %v4086_v54 = vmul.f32 %v613_v44, %v3447_v28  ;;  %v4089_v34 = vmul.f32 %v615_v5, %v3449_v43 }
 0x26f   :  { %v781_v17 = vadd.f32 %v777_v14, %v764_v45  ;;  %v782_v25 = vadd.f32 %v777_v14, %v765_v3  ;;  %v714_v55 = vadd.f32 %v3953_v29, %v698_v33  ;;  %v715_v35 = vadd.f32 %v3957_v42, %v699_v0 }
 0x270   :  { %v758_v29 = vmul.f32 %v752_v32, %v4086_v54  ;;  %v759_v42 = vmul.f32 %v752_v32, %v4089_v34  ;;  %v2856_v32 = vld [vmem:[%s5300_s9 + $0x38] sm:$0xff] }
 0x271   :  { %v785_v50 = vmax.f32 %v781_v17, 0.0  ;;  %v786_v6 = vmax.f32 %v782_v25, 0.0  ;;  %v730_v57 = vadd.f32 %v726_v12, %v714_v55  ;;  %v731_v56 = vadd.f32 %v727_v13, %v715_v35  ;;  %v772_v3 = vpop.permute.xlu1 %771  ;;  %v2647_v13 = vld [vmem:[%s5299_s5 + $0x10] sm:$0xff]  ;;  %v2864_v55 = vld [vmem:[%s5300_s9 + $0x78] sm:$0xff] }
 0x272   :  { %v4107_v35 = vld [vmem:[%s5295_s3 + $0x38] sm:$0xff] }
 0x273   :  { %v789_v62 = vmin.f32 %v785_v50, 6.0  ;;  %v790_v33 = vmin.f32 %v786_v6, 6.0  ;;  %v746_v0 = vadd.f32 %v742_v51, %v730_v57  ;;  %v747_v45 = vadd.f32 %v743_v10, %v731_v56  ;;  %v2855_v51 = vld [vmem:[%s5300_s9 + $0x30] sm:$0xff]  ;;  %1539 = vperm.xlu2 %2951, %v4107_v35   ;;  %1549 = vperm.xlu0 %2952, %v4107_v35   ;;  %v2648_v57 = vld [vmem:[%s5299_s5 + $0x18] sm:$0xff]  ;;  %v2854_v56 = vld [vmem:[%s5300_s9 + $0x28] sm:$0xff] }
 0x274   :  { %v2863_v10 = vld [vmem:[%s5300_s9 + $0x70] sm:$0xff]  ;;  %v1247_v50 = vmax.f32 %v3922_v63, %v3886_v47  ;;  %v1248_v6 = vmax.f32 %v3925_v15, %v3889_v16 }
 0x275   :  { %827 = vmatpush.msrb.mxu2 %v789_v62  ;;  %850 = vmatpush.msrb.mxu3 %v790_v33  ;;  %v762_v44 = vadd.f32 %v758_v29, %v746_v0  ;;  %v763_v48 = vadd.f32 %v759_v42, %v747_v45  ;;  %v2862_v29 = vld [vmem:[%s5300_s9 + $0x68] sm:$0xff]  ;;  %v4135_v16 = vld [vmem:[%s5295_s3 + $0x30] sm:$0xff]  ;;  %v5454_v62 = vld [vmem:[#allocation29_spill] sm:$0xff] }
 0x276   :  { %v1251_v42 = vmax.f32 %v1247_v50, %v3928_v8  ;;  %v1252_v63 = vmax.f32 %v1248_v6, %v3931_v36  ;;  %v2853_v8 = vld [vmem:[%s5300_s9 + $0x20] sm:$0xff]  ;;  %v5455_v0 = vld [vmem:[#allocation28_spill] sm:$0xff]  ;;  %v5460_v6 = vmov 2  }
 0x277   :  { %v779_v14 = vadd.f32 %v772_v3, %v762_v44  ;;  %v780_v5 = vadd.f32 %v772_v3, %v763_v48  ;;  %v2861_v36 = vld [vmem:[%s5300_s9 + $0x60] sm:$0xff]  ;;  %v2658_v3 = vld [vmem:[%s5296_s4 + $0x28] sm:$0xff]  ;;  %v2852_v44 = vld [vmem:[%s5300_s9 + $0x18] sm:$0xff] }
 0x278   :  { %v1255_v47 = vmax.f32 %v1251_v42, %v3938_v20  ;;  %v1256_v15 = vmax.f32 %v1252_v63, %v3941_v9  ;;  %v1245_v20 = vmax.f32 %v3842_v39, %v3810_v2  ;;  %v1246_v9 = vmax.f32 %v3845_v41, %v3813_v11  ;;  %v2860_v2 = vld [vmem:[%s5300_s9 + $0x58] sm:$0xff]  ;;  %1154 = vperm.xlu1 %2953, %v2658_v3  }
 0x279   :  { %v783_v59 = vmax.f32 %v779_v14, 0.0  ;;  %v784_v17 = vmax.f32 %v780_v5, 0.0  ;;  %v2657_v14 = vld [vmem:[%s5296_s4 + $0x20] sm:$0xff]  ;;  %v5461_v42 = vmov 3  }
 0x27a   :  { %v1259_v33 = vmax.f32 %v1255_v47, %v5454_v62  ;;  %v1260_v45 = vmax.f32 %v1256_v15, %v5455_v0  ;;  %v1249_v11 = vmax.f32 %v1245_v20, %v3850_v37  ;;  %v1250_v39 = vmax.f32 %v1246_v9, %v3853_v30  ;;  %v5456_v5 = vld [vmem:[#allocation30_spill] sm:$0xff]  ;;  %v2851_v37 = vld [vmem:[%s5300_s9 + $0x10] sm:$0xff]  ;;  %v800_v9 = vpop.permute.xlu0 %799 }
 0x27b   :  { %v787_v25 = vmin.f32 %v783_v59, 6.0  ;;  %v788_v12 = vmin.f32 %v784_v17, 6.0  ;;  %1534 = vperm.xlu2 %2951, %v4135_v16   ;;  %1545 = vperm.xlu0 %2952, %v4135_v16  }
 0x27c   :  { %v1263_v41 = vmax.f32 %v1259_v33, %v3978_v61  ;;  %v1264_v48 = vmax.f32 %v1260_v45, %v3981_v53  ;;  %v1253_v59 = vmax.f32 %v1249_v11, %v5456_v5  ;;  %v1254_v17 = vmax.f32 %v1250_v39, %v3871_v1  ;;  %v2859_v61 = vld [vmem:[%s5300_s9 + $0x50] sm:$0xff]  ;;  %v5458_v1 = vld [vmem:[#allocation27_spill] sm:$0xff]  ;;  %v4237_v11 = vpop.permute.xlu1 %1021 }
 0x27d   :  { %828 = vmatpush.msrb.mxu2 %v787_v25  ;;  %851 = vmatpush.msrb.mxu3 %v788_v12  ;;  %v5457_v25 = vmov 5  }
 0x27e   :  { %2651 = vmatmul.msk.f32.vlgmr.msrb.gmra.mxu2 %vm428_vm8, %v2647_v13  ;;  %2653 = vmatmul.msk.f32.vlgmr.msrb.gmra.mxu3 %vm428_vm8, %v2647_v13  ;;  %v1267_v30 = vmax.f32 %v1263_v41, %v3996_v18  ;;  %v1268_v53 = vmax.f32 %v1264_v48, %v3999_v26  ;;  %v1258_v12 = vmax.f32 %v1254_v17, %v5458_v1  ;;  %v5459_v13 = vld [vmem:[#allocation26_spill] sm:$0xff]  ;;  %v2858_v18 = vld [vmem:[%s5300_s9 + $0x48] sm:$0xff] }
 0x27f   :  { %1407 = vmatpush.bf16.msra.mxu2 %v2856_v32  ;;  %1421 = vmatpush.bf16.msra.mxu3 %v2864_v55  ;;  %v1257_v32 = vmax.f32 %v1253_v59, %v5459_v13  ;;  %v2850_v55 = vld [vmem:[%s5300_s9 + $0x8] sm:$0xff] }
 0x280   :  { %v1272_v50 = vmax.f32 %v1268_v53, %v4011_v58  ;;  %2954 = vset.pattern.permute.xlu1 %v5460_v6 }
 0x281   :  { %v1261_v26 = vmax.f32 %v1257_v32, %v3916_v40  ;;  %1561 = vperm.xlu1 %2954, %v4107_v35   ;;  %v2849_v40 = vld [vmem:[%s5300_s9] sm:$0xff] }
 0x283   :  { %1408 = vmatpush.bf16.msra.mxu2 %v2855_v51  ;;  %1422 = vmatpush.bf16.msra.mxu3 %v2863_v10  ;;  %v1262_v51 = vmax.f32 %v1258_v12, %v3919_v4  ;;  %v1271_v10 = vmax.f32 %v1267_v30, %v4008_v31  ;;  %v2857_v4 = vld [vmem:[%s5300_s9 + $0x40] sm:$0xff]  ;;  %s3036_s9 = smov 8  }
 0x284   :  { %1149 = vperm.xlu2 %2951, %v2657_v14   ;;  %2958 = vset.pattern.permute.xlu0 %v5457_v25  ;;  %v4251_v59 = vpop.permute.xlu1 %1017 }
 0x285   :  { %1597 = vperm.xlu0 %2958, %v4107_v35  }
 0x286   :  { %2652 = vmatmul.msk.f32.gmra.mxu2 %vm428_vm8, %v2648_v57  ;;  %2654 = vmatmul.msk.f32.gmra.mxu3 %vm428_vm8, %v2648_v57  ;;  %v1265_v57 = vmax.f32 %v1261_v26, %v4048_v7  ;;  %v1276_v7 = vmax.f32 %v1272_v50, %v4029_v22  ;;  %v5464_v22 = vmov 6  }
 0x287   :  { %1409 = vmatpush.bf16.msra.mxu2 %v2854_v56  ;;  %1423 = vmatpush.bf16.msra.mxu3 %v2862_v29  ;;  %v1266_v56 = vmax.f32 %v1262_v51, %v4051_v21  ;;  %v1275_v29 = vmax.f32 %v1271_v10, %v4026_v27  ;;  %v5462_v21 = vmov 7   ;;  %v5463_v27 = vmov 4   ;;  %v4301_v10 = vpop.permute.xlu0 %1009 }
 0x288   :  { %v1269_v31 = vmax.f32 %v1265_v57, %v4060_v38 }
 0x289   :  { %v1270_v58 = vmax.f32 %v1266_v56, %v4063_v49  ;;  %1557 = vperm.xlu1 %2954, %v4135_v16   ;;  %v5465_v49 = vmov 8  }
 0x28a   :  { %v1273_v63 = vmax.f32 %v1269_v31, %v4086_v54  ;;  %v805_v54 = vpop.permute.xlu2 %804 }
 0x28b   :  { %1410 = vmatpush.bf16.msra.mxu2 %v2853_v8  ;;  %1424 = vmatpush.bf16.msra.mxu3 %v2861_v36  ;;  %v1274_v47 = vmax.f32 %v1270_v58, %v4089_v34 }
 0x28c   :  { %2955 = vset.pattern.permute.xlu2 %v5461_v42  ;;  %v1277_v15 = vpack.c.bf16 %v1275_v29, %v1273_v63  ;;  %v4269_v30 = vpop.permute.xlu1 %1049 }
 0x28d   :  { %1573 = vperm.xlu2 %2955, %v4107_v35   ;;  %2961 = vset.pattern.permute.xlu0 %v5462_v21  ;;  %v1278_v38 = vpack.c.bf16 %v1276_v7, %v1274_v47 }
 0x28f   :  { %1411 = vmatpush.bf16.msra.mxu2 %v2852_v44  ;;  %1425 = vmatpush.bf16.msra.mxu3 %v2860_v2  ;;  %v4317_v56 = vpop.permute.xlu0 %1004 }
 0x291   :  { %2956 = vset.pattern.permute.xlu1 %v5461_v42 }
 0x292   :  { %1569 = vperm.xlu1 %2956, %v4135_v16   ;;  %v4227_v34 = vpop.permute.xlu2 %1037 }
 0x293   :  { %1412 = vmatpush.bf16.msra.mxu2 %v2851_v37  ;;  %1426 = vmatpush.bf16.msra.mxu3 %v2859_v61 }
 0x294   :  { %v4279_v1 = vpop.permute.xlu1 %1065 }
 0x295   :  { %2957 = vset.pattern.permute.xlu2 %v5463_v27 }
 0x296   :  { %1585 = vperm.xlu2 %2957, %v4107_v35  }
 0x297   :  { %1413 = vmatpush.bf16.msra.mxu2 %v2850_v55  ;;  %1427 = vmatpush.bf16.msra.mxu3 %v2858_v18 }
 0x29a   :  { %2959 = vset.pattern.permute.xlu1 %v5457_v25  ;;  %v4229_v8 = vpop.permute.xlu2 %1033 }
 0x29b   :  { %1414 = vmatpush.bf16.msra.mxu2 %v2849_v40  ;;  %1428 = vmatpush.bf16.msra.mxu3 %v2857_v4  ;;  %v4329_v4 = vpop.permute.xlu0 %1053 }
 0x29c   :  { %1593 = vperm.xlu1 %2959, %v4135_v16   ;;  %v4287_v13 = vpop.permute.xlu1 %1081 }
 0x29e   :  { %1415 = vmatmul.bf16.vlgmr.msra.gmra.mxu2 %v1277_v15  ;;  %1429 = vmatmul.bf16.vlgmr.msra.gmra.mxu3 %v1278_v38 }
 0x29f   :  { %1581 = vperm.xlu2 %2957, %v4135_v16  }
 0x2a2   :  { %v4231_v36 = vpop.permute.xlu2 %1069 }
 0x2a3   :  { %v4341_v63 = vpop.permute.xlu0 %1133 }
 0x2a4   :  { %2963 = vset.pattern.permute.xlu1 %v5465_v49  ;;  %v4299_v51 = vpop.permute.xlu1 %1097 }
 0x2a7   :  { %2960 = vset.pattern.permute.xlu2 %v5464_v22  ;;  %v5482_v22 = vmov 0  }
 0x2a8   :  { %1609 = vperm.xlu2 %2960, %v4107_v35  }
 0x2aa   :  { %v4233_v20 = vpop.permute.xlu2 %1085 }
 0x2ac   :  { %v4311_v57 = vpop.permute.xlu1 %1129 }
 0x2b0   :  { %1605 = vperm.xlu2 %2960, %v4135_v16  }
 0x2b2   :  { %v4235_v2 = vpop.permute.xlu2 %1101 }
 0x2b8   :  { %2962 = vset.pattern.permute.xlu2 %v5462_v21 }
 0x2ba   :  { %v4249_v5 = vpop.permute.xlu2 %1117 }
 0x2c2   :  { %v4267_v61 = vpop.permute.xlu2 %1113 }
 0x2cd   :  { %v4277_v53 = vpop.permute.xlu2 %1539 }
 0x2ce   :  { %5466 = vst [vmem:[#allocation22_spill] sm:$0xff] %v4277_v53 }
 0x2d5   :  { %v4289_v32 = vpop.permute.xlu2 %1534 }
 0x2d6   :  { %5467 = vst [vmem:[#allocation24_spill] sm:$0xff] %v4289_v32  ;;  %v5490_v32 = vld [vmem:[#allocation13_spill] sm:$0xff] }
 0x2de   :  { %v4303_v50 = vpop.permute.xlu2 %1149 }
 0x2e7   :  { %v4321_v40 = vpop.permute.xlu2 %1573 }
 0x2e8   :  { %5468 = vst [vmem:[#allocation9_spill] sm:$0xff] %v4321_v40  ;;  %v5488_v40 = vld [vmem:[#allocation8_spill] sm:$0xff] }
 0x2ea   :  { %v4331_v31 = vpop.permute.xlu1 %1154 }
 0x2eb   :  { %5469 = vst [vmem:[#allocation16_spill] sm:$0xff] %v4331_v31 }
 0x2f0   :  { %v4333_v58 = vpop.permute.xlu2 %1585 }
 0x2f1   :  { %5470 = vst [vmem:[#allocation23_spill] sm:$0xff] %v4333_v58  ;;  %v5486_v58 = vld [vmem:[#allocation4_spill] sm:$0xff] }
 0x2f3   :  { %v4343_v47 = vpop.permute.xlu1 %1561 }
 0x2f4   :  { %5471 = vst [vmem:[#allocation25_spill] sm:$0xff] %v4343_v47 }
 0x2f9   :  { %v4347_v38 = vpop.permute.xlu2 %1581 }
 0x2fa   :  { %5473 = vst [vmem:[#allocation19_spill] sm:$0xff] %v4347_v38  ;;  %v5484_v38 = vld [vmem:[#allocation6_spill] sm:$0xff] }
 0x301   :  { %v830_v62 = vpop.f32.mrf.mxu2  ;;  %v853_v33 = vpop.f32.mrf.mxu3 }
 0x302   :  { %v831_v0 = vadd.f32 %v830_v62, %v800_v9  ;;  %v854_v45 = vadd.f32 %v853_v33, %v800_v9  ;;  %v4357_v9 = vpop.permute.xlu2 %1609  ;;  %v4359_v62 = vpop.permute.xlu1 %1557 }
 0x303   :  { %5475 = vst [vmem:[#allocation28_spill] sm:$0xff] %v4357_v9  ;;  %v5483_v9 = vld [vmem:[#allocation5_spill] sm:$0xff] }
 0x304   :  { %v859_v3 = vmax.f32 %v831_v0, 0.0  ;;  %v860_v44 = vmax.f32 %v854_v45, 0.0  ;;  %5476 = vst [vmem:[#allocation30_spill] sm:$0xff] %v4359_v62 }
 0x306   :  { %v4239_v39 = vmin.f32 %v859_v3, 6.0  ;;  %v4241_v41 = vmin.f32 %v860_v44, 6.0 }
 0x308   :  { %871 = vrot.lane.b32.xlu1 %v4241_v41, %s3022_s22  ;;  %883 = vrot.lane.b32.xlu2 %v4239_v39, %s3021_s21 }
 0x309   :  { %867 = vrot.lane.b32.xlu0 %v4239_v39, %s3022_s22  ;;  %v856_v48 = vpop.f32.mrf.mxu3  ;;  %v833_v12 = vpop.f32.mrf.mxu2 }
 0x30a   :  { %v857_v14 = vadd.f32 %v856_v48, %v805_v54  ;;  %v834_v55 = vadd.f32 %v833_v12, %v805_v54  ;;  %v4355_v54 = vpop.permute.xlu0 %1549  ;;  %v4369_v3 = vpop.permute.xlu1 %1569 }
 0x30b   :  { %5474 = vst [vmem:[#allocation29_spill] sm:$0xff] %v4355_v54  ;;  %v4373_v48 = vpop.permute.xlu2 %1605  ;;  %v5489_v54 = vld [vmem:[#allocation12_spill] sm:$0xff] }
 0x30c   :  { %v862_v17 = vmax.f32 %v857_v14, 0.0  ;;  %v861_v18 = vmax.f32 %v834_v55, 0.0  ;;  %5477 = vst [vmem:[#allocation27_spill] sm:$0xff] %v4369_v3  ;;  %v5487_v3 = vld [vmem:[#allocation7_spill] sm:$0xff] }
 0x30d   :  { %5479 = vst [vmem:[#allocation31_spill] sm:$0xff] %v4373_v48 }
 0x30e   :  { %v4259_v37 = vmin.f32 %v862_v17, 6.0  ;;  %v4297_v26 = vmin.f32 %v861_v18, 6.0 }
 0x310   :  { %919 = vrot.lane.b32.xlu1 %v4241_v41, %s3025_s29  ;;  %899 = vrot.lane.b32.xlu2 %v4239_v39, %s3024_s0 }
 0x311   :  { %887 = vrot.lane.b32.xlu0 %v4241_v41, %s3021_s21 }
 0x312   :  { %v4371_v44 = vpop.permute.xlu0 %1545  ;;  %v4384_v14 = vpop.permute.xlu1 %1593 }
 0x313   :  { %5478 = vst [vmem:[#allocation26_spill] sm:$0xff] %v4371_v44 }
 0x314   :  { %5480 = vst [vmem:[#allocation32_spill] sm:$0xff] %v4384_v14 }
 0x318   :  { %939 = vrot.lane.b32.xlu1 %v4241_v41, %s3027_s13  ;;  %873 = vrot.lane.b32.xlu2 %v4259_v37, %s3022_s22 }
 0x319   :  { %903 = vrot.lane.b32.xlu0 %v4241_v41, %s3024_s0 }
 0x31a   :  { %v4388_v17 = vpop.permute.xlu0 %1597 }
 0x31b   :  { %5481 = vst [vmem:[#allocation33_spill] sm:$0xff] %v4388_v17 }
 0x320   :  { %955 = vrot.lane.b32.xlu1 %v4241_v41, %s3030_s14  ;;  %889 = vrot.lane.b32.xlu2 %v4259_v37, %s3021_s21 }
 0x321   :  { %915 = vrot.lane.b32.xlu0 %v4239_v39, %s3025_s29  ;;  %v1430_v29 = vpop.f32.mrf.mxu3  ;;  %v1416_v7 = vpop.f32.mrf.mxu2 }
 0x322   :  { %v4345_v15 = vadd.f32 %v1430_v29, %v1416_v7 }
 0x324   :  { %5472 = vst [vmem:[#allocation2_spill] sm:$0xff] %v4345_v15 }
 0x328   :  { %971 = vrot.lane.b32.xlu1 %v4241_v41, %s3032_s15  ;;  %905 = vrot.lane.b32.xlu2 %v4259_v37, %s3024_s0 }
 0x329   :  { %935 = vrot.lane.b32.xlu0 %v4239_v39, %s3027_s13  ;;  %v1432_v33 = vpop.f32.mrf.mxu3  ;;  %v1418_v0 = vpop.f32.mrf.mxu2 }
 0x32a   :  { %v4367_v45 = vadd.f32 %v1432_v33, %v1418_v0 }
 0x330   :  { %987 = vrot.lane.b32.xlu1 %v4241_v41, %s3033_s16  ;;  %921 = vrot.lane.b32.xlu2 %v4259_v37, %s3025_s29 }
 0x331   :  { %951 = vrot.lane.b32.xlu0 %v4239_v39, %s3030_s14 }
 0x338   :  { %869 = vrot.lane.b32.xlu1 %v4297_v26, %s3022_s22  ;;  %941 = vrot.lane.b32.xlu2 %v4259_v37, %s3027_s13 }
 0x339   :  { %967 = vrot.lane.b32.xlu0 %v4239_v39, %s3032_s15 }
 0x340   :  { %885 = vrot.lane.b32.xlu1 %v4297_v26, %s3021_s21  ;;  %953 = vrot.lane.b32.xlu2 %v4297_v26, %s3030_s14 }
 0x341   :  { %983 = vrot.lane.b32.xlu0 %v4239_v39, %s3033_s16 }
 0x348   :  { %901 = vrot.lane.b32.xlu1 %v4297_v26, %s3024_s0  ;;  %969 = vrot.lane.b32.xlu2 %v4297_v26, %s3032_s15 }
 0x349   :  { %957 = vrot.lane.b32.xlu0 %v4259_v37, %s3030_s14 }
 0x350   :  { %917 = vrot.lane.b32.xlu1 %v4297_v26, %s3025_s29  ;;  %985 = vrot.lane.b32.xlu2 %v4297_v26, %s3033_s16 }
 0x351   :  { %973 = vrot.lane.b32.xlu0 %v4259_v37, %s3032_s15 }
 0x358   :  { %937 = vrot.lane.b32.xlu1 %v4297_v26, %s3027_s13  ;;  %1435 = vrot.lane.b32.xlu2 %v4345_v15, %s3036_s9 }
 0x359   :  { %989 = vrot.lane.b32.xlu0 %v4259_v37, %s3033_s16 }
 0x360   :  { %1496 = vrot.lane.b32.xlu1 %v4345_v15, %s3037_s17  ;;  %1456 = vrot.lane.b32.xlu2 %v4345_v15, %s3038_s18 }
 0x361   :  { %1445 = vrot.lane.b32.xlu0 %v4345_v15, %s3039_s19 }
 0x362   :  { %v884_v12 = vpop.permute.xlu2 %883 }
 0x368   :  { %1437 = vrot.lane.b32.xlu1 %v4367_v45, %s3036_s9  ;;  %1447 = vrot.lane.b32.xlu2 %v4367_v45, %s3039_s19 }
 0x369   :  { %1467 = vrot.lane.b32.xlu0 %v4345_v15, %s3025_s29 }
 0x36a   :  { %v900_v29 = vpop.permute.xlu2 %899 }
 0x370   :  { %1458 = vrot.lane.b32.xlu1 %v4367_v45, %s3038_s18  ;;  %1617 = vperm.xlu2 %2962, %v4135_v16  }
 0x371   :  { %1485 = vrot.lane.b32.xlu0 %v4345_v15, %s3027_s13 }
 0x372   :  { %v4402_v0 = vpop.permute.xlu2 %873 }
 0x378   :  { %1469 = vrot.lane.b32.xlu1 %v4367_v45, %s3025_s29  ;;  %1509 = vrot.lane.b32.xlu2 %v4367_v45, %s3040_s20 }
 0x379   :  { %1507 = vrot.lane.b32.xlu0 %v4345_v15, %s3040_s20  ;;  %2964 = vset.pattern.permute.xlu2 %v5465_v49 }
 0x37a   :  { %v872_v55 = vpop.permute.xlu1 %871 }
 0x37b   :  { %v868_v18 = vpop.permute.xlu0 %867 }
 0x37c   :  { %v875_v25 = vsel %vm52_vm0, %v868_v18, %v872_v55  ;;  %v877_v42 = vsel %vm52_vm0, %v872_v55, %v868_v18  ;;  %v2742_v55 = vld [vmem:[%s5296_s4 + $0x38] sm:$0xff]  ;;  %v890_v18 = vpop.permute.xlu2 %889 }
 0x380   :  { %1518 = vrot.lane.b32.xlu1 %v4345_v15, %s3041_s23  ;;  %1629 = vperm.xlu2 %2964, %v4135_v16   ;;  %v880_v15 = vmul.f32 %v875_v25, %v5486_v58 }
 0x381   :  { %1487 = vrot.lane.b32.xlu0 %v4367_v45, %s3027_s13 }
 0x382   :  { %v920_v7 = vpop.permute.xlu1 %919 }
 0x383   :  { %v888_v33 = vpop.permute.xlu0 %887 }
 0x384   :  { %v891_v49 = vsel %vm75_vm1, %v884_v12, %v888_v33  ;;  %v893_v27 = vsel %vm75_vm1, %v888_v33, %v884_v12  ;;  %v5485_v12 = vld [vmem:[#allocation3_spill] sm:$0xff] }
 0x385   :  { %v895_v14 = vmul.f32 %v893_v27, %v5483_v9  ;;  %v896_v17 = vmul.f32 %v891_v49, %v5484_v38  ;;  %v879_v33 = vmul.f32 %v877_v42, %v5485_v12  ;;  %v1013_v49 = vmul.f32 %v4317_v56, %v880_v15 }
 0x387   :  { %v1025_v27 = vmul.f32 %v4251_v59, %v896_v17  ;;  %v1012_v42 = vmul.f32 %v4317_v56, %v879_v33  ;;  %v5491_v56 = vld [vmem:[#allocation10_spill] sm:$0xff] }
 0x388   :  { %1633 = vperm.xlu1 %2963, %v4107_v35   ;;  %2967 = vset.pattern.permute.xlu2 %v5482_v22 }
 0x389   :  { %1621 = vperm.xlu0 %2961, %v4107_v35  }
 0x38a   :  { %v4411_v16 = vpop.permute.xlu1 %939 }
 0x38b   :  { %v904_v21 = vpop.permute.xlu0 %903 }
 0x38c   :  { %v907_v48 = vsel %vm99_vm2, %v900_v29, %v904_v21  ;;  %v909_v35 = vsel %vm99_vm2, %v904_v21, %v900_v29  ;;  %v1024_v21 = vmul.f32 %v4251_v59, %v895_v14  ;;  %v931_v14 = vmul.f32 %v4239_v39, %v5489_v54 }
 0x38d   :  { %v911_v62 = vmul.f32 %v909_v35, %v5487_v3  ;;  %v912_v47 = vmul.f32 %v907_v48, %v5488_v40  ;;  %v932_v59 = vmul.f32 %v4241_v41, %v5490_v32 }
 0x38e   :  { %v1028_v33 = vadd.f32 %v1024_v21, %v1012_v42  ;;  %v1072_v41 = vmul.f32 %v4279_v1, %v931_v14 }
 0x38f   :  { %v1040_v48 = vmul.f32 %v4229_v8, %v911_v62  ;;  %v1041_v29 = vmul.f32 %v4229_v8, %v912_v47  ;;  %v5492_v62 = vld [vmem:[#allocation11_spill] sm:$0xff]  ;;  %v1073_v31 = vmul.f32 %v4279_v1, %v932_v59  ;;  %v2745_v1 = vld [vmem:[%s5297_s6 + $0x30] sm:$0xff] }
 0x390   :  { %1498 = vrot.lane.b32.xlu1 %v4367_v45, %s3037_s17 }
 0x391   :  { %2965 = vset.pattern.permute.xlu0 %v5482_v22  ;;  %2966 = vset.pattern.permute.xlu1 %v5482_v22  ;;  %v1029_v22 = vadd.f32 %v1025_v27, %v1013_v49  ;;  %v1044_v8 = vadd.f32 %v1040_v48, %v1028_v33  ;;  %v906_v27 = vpop.permute.xlu2 %905  ;;  %v5493_v49 = vmov 1  }
 0x392   :  { %v956_v25 = vpop.permute.xlu1 %955  ;;  %1650 = vperm.xlu0 %2965, %v2742_v55  }
 0x393   :  { %v916_v35 = vpop.permute.xlu0 %915  ;;  %v1045_v47 = vadd.f32 %v1041_v29, %v1029_v22 }
 0x394   :  { %v923_v17 = vsel %vm123_vm3, %v916_v35, %v920_v7  ;;  %v925_v55 = vsel %vm123_vm3, %v920_v7, %v916_v35 }
 0x395   :  { %v927_v15 = vmul.f32 %v925_v55, %v5491_v56  ;;  %v928_v53 = vmul.f32 %v923_v17, %v5492_v62 }
 0x397   :  { %v1056_v44 = vmul.f32 %v4269_v30, %v927_v15  ;;  %v1057_v39 = vmul.f32 %v4269_v30, %v928_v53  ;;  %v2741_v30 = vld [vmem:[%s5296_s4 + $0x30] sm:$0xff] }
 0x398   :  { %1520 = vrot.lane.b32.xlu1 %v4367_v45, %s3041_s23 }
 0x399   :  { %v1060_v7 = vadd.f32 %v1056_v44, %v1044_v8  ;;  %v1061_v21 = vadd.f32 %v1057_v39, %v1045_v47  ;;  %v922_v14 = vpop.permute.xlu2 %921 }
 0x39a   :  { %v972_v42 = vpop.permute.xlu1 %971  ;;  %2970 = vset.pattern.permute.xlu0 %v5493_v49 }
 0x39b   :  { %v4457_v35 = vadd.f32 %v1073_v31, %v1061_v21  ;;  %v936_v22 = vpop.permute.xlu0 %935  ;;  %v4459_v48 = vadd.f32 %v1072_v41, %v1060_v7  ;;  %v4470_v31 = vld [vmem:[%s5295_s3 + $0x48] sm:$0xff]  ;;  %v934_v41 = vmul.f32 %v4259_v37, %v5490_v32  ;;  %v933_v7 = vmul.f32 %v4297_v26, %v5489_v54 }
 0x39c   :  { %5494 = vst [vmem:[#allocation5_spill] sm:$0xff] %v4470_v31  ;;  %v943_v8 = vsel %vm158_vm4, %v936_v22, %v4411_v16  ;;  %v945_v47 = vsel %vm158_vm4, %v4411_v16, %v936_v22  ;;  %v5495_v32 = vld [vmem:[#allocation15_spill] sm:$0xff] }
 0x39d   :  { %v947_v37 = vmul.f32 %v943_v8, %v3394_v60  ;;  %v4517_v49 = vmul.f32 %v4231_v36, %v933_v7 }
 0x3a0   :  { %1645 = vperm.xlu1 %2966, %v2741_v30  }
 0x3a1   :  { %v4472_v17 = vpop.permute.xlu2 %941 }
 0x3a2   :  { %v988_v53 = vpop.permute.xlu1 %987 }
 0x3a3   :  { %v952_v29 = vpop.permute.xlu0 %951 }
 0x3a4   :  { %v959_v26 = vsel %vm182_vm5, %v952_v29, %v956_v25  ;;  %v961_v54 = vsel %vm182_vm5, %v956_v25, %v952_v29  ;;  %v1088_v25 = vmul.f32 %v4287_v13, %v947_v37 }
 0x3a8   :  { %1667 = vperm.xlu1 %2966, %v2745_v1  }
 0x3a9   :  { %v4475_v15 = vpop.permute.xlu2 %953 }
 0x3aa   :  { %v870_v44 = vpop.permute.xlu1 %869 }
 0x3ab   :  { %v968_v59 = vpop.permute.xlu0 %967  ;;  %v876_v21 = vsel %vm52_vm0, %v870_v44, %v4402_v0  ;;  %v878_v30 = vsel %vm52_vm0, %v4402_v0, %v870_v44 }
 0x3b0   :  { %1768 = vperm.xlu1 %2966, %v4470_v31  }
 0x3b2   :  { %v886_v55 = vpop.permute.xlu1 %885 }
 0x3b3   :  { %v984_v33 = vpop.permute.xlu0 %983  ;;  %v892_v16 = vsel %vm75_vm1, %v886_v55, %v890_v18  ;;  %v894_v22 = vsel %vm75_vm1, %v890_v18, %v886_v55  ;;  %v882_v18 = vmul.f32 %v876_v21, %v5486_v58  ;;  %v963_v21 = vmul.f32 %v959_v26, %v3409_v19 }
 0x3b4   :  { %v897_v55 = vmul.f32 %v894_v22, %v5483_v9  ;;  %v898_v8 = vmul.f32 %v892_v16, %v5484_v38  ;;  %v975_v16 = vsel %vm206_vm6, %v968_v59, %v972_v42  ;;  %v991_v26 = vsel %vm230_vm7, %v984_v33, %v988_v53 }
 0x3b5   :  { %v1015_v22 = vmul.f32 %v4301_v10, %v882_v18  ;;  %v1104_v18 = vmul.f32 %v4299_v51, %v963_v21 }
 0x3b8   :  { %2971 = vset.pattern.permute.xlu1 %v5460_v6  ;;  %v948_v6 = vmul.f32 %v945_v47, %v5495_v32  ;;  %v4514_v47 = vmul.f32 %v4231_v36, %v934_v41  ;;  %v977_v41 = vsel %vm206_vm6, %v972_v42, %v968_v59  ;;  %v970_v36 = vpop.permute.xlu2 %969 }
 0x3b9   :  { %1790 = vperm.xlu1 %2971, %v4470_v31   ;;  %v881_v31 = vmul.f32 %v878_v30, %v5485_v12  ;;  %v964_v30 = vmul.f32 %v961_v54, %v5420_v24  ;;  %v993_v54 = vsel %vm230_vm7, %v988_v53, %v984_v33  ;;  %v979_v53 = vmul.f32 %v975_v16, %v3429_v23 }
 0x3ba   :  { %v902_v39 = vpop.permute.xlu1 %901  ;;  %v1089_v29 = vmul.f32 %v4287_v13, %v948_v6  ;;  %v1026_v6 = vmul.f32 %v4237_v11, %v897_v55  ;;  %v1027_v13 = vmul.f32 %v4237_v11, %v898_v8  ;;  %v980_v33 = vmul.f32 %v977_v41, %v3431_v46 }
 0x3bb   :  { %v958_v1 = vpop.permute.xlu0 %957  ;;  %v908_v0 = vsel %vm99_vm2, %v902_v39, %v906_v27  ;;  %v910_v44 = vsel %vm99_vm2, %v906_v27, %v902_v39  ;;  %v1014_v7 = vmul.f32 %v4301_v10, %v881_v31  ;;  %v1105_v55 = vmul.f32 %v4299_v51, %v964_v30 }
 0x3bc   :  { %v913_v27 = vmul.f32 %v910_v44, %v5487_v3  ;;  %v914_v39 = vmul.f32 %v908_v0, %v5488_v40  ;;  %v1031_v40 = vadd.f32 %v1027_v13, %v1015_v22  ;;  %v996_v21 = vmul.f32 %v993_v54, %v3449_v43 }
 0x3bd   :  { %v1030_v8 = vadd.f32 %v1026_v6, %v1014_v7  ;;  %v960_v30 = vsel %vm182_vm5, %v4475_v15, %v958_v1  ;;  %v962_v16 = vsel %vm182_vm5, %v958_v1, %v4475_v15 }
 0x3be   :  { %v1042_v10 = vmul.f32 %v4227_v34, %v913_v27  ;;  %v1043_v31 = vmul.f32 %v4227_v34, %v914_v39  ;;  %v1092_v34 = vadd.f32 %v1088_v25, %v4459_v48  ;;  %v1093_v39 = vadd.f32 %v1089_v29, %v4457_v35 }
 0x3bf   :  { %v1120_v48 = vmul.f32 %v4267_v61, %v979_v53  ;;  %v1121_v35 = vmul.f32 %v4267_v61, %v980_v33  ;;  %v965_v6 = vmul.f32 %v960_v30, %v3409_v19  ;;  %v966_v13 = vmul.f32 %v962_v16, %v5420_v24 }
 0x3c0   :  { %v1047_v51 = vadd.f32 %v1043_v31, %v1031_v40  ;;  %v1108_v41 = vadd.f32 %v1104_v18, %v1092_v34 }
 0x3c1   :  { %v1106_v53 = vmul.f32 %v4235_v2, %v965_v6  ;;  %v1107_v33 = vmul.f32 %v4235_v2, %v966_v13 }
 0x3c2   :  { %v918_v37 = vpop.permute.xlu1 %917 }
 0x3c3   :  { %v924_v0 = vsel %vm123_vm3, %v918_v37, %v922_v14  ;;  %v926_v42 = vsel %vm123_vm3, %v922_v14, %v918_v37  ;;  %v974_v59 = vpop.permute.xlu0 %973  ;;  %v995_v37 = vmul.f32 %v991_v26, %v3447_v28  ;;  %v986_v26 = vpop.permute.xlu2 %985 }
 0x3c4   :  { %v929_v11 = vmul.f32 %v926_v42, %v5491_v56  ;;  %v930_v44 = vmul.f32 %v924_v0, %v5492_v62  ;;  %v1046_v0 = vadd.f32 %v1042_v10, %v1030_v8  ;;  %v976_v7 = vsel %vm206_vm6, %v970_v36, %v974_v59 }
 0x3c5   :  { %v978_v40 = vsel %vm206_vm6, %v974_v59, %v970_v36  ;;  %v1136_v54 = vmul.f32 %v4311_v57, %v995_v37  ;;  %v1137_v42 = vmul.f32 %v4311_v57, %v996_v21  ;;  %v981_v10 = vmul.f32 %v976_v7, %v3429_v23 }
 0x3c6   :  { %v1058_v14 = vmul.f32 %v4329_v4, %v929_v11  ;;  %v1059_v27 = vmul.f32 %v4329_v4, %v930_v44  ;;  %v1109_v4 = vadd.f32 %v1105_v55, %v1093_v39  ;;  %v982_v31 = vmul.f32 %v978_v40, %v3431_v46  ;;  %v5496_v40 = vld [vmem:[#allocation16_spill] sm:$0xff] }
 0x3c7   :  { %v1124_v8 = vadd.f32 %v1120_v48, %v1108_v41 }
 0x3c8   :  { %v1062_v25 = vadd.f32 %v1058_v14, %v1046_v0  ;;  %v1063_v29 = vadd.f32 %v1059_v27, %v1047_v51  ;;  %v1125_v14 = vadd.f32 %v1121_v35, %v1109_v4  ;;  %v1123_v0 = vmul.f32 %v4249_v5, %v982_v31 }
 0x3c9   :  { %v1140_v21 = vadd.f32 %v1136_v54, %v1124_v8 }
 0x3ca   :  { %v938_v22 = vpop.permute.xlu1 %937  ;;  %v1078_v44 = vadd.f32 %v4517_v49, %v1062_v25  ;;  %v1079_v18 = vadd.f32 %v4514_v47, %v1063_v29  ;;  %v1141_v49 = vadd.f32 %v1137_v42, %v1125_v14  ;;  %v1122_v47 = vmul.f32 %v4249_v5, %v981_v10 }
 0x3cb   :  { %v944_v15 = vsel %vm158_vm4, %v938_v22, %v4472_v17  ;;  %v946_v61 = vsel %vm158_vm4, %v4472_v17, %v938_v22  ;;  %v990_v1 = vpop.permute.xlu0 %989  ;;  %v1157_v29 = vadd.f32 %v4303_v50, %v1140_v21  ;;  %v1436_v6 = vpop.permute.xlu2 %1435 }
 0x3cc   :  { %v949_v36 = vmul.f32 %v944_v15, %v3394_v60  ;;  %v950_v59 = vmul.f32 %v946_v61, %v5495_v32  ;;  %v992_v11 = vsel %vm230_vm7, %v986_v26, %v990_v1  ;;  %v994_v17 = vsel %vm230_vm7, %v990_v1, %v986_v26 }
 0x3cd   :  { %v997_v39 = vmul.f32 %v992_v11, %v3447_v28  ;;  %v998_v37 = vmul.f32 %v994_v17, %v3449_v43  ;;  %v1158_v7 = vadd.f32 %v4303_v50, %v1141_v49  ;;  %v1161_v1 = vmax.f32 %v1157_v29, 0.0  ;;  %v2659_v17 = vld [vmem:[%s5299_s5 + $0x20] sm:$0xff]  ;;  %v2746_v49 = vld [vmem:[%s5297_s6 + $0x38] sm:$0xff] }
 0x3ce   :  { %v1090_v57 = vmul.f32 %v4233_v20, %v949_v36  ;;  %v1091_v55 = vmul.f32 %v4233_v20, %v950_v59  ;;  %1672 = vperm.xlu2 %2967, %v2746_v49  }
 0x3cf   :  { %v1138_v2 = vmul.f32 %v4341_v63, %v997_v39  ;;  %v1139_v16 = vmul.f32 %v4341_v63, %v998_v37  ;;  %v1162_v26 = vmax.f32 %v1158_v7, 0.0  ;;  %v1165_v36 = vmin.f32 %v1161_v1, 6.0  ;;  %v4637_v37 = vld [vmem:[%s5301_s2 + $0x3] ss:$0 sm:$0xff]  ;;  %v5502_v1 = vld [vmem:[#allocation9_spill] sm:$0xff] }
 0x3d0   :  { %v1094_v27 = vadd.f32 %v1090_v57, %v1078_v44  ;;  %v1095_v34 = vadd.f32 %v1091_v55, %v1079_v18  ;;  %v4611_v18 = vld [vmem:[%s5301_s2] ss:$0 sm:$0xff] }
 0x3d1   :  { %v1166_v59 = vmin.f32 %v1162_v26, 6.0 }
 0x3d2   :  { %v4595_v51 = vpop.permute.xlu1 %1496  ;;  %v1110_v20 = vadd.f32 %v1106_v53, %v1094_v27  ;;  %v1111_v30 = vadd.f32 %v1107_v33, %v1095_v34  ;;  %v4618_v53 = vld [vmem:[%s5301_s2 + $0x1] ss:$0 sm:$0xff]  ;;  %v4623_v33 = vld [vmem:[%s5301_s2 + $0x2] ss:$0 sm:$0xff]  ;;  %v2660_v27 = vld [vmem:[%s5299_s5 + $0x28] sm:$0xff]  ;;  %v1443_v34 = vmul.f32 %v4611_v18, %v1436_v6 }
 0x3d3   :  { %v1446_v41 = vpop.permute.xlu0 %1445  ;;  %v1457_v10 = vpop.permute.xlu2 %1456 }
 0x3d4   :  { %v1126_v4 = vadd.f32 %v1122_v47, %v1110_v20  ;;  %v1127_v48 = vadd.f32 %v1123_v0, %v1111_v30  ;;  %v1454_v8 = vmul.f32 %v4618_v53, %v1446_v41  ;;  %v5497_v0 = vld [vmem:[#allocation26_spill] sm:$0xff]  ;;  %v5499_v41 = vld [vmem:[#allocation24_spill] sm:$0xff] }
 0x3d5   :  { %v5498_v30 = vld [vmem:[#allocation22_spill] sm:$0xff] }
 0x3d6   :  { %v1142_v35 = vadd.f32 %v1138_v2, %v1126_v4  ;;  %v1143_v25 = vadd.f32 %v1139_v16, %v1127_v48  ;;  %v1552_v20 = vmul.f32 %v5497_v0, %v1454_v8  ;;  %v1542_v4 = vmul.f32 %v5499_v41, %v1443_v34  ;;  %v4673_v8 = vld [vmem:[%s5301_s2 + $0x6] ss:$0 sm:$0xff]  ;;  %v5507_v34 = vld [vmem:[#allocation5_spill] sm:$0xff] }
 0x3d8   :  { %v1159_v22 = vadd.f32 %v5496_v40, %v1142_v35  ;;  %v1160_v5 = vadd.f32 %v5496_v40, %v1143_v25  ;;  %v1465_v35 = vmul.f32 %v4623_v33, %v1457_v10  ;;  %v5500_v25 = vld [vmem:[#allocation29_spill] sm:$0xff] }
 0x3d9   :  { %v5501_v40 = vld [vmem:[#allocation25_spill] sm:$0xff] }
 0x3da   :  { %v1438_v13 = vpop.permute.xlu1 %1437  ;;  %v1163_v15 = vmax.f32 %v1159_v22, 0.0  ;;  %v1164_v61 = vmax.f32 %v1160_v5, 0.0  ;;  %v4654_v5 = vld [vmem:[%s5301_s2 + $0x4] ss:$0 sm:$0xff] }
 0x3db   :  { %v1468_v42 = vpop.permute.xlu0 %1467  ;;  %v1448_v44 = vpop.permute.xlu2 %1447  ;;  %v1444_v14 = vmul.f32 %v4611_v18, %v1438_v13  ;;  %v1554_v13 = vadd.f32 %v1552_v20, %v1542_v4  ;;  %v4681_v20 = vld [vmem:[%s5295_s3 + $0x40] sm:$0xff] }
 0x3dc   :  { %v1167_v63 = vmin.f32 %v1163_v15, 6.0  ;;  %v1168_v54 = vmin.f32 %v1164_v61, 6.0  ;;  %v1455_v39 = vmul.f32 %v4618_v53, %v1448_v44  ;;  %v1476_v7 = vmul.f32 %v4637_v37, %v1468_v42  ;;  %v4659_v61 = vld [vmem:[%s5301_s2 + $0x5] ss:$0 sm:$0xff]  ;;  %1786 = vperm.xlu1 %2971, %v4681_v20   ;;  %1774 = vperm.xlu0 %2970, %v4681_v20  }
 0x3dd   :  { %v1543_v2 = vmul.f32 %v5498_v30, %v1444_v14 }
 0x3de   :  { %1205 = vmatpush.msrb.mxu0 %v1167_v63  ;;  %1228 = vmatpush.msrb.mxu1 %v1168_v54  ;;  %v1553_v29 = vmul.f32 %v5500_v25, %v1455_v39  ;;  %v1484_v63 = vmul.f32 %v4654_v5, %v4367_v45  ;;  %v5503_v54 = vld [vmem:[#allocation30_spill] sm:$0xff]  ;;  %v5511_v25 = vld [vmem:[#allocation32_spill] sm:$0xff] }
 0x3df   :  { %v1564_v42 = vmul.f32 %v5503_v54, %v1465_v35  ;;  %v4691_v35 = vld [vmem:[%s5301_s2 + $0x7] ss:$0 sm:$0xff] }
 0x3e0   :  { %1206 = vmatpush.msrb.mxu0 %v1165_v36  ;;  %1229 = vmatpush.msrb.mxu1 %v1166_v59  ;;  %v1555_v15 = vadd.f32 %v1553_v29, %v1543_v2  ;;  %v5504_v36 = vld [vmem:[#allocation27_spill] sm:$0xff]  ;;  %v5509_v2 = vld [vmem:[#allocation33_spill] sm:$0xff] }
 0x3e1   :  { %2663 = vmatmul.msk.f32.vlgmr.msrb.gmra.mxu0 %vm428_vm8, %v2659_v17  ;;  %2665 = vmatmul.msk.f32.vlgmr.msrb.gmra.mxu1 %vm428_vm8, %v2659_v17  ;;  %v1576_v59 = vmul.f32 %v5504_v36, %v1476_v7  ;;  %v5506_v17 = vld [vmem:[#allocation2_spill] sm:$0xff]  ;;  %v1566_v14 = vadd.f32 %v1564_v42, %v1554_v13  ;;  %v4697_v7 = vld [vmem:[%s5301_s2 + $0x8] ss:$0 sm:$0xff]  ;;  %v1505_v13 = vmul.f32 %v4673_v8, %v4595_v51 }
 0x3e2   :  { %v1459_v50 = vpop.permute.xlu1 %1458  ;;  %v1483_v44 = vmul.f32 %v4654_v5, %v5506_v17 }
 0x3e3   :  { %v1486_v31 = vpop.permute.xlu0 %1485  ;;  %v1466_v21 = vmul.f32 %v4623_v33, %v1459_v50  ;;  %v1618_v47 = vpop.permute.xlu2 %1617  ;;  %v1578_v30 = vadd.f32 %v1576_v59, %v1566_v14 }
 0x3e4   :  { %v1494_v45 = vmul.f32 %v4659_v61, %v1486_v31  ;;  %v5510_v31 = vld [vmem:[#allocation19_spill] sm:$0xff] }
 0x3e5   :  { %v1565_v22 = vmul.f32 %v5501_v40, %v1466_v21  ;;  %v5508_v21 = vld [vmem:[#allocation23_spill] sm:$0xff]  ;;  %v1588_v4 = vmul.f32 %v5510_v31, %v1483_v44 }
 0x3e6   :  { %v1589_v49 = vmul.f32 %v5508_v21, %v1484_v63  ;;  %v1600_v29 = vmul.f32 %v5511_v25, %v1494_v45 }
 0x3e7   :  { %v1567_v50 = vadd.f32 %v1565_v22, %v1555_v15  ;;  %v5512_v22 = vld [vmem:[#allocation28_spill] sm:$0xff] }
 0x3e9   :  { %2664 = vmatmul.msk.f32.gmra.mxu0 %vm428_vm8, %v2660_v27  ;;  %2666 = vmatmul.msk.f32.gmra.mxu1 %vm428_vm8, %v2660_v27 }
 0x3ea   :  { %v1470_v11 = vpop.permute.xlu1 %1469 }
 0x3eb   :  { %v1508_v57 = vpop.permute.xlu0 %1507  ;;  %v1477_v16 = vmul.f32 %v4637_v37, %v1470_v11  ;;  %v5505_v11 = vmov 1   ;;  %v1510_v39 = vpop.permute.xlu2 %1509 }
 0x3ec   :  { %2968 = vset.pattern.permute.xlu2 %v5505_v11  ;;  %v1517_v54 = vmul.f32 %v4691_v35, %v1510_v39  ;;  %v5516_v39 = vmov 5  }
 0x3ed   :  { %v1577_v26 = vmul.f32 %v5502_v1, %v1477_v16  ;;  %1778 = vperm.xlu2 %2968, %v5507_v34   ;;  %v1590_v1 = vadd.f32 %v1588_v4, %v1578_v30  ;;  %2975 = vset.pattern.permute.xlu0 %v5516_v39 }
 0x3ee   :  { %1826 = vperm.xlu0 %2975, %v5507_v34  }
 0x3ef   :  { %v1579_v27 = vadd.f32 %v1577_v26, %v1567_v50  ;;  %v1516_v26 = vmul.f32 %v4691_v35, %v1508_v57  ;;  %v1602_v42 = vadd.f32 %v1600_v29, %v1590_v1  ;;  %v5513_v50 = vmov 0   ;;  %v2744_v1 = vld [vmem:[%s5299_s5 + $0x38] sm:$0xff] }
 0x3f0   :  { %v5517_v29 = vmov 7  }
 0x3f1   :  { %v1591_v40 = vadd.f32 %v1589_v49, %v1579_v27  ;;  %v1624_v51 = vmul.f32 %v1618_v47, %v1516_v26  ;;  %v5515_v27 = vmov 3   ;;  %v5520_v26 = vmov 6  }
 0x3f2   :  { %v4613_v55 = vpop.permute.xlu1 %1518  ;;  %2973 = vset.pattern.permute.xlu1 %v5515_v27 }
 0x3f3   :  { %v1488_v6 = vpop.permute.xlu0 %1487  ;;  %v1527_v36 = vmul.f32 %v4697_v7, %v4613_v55  ;;  %v1630_v44 = vpop.permute.xlu2 %1629  ;;  %1798 = vperm.xlu1 %2973, %v4681_v20  }
 0x3f4   :  { %v1495_v10 = vmul.f32 %v4659_v61, %v1488_v6 }
 0x3f5   :  { %2969 = vset.pattern.permute.xlu2 %v5513_v50  ;;  %v1636_v55 = vmul.f32 %v1630_v44, %v1527_v36 }
 0x3f6   :  { %v1601_v16 = vmul.f32 %v5509_v2, %v1495_v10  ;;  %v5514_v10 = vld [vmem:[#allocation31_spill] sm:$0xff]  ;;  %1763 = vperm.xlu2 %2969, %v4681_v20   ;;  %2978 = vset.pattern.permute.xlu0 %v5517_v29 }
 0x3f7   :  { %v1612_v17 = vmul.f32 %v5514_v10, %v1505_v13  ;;  %v5518_v13 = vmov 4  }
 0x3f8   :  { %v1603_v63 = vadd.f32 %v1601_v16, %v1591_v40 }
 0x3fa   :  { %v1634_v48 = vpop.permute.xlu1 %1633 }
 0x3fb   :  { %v1622_v15 = vpop.permute.xlu0 %1621  ;;  %2976 = vset.pattern.permute.xlu1 %v5516_v39 }
 0x3fc   :  { %v1625_v45 = vmul.f32 %v1622_v15, %v1517_v54  ;;  %1822 = vperm.xlu1 %2976, %v4681_v20   ;;  %v5519_v15 = vmov 8  }
 0x3fe   :  { %2972 = vset.pattern.permute.xlu2 %v5515_v27 }
 0x3ff   :  { %1802 = vperm.xlu2 %2972, %v5507_v34  }
 0x402   :  { %v1499_v0 = vpop.permute.xlu1 %1498 }
 0x403   :  { %v1506_v41 = vmul.f32 %v4673_v8, %v1499_v0  ;;  %v1614_v0 = vadd.f32 %v1612_v17, %v1602_v42 }
 0x404   :  { %v1651_v30 = vpop.permute.xlu0 %1650  ;;  %2980 = vset.pattern.permute.xlu1 %v5519_v15 }
 0x405   :  { %v1613_v6 = vmul.f32 %v5512_v22, %v1506_v41  ;;  %v1626_v16 = vadd.f32 %v1624_v51, %v1614_v0  ;;  %v2752_v0 = vld [vmem:[%s5296_s4 + $0x48] sm:$0xff] }
 0x407   :  { %v1615_v59 = vadd.f32 %v1613_v6, %v1603_v63  ;;  %v1638_v47 = vadd.f32 %v1636_v55, %v1626_v16  ;;  %v2743_v6 = vld [vmem:[%s5299_s5 + $0x30] sm:$0xff]  ;;  %2974 = vset.pattern.permute.xlu2 %v5518_v13  ;;  %v2661_v16 = vld [vmem:[%s5297_s6 + $0x20] sm:$0xff] }
 0x408   :  { %1814 = vperm.xlu2 %2974, %v5507_v34  }
 0x409   :  { %v1627_v49 = vadd.f32 %v1625_v45, %v1615_v59 }
 0x40a   :  { %v1521_v14 = vpop.permute.xlu1 %1520 }
 0x40b   :  { %v1528_v57 = vmul.f32 %v4697_v7, %v1521_v14 }
 0x40d   :  { %v1637_v21 = vmul.f32 %v1634_v48, %v1528_v57 }
 0x40f   :  { %v1639_v2 = vadd.f32 %v1637_v21, %v1627_v49  ;;  %v2755_v21 = vld [vmem:[%s5297_s6 + $0x40] sm:$0xff] }
 0x410   :  { %1810 = vperm.xlu2 %2974, %v4681_v20  }
 0x411   :  { %v1654_v41 = vadd.f32 %v1651_v30, %v1639_v2  ;;  %v2662_v30 = vld [vmem:[%s5297_s6 + $0x28] sm:$0xff] }
 0x412   :  { %v1646_v31 = vpop.permute.xlu1 %1645  ;;  %v2756_v2 = vld [vmem:[%s5297_s6 + $0x48] sm:$0xff] }
 0x413   :  { %v1656_v4 = vmax.f32 %v1654_v41, 0.0  ;;  %v1653_v25 = vadd.f32 %v1646_v31, %v1638_v47  ;;  %v2063_v31 = vld [vmem:[%s5302_s7 + $0x8] sm:$0xff] }
 0x415   :  { %v1658_v40 = vmin.f32 %v1656_v4, 6.0  ;;  %v1655_v48 = vmax.f32 %v1653_v25, 0.0  ;;  %v2824_v4 = vld [vmem:[%s5302_s7 + $0x18] sm:$0xff] }
 0x417   :  { %v1657_v22 = vmin.f32 %v1655_v48, 6.0  ;;  %1695 = vmatpush.msra.mxu0 %v1658_v40  ;;  %v2823_v48 = vld [vmem:[%s5302_s7 + $0x10] sm:$0xff] }
 0x418   :  { %2977 = vset.pattern.permute.xlu2 %v5520_v26 }
 0x419   :  { %1696 = vmatpush.msra.mxu0 %v1657_v22  ;;  %1838 = vperm.xlu2 %2977, %v5507_v34   ;;  %v2825_v22 = vld [vmem:[%s5302_s7 + $0x20] sm:$0xff] }
 0x41a   :  { %2747 = vmatmul.msk.f32.vlgmr.msra.gmra.mxu0 %vm428_vm8, %v2743_v6  ;;  %v1668_v42 = vpop.permute.xlu1 %1667 }
 0x421   :  { %1834 = vperm.xlu2 %2977, %v4681_v20  }
 0x422   :  { %2748 = vmatmul.msk.f32.gmra.mxu0 %vm428_vm8, %v2744_v1  ;;  %v1769_v47 = vpop.permute.xlu1 %1768 }
 0x428   :  { %v1673_v14 = vpop.permute.xlu2 %1672 }
 0x429   :  { %2979 = vset.pattern.permute.xlu2 %v5517_v29 }
 0x42b   :  { %v1791_v40 = vpop.permute.xlu1 %1790 }
 0x447   :  { %v4772_v55 = vpop.permute.xlu2 %1778 }
 0x44e   :  { %v1787_v1 = vpop.permute.xlu1 %1786 }
 0x450   :  { %v1764_v49 = vpop.permute.xlu2 %1763 }
 0x45e   :  { %v4735_v63 = vpop.f32.mrf.mxu0 }
 0x466   :  { %v4737_v54 = vpop.f32.mrf.mxu0 }
 0x497   :  { %v1698_v36 = vpop.f32.mrf.mxu0 }
 0x498   :  { %v1699_v59 = vadd.f32 %v1698_v36, %v1668_v42  ;;  %v1799_v36 = vpop.permute.xlu1 %1798 }
 0x49a   :  { %v1704_v10 = vmax.f32 %v1699_v59, 0.0  ;;  %v1775_v59 = vpop.permute.xlu0 %1774 }
 0x49c   :  { %v4739_v17 = vmin.f32 %v1704_v10, 6.0 }
 0x49e   :  { %1720 = vrot.lane.b32.xlu0 %v4739_v17, %s3038_s18  ;;  %1714 = vrot.lane.b32.xlu2 %v4739_v17, %s3039_s19 }
 0x49f   :  { %1708 = vrot.lane.b32.xlu1 %v4739_v17, %s3036_s9  ;;  %v1701_v44 = vpop.f32.mrf.mxu0 }
 0x4a0   :  { %v1702_v51 = vadd.f32 %v1701_v44, %v1673_v14  ;;  %v1823_v14 = vpop.permute.xlu1 %1822 }
 0x4a2   :  { %v1705_v45 = vmax.f32 %v1702_v51, 0.0  ;;  %v1827_v10 = vpop.permute.xlu0 %1826 }
 0x4a4   :  { %v4753_v57 = vmin.f32 %v1705_v45, 6.0 }
 0x4a6   :  { %1734 = vrot.lane.b32.xlu0 %v4739_v17, %s3027_s13  ;;  %1726 = vrot.lane.b32.xlu2 %v4739_v17, %s3025_s29 }
 0x4a7   :  { %1740 = vrot.lane.b32.xlu1 %v4739_v17, %s3037_s17 }
 0x4ae   :  { %1746 = vrot.lane.b32.xlu0 %v4739_v17, %s3040_s20  ;;  %1710 = vrot.lane.b32.xlu2 %v4753_v57, %s3036_s9 }
 0x4af   :  { %1728 = vrot.lane.b32.xlu1 %v4753_v57, %s3025_s29 }
 0x4b6   :  { %1716 = vrot.lane.b32.xlu0 %v4753_v57, %s3039_s19  ;;  %1846 = vperm.xlu2 %2979, %v4681_v20  }
 0x4b7   :  { %1752 = vrot.lane.b32.xlu1 %v4739_v17, %s3041_s23 }
 0x4be   :  { %1722 = vrot.lane.b32.xlu0 %v4753_v57, %s3038_s18  ;;  %1748 = vrot.lane.b32.xlu2 %v4753_v57, %s3040_s20 }
 0x4bf   :  { %1862 = vperm.xlu1 %2980, %v5507_v34   ;;  %2981 = vset.pattern.permute.xlu2 %v5519_v15 }
 0x4c6   :  { %1736 = vrot.lane.b32.xlu0 %v4753_v57, %s3027_s13  ;;  %1858 = vperm.xlu2 %2981, %v4681_v20   ;;  %v2751_v20 = vld [vmem:[%s5296_s4 + $0x40] sm:$0xff] }
 0x4c7   :  { %1742 = vrot.lane.b32.xlu1 %v4753_v57, %s3037_s17 }
 0x4c8   :  { %2983 = vset.pattern.permute.xlu1 %v5513_v50 }
 0x4ce   :  { %1850 = vperm.xlu0 %2978, %v5507_v34   ;;  %2984 = vset.pattern.permute.xlu2 %v5513_v50  ;;  %v4797_v34 = vpop.permute.xlu2 %1802 }
 0x4cf   :  { %1754 = vrot.lane.b32.xlu1 %v4753_v57, %s3041_s23  ;;  %1896 = vperm.xlu2 %2984, %v2755_v21  }
 0x4d6   :  { %2982 = vset.pattern.permute.xlu0 %v5513_v50  ;;  %v1815_v41 = vpop.permute.xlu2 %1814 }
 0x4d7   :  { %1874 = vperm.xlu1 %2983, %v2751_v20   ;;  %1879 = vperm.xlu0 %2982, %v2752_v0  }
 0x4d8   :  { %1182 = vperm.xlu2 %2984, %v2662_v30  }
 0x4de   :  { %v1811_v25 = vpop.permute.xlu2 %1810 }
 0x4df   :  { %1901 = vperm.xlu1 %2983, %v2756_v2   ;;  %1177 = vperm.xlu0 %2982, %v2661_v16  }
 0x4e6   :  { %v4817_v6 = vpop.permute.xlu2 %1838 }
 0x4e7   :  { %2071 = vperm.xlu1 %2983, %v2063_v31   ;;  %2088 = vperm.xlu0 %2982, %v2824_v4   ;;  %v1732_v31 = vmul.f32 %v4654_v5, %v4739_v17 }
 0x4e9   :  { %v1817_v46 = vmul.f32 %v1811_v25, %v1732_v31 }
 0x4ee   :  { %v4821_v42 = vpop.permute.xlu2 %1834 }
 0x4ef   :  { %2083 = vperm.xlu1 %2983, %v2823_v48   ;;  %2106 = vperm.xlu0 %2982, %v2825_v22  }
 0x4f7   :  { %2985 = vset.pattern.permute.xlu0 %v5505_v11  ;;  %2987 = vset.pattern.permute.xlu1 %v5505_v11 }
 0x4f8   :  { %v1715_v44 = vpop.permute.xlu2 %1714 }
 0x4f9   :  { %v1718_v51 = vmul.f32 %v4618_v53, %v1715_v44 }
 0x4fb   :  { %v1781_v2 = vmul.f32 %v1775_v59, %v1718_v51 }
 0x500   :  { %v1727_v21 = vpop.permute.xlu2 %1726 }
 0x501   :  { %v1730_v16 = vmul.f32 %v4637_v37, %v1727_v21 }
 0x503   :  { %v1805_v22 = vmul.f32 %v1799_v36, %v1730_v16 }
 0x508   :  { %v1711_v62 = vpop.permute.xlu2 %1710 }
 0x510   :  { %v1721_v45 = vpop.permute.xlu0 %1720  ;;  %v1847_v21 = vpop.permute.xlu2 %1846 }
 0x511   :  { %v1709_v20 = vpop.permute.xlu1 %1708  ;;  %v1724_v0 = vmul.f32 %v4623_v33, %v1721_v45 }
 0x512   :  { %v1712_v30 = vmul.f32 %v4611_v18, %v1709_v20 }
 0x513   :  { %v1793_v4 = vmul.f32 %v1787_v1, %v1724_v0 }
 0x514   :  { %v1771_v11 = vmul.f32 %v1764_v49, %v1712_v30  ;;  %v1713_v49 = vmul.f32 %v4611_v18, %v1711_v62  ;;  %v1733_v30 = vmul.f32 %v4654_v5, %v4753_v57 }
 0x516   :  { %v1783_v48 = vadd.f32 %v1781_v2, %v1771_v11  ;;  %v1772_v36 = vmul.f32 %v1769_v47, %v1713_v49  ;;  %v1818_v62 = vmul.f32 %v1815_v41, %v1733_v30 }
 0x518   :  { %v1795_v43 = vadd.f32 %v1793_v4, %v1783_v48  ;;  %v1735_v28 = vpop.permute.xlu0 %1734  ;;  %v1749_v11 = vpop.permute.xlu2 %1748 }
 0x519   :  { %v1741_v44 = vpop.permute.xlu1 %1740  ;;  %v1738_v18 = vmul.f32 %v4659_v61, %v1735_v28 }
 0x51a   :  { %v1807_v23 = vadd.f32 %v1805_v22, %v1795_v43  ;;  %v1744_v48 = vmul.f32 %v4673_v8, %v1741_v44 }
 0x51b   :  { %v1829_v4 = vmul.f32 %v1823_v14, %v1738_v18  ;;  %v2062_v14 = vld [vmem:[%s5302_s7] sm:$0xff] }
 0x51c   :  { %v1819_v32 = vadd.f32 %v1817_v46, %v1807_v23  ;;  %2066 = vperm.xlu2 %2984, %v2062_v14   ;;  %v2795_v14 = vld [vmem:[%s5303_s10 + $0x48] sm:$0xf0] }
 0x51e   :  { %v1831_v41 = vadd.f32 %v1829_v4, %v1819_v32  ;;  %v2811_v4 = vld [vmem:[%s5303_s10 + $0x68] sm:$0xf0] }
 0x520   :  { %v1747_v60 = vpop.permute.xlu0 %1746  ;;  %v1859_v44 = vpop.permute.xlu2 %1858 }
 0x521   :  { %v1729_v45 = vpop.permute.xlu1 %1728  ;;  %v1750_v5 = vmul.f32 %v4691_v35, %v1747_v60  ;;  %v4852_v60 = vld [vmem:[%s5295_s3 + $0x58] sm:$0xff] }
 0x522   :  { %v1731_v0 = vmul.f32 %v4637_v37, %v1729_v45  ;;  %2399 = vperm.xlu0 %2985, %v4852_v60  }
 0x524   :  { %v1806_v2 = vmul.f32 %v4797_v34, %v1731_v0  ;;  %v1751_v34 = vmul.f32 %v4691_v35, %v1749_v11 }
 0x528   :  { %v1717_v20 = vpop.permute.xlu0 %1716 }
 0x529   :  { %v1753_v59 = vpop.permute.xlu1 %1752  ;;  %v1719_v51 = vmul.f32 %v4618_v53, %v1717_v20 }
 0x52a   :  { %v1756_v28 = vmul.f32 %v4697_v7, %v1753_v59  ;;  %2986 = vset.pattern.permute.xlu0 %v5513_v50 }
 0x52b   :  { %v1782_v17 = vmul.f32 %v4772_v55, %v1719_v51  ;;  %v2809_v51 = vld [vmem:[%s5303_s10 + $0x60] sm:$0xf] }
 0x52d   :  { %v1784_v23 = vadd.f32 %v1782_v17, %v1772_v36 }
 0x530   :  { %v1723_v1 = vpop.permute.xlu0 %1722 }
 0x531   :  { %v1725_v25 = vmul.f32 %v4623_v33, %v1723_v1  ;;  %v1863_v43 = vpop.permute.xlu1 %1862 }
 0x533   :  { %v1794_v46 = vmul.f32 %v1791_v40, %v1725_v25  ;;  %v2826_v25 = vld [vmem:[%s5302_s7 + $0x28] sm:$0xff] }
 0x534   :  { %2111 = vperm.xlu2 %2984, %v2826_v25   ;;  %v2868_v25 = vld [vmem:[%s5303_s10 + $0x14] sm:$0xf0] }
 0x535   :  { %v1796_v53 = vadd.f32 %v1794_v46, %v1784_v23 }
 0x537   :  { %v1808_v16 = vadd.f32 %v1806_v2, %v1796_v53 }
 0x538   :  { %v1737_v55 = vpop.permute.xlu0 %1736 }
 0x539   :  { %v1739_v47 = vmul.f32 %v4659_v61, %v1737_v55  ;;  %v1820_v37 = vadd.f32 %v1818_v62, %v1808_v16  ;;  %v1743_v31 = vpop.permute.xlu1 %1742  ;;  %v1841_v61 = vmul.f32 %v4821_v42, %v1744_v48  ;;  %v2880_v42 = vld [vmem:[%s5303_s10 + $0x74] sm:$0xf0]  ;;  %v2819_v55 = vld [vmem:[%s5303_s10 + $0x78] sm:$0xf0]  ;;  %v2754_v48 = vld [vmem:[%s5299_s5 + $0x48] sm:$0xff] }
 0x53a   :  { %v1745_v40 = vmul.f32 %v4673_v8, %v1743_v31  ;;  %v1853_v8 = vmul.f32 %v1847_v21, %v1750_v5  ;;  %v1865_v21 = vmul.f32 %v1859_v44, %v1756_v28  ;;  %v5521_v5 = vmov 2  }
 0x53b   :  { %v1830_v33 = vmul.f32 %v1827_v10, %v1739_v47  ;;  %v1843_v49 = vadd.f32 %v1841_v61, %v1831_v41  ;;  %v2875_v41 = vld [vmem:[%s5303_s10 + $0x54] sm:$0xf]  ;;  %v2874_v61 = vld [vmem:[%s5303_s10 + $0x44] sm:$0xf0] }
 0x53c   :  { %v1842_v22 = vmul.f32 %v4817_v6, %v1745_v40  ;;  %v2817_v6 = vld [vmem:[%s5303_s10 + $0x70] sm:$0xf]  ;;  %2387 = vperm.xlu2 %2984, %v4852_v60  }
 0x53d   :  { %v1832_v57 = vadd.f32 %v1830_v33, %v1820_v37  ;;  %v2818_v59 = vor.u32 %v2880_v42, %v2817_v6  ;;  %v1855_v0 = vadd.f32 %v1853_v8, %v1843_v49  ;;  %v2753_v37 = vld [vmem:[%s5299_s5 + $0x40] sm:$0xff]  ;;  %v2872_v6 = vld [vmem:[%s5303_s10 + $0x34] sm:$0xf0]  ;;  %v2871_v42 = vld [vmem:[%s5303_s10 + $0x34] sm:$0xf] }
 0x53e   :  { %v2877_v33 = vld [vmem:[%s5303_s10 + $0x64] sm:$0xf]  ;;  %v2870_v49 = vld [vmem:[%s5303_s10 + $0x24] sm:$0xf0] }
 0x53f   :  { %v1844_v32 = vadd.f32 %v1842_v22, %v1832_v57  ;;  %2034 = vmatpush.bf16.msrb.mxu0 %v2818_v59  ;;  %v1867_v23 = vadd.f32 %v1865_v21, %v1855_v0  ;;  %v2814_v40 = vor.u32 %v2877_v33, %v2811_v4  ;;  %v2801_v57 = vld [vmem:[%s5303_s10 + $0x50] sm:$0xf]  ;;  %v2803_v22 = vld [vmem:[%s5303_s10 + $0x58] sm:$0xf0]  ;;  %v2869_v21 = vld [vmem:[%s5303_s10 + $0x24] sm:$0xf] }
 0x540   :  { %v1851_v45 = vpop.permute.xlu0 %1850  ;;  %v2787_v59 = vld [vmem:[%s5303_s10 + $0x38] sm:$0xf0]  ;;  %v2769_v0 = vld [vmem:[%s5303_s10 + $0x10] sm:$0xf] }
 0x541   :  { %v1854_v20 = vmul.f32 %v1851_v45, %v1751_v34  ;;  %v1755_v10 = vpop.permute.xlu1 %1754  ;;  %v2876_v34 = vld [vmem:[%s5303_s10 + $0x54] sm:$0xf0]  ;;  %v2793_v45 = vld [vmem:[%s5303_s10 + $0x40] sm:$0xf] }
 0x542   :  { %v1757_v35 = vmul.f32 %v4697_v7, %v1755_v10  ;;  %v2878_v7 = vld [vmem:[%s5303_s10 + $0x64] sm:$0xf0]  ;;  %v2802_v28 = vor.u32 %v2876_v34, %v2801_v57  ;;  %v2873_v10 = vld [vmem:[%s5303_s10 + $0x44] sm:$0xf]  ;;  %v2794_v8 = vor.u32 %v2874_v61, %v2793_v45 }
 0x543   :  { %v1856_v17 = vadd.f32 %v1854_v20, %v1844_v32  ;;  %v2810_v36 = vor.u32 %v2878_v7, %v2809_v51  ;;  %v2806_v20 = vor.u32 %v2875_v41, %v2803_v22  ;;  %v2798_v32 = vor.u32 %v2873_v10, %v2795_v14  ;;  %v2777_v7 = vld [vmem:[%s5303_s10 + $0x20] sm:$0xf] }
 0x544   :  { %v1866_v1 = vmul.f32 %v1863_v43, %v1757_v35  ;;  %v2879_v43 = vld [vmem:[%s5303_s10 + $0x74] sm:$0xf]  ;;  %2988 = vset.pattern.permute.xlu2 %v5521_v5  ;;  %v2785_v35 = vld [vmem:[%s5303_s10 + $0x30] sm:$0xf]  ;;  %v2790_v51 = vor.u32 %v2871_v42, %v2787_v59 }
 0x545   :  { %2035 = vmatpush.bf16.msrb.mxu0 %v2810_v36  ;;  %v2822_v31 = vor.u32 %v2879_v43, %v2819_v55  ;;  %2415 = vperm.xlu2 %2988, %v4852_v60   ;;  %v2786_v44 = vor.u32 %v2872_v6, %v2785_v35  ;;  %v2763_v55 = vld [vmem:[%s5303_s10 + $0x8] sm:$0xf0] }
 0x546   :  { %v1868_v46 = vadd.f32 %v1866_v1, %v1856_v17  ;;  %v2778_v17 = vor.u32 %v2870_v49, %v2777_v7  ;;  %v2779_v1 = vld [vmem:[%s5303_s10 + $0x28] sm:$0xf0] }
 0x547   :  { %v2782_v36 = vor.u32 %v2869_v21, %v2779_v1 }
 0x549   :  { %v1875_v30 = vpop.permute.xlu1 %1874  ;;  %v1880_v2 = vpop.permute.xlu0 %1879  ;;  %2036 = vmatpush.bf16.msrb.mxu0 %v2802_v28 }
 0x54a   :  { %v1882_v53 = vadd.f32 %v1875_v30, %v1867_v23  ;;  %v1883_v16 = vadd.f32 %v1880_v2, %v1868_v46  ;;  %v2867_v23 = vld [vmem:[%s5303_s10 + $0x14] sm:$0xf]  ;;  %v2770_v46 = vor.u32 %v2868_v25, %v2769_v0  ;;  %v2771_v30 = vld [vmem:[%s5303_s10 + $0x18] sm:$0xf0] }
 0x54b   :  { %v2774_v2 = vor.u32 %v2867_v23, %v2771_v30 }
 0x54c   :  { %v1884_v62 = vmax.f32 %v1882_v53, 0.0  ;;  %v1885_v18 = vmax.f32 %v1883_v16, 0.0  ;;  %v1231_v53 = vpop.f32.mrf.mxu1  ;;  %v2761_v16 = vld [vmem:[%s5303_s10] sm:$0xf] }
 0x54d   :  { %2991 = vset.pattern.permute.xlu2 %v5515_v27  ;;  %2037 = vmatpush.bf16.msrb.mxu0 %v2794_v8 }
 0x54e   :  { %v1887_v11 = vmin.f32 %v1885_v18, 6.0  ;;  %v1886_v47 = vmin.f32 %v1884_v62, 6.0  ;;  %v2866_v62 = vld [vmem:[%s5303_s10 + $0x4] sm:$0xf0]  ;;  %v2865_v18 = vld [vmem:[%s5303_s10 + $0x4] sm:$0xf] }
 0x54f   :  { %v2762_v43 = vor.u32 %v2866_v62, %v2761_v16 }
 0x550   :  { %1924 = vmatpush.msra.mxu1 %v1887_v11  ;;  %v2766_v11 = vor.u32 %v2865_v18, %v2763_v55 }
 0x551   :  { %2038 = vmatpush.bf16.msrb.mxu0 %v2786_v44  ;;  %v1902_v4 = vpop.permute.xlu1 %1901  ;;  %v1178_v45 = vpop.permute.xlu0 %1177 }
 0x552   :  { %1925 = vmatpush.msra.mxu1 %v1886_v47  ;;  %v1209_v61 = vadd.f32 %v4735_v63, %v1178_v45 }
 0x553   :  { %2757 = vmatmul.msk.f32.vlgmr.msra.gmra.mxu1 %vm428_vm8, %v2753_v37 }
 0x554   :  { %2048 = vmatpush.bf16.msrb.mxu1 %v2822_v31  ;;  %v1234_v47 = vpop.f32.mrf.mxu1  ;;  %v1897_v31 = vpop.permute.xlu2 %1896  ;;  %v1237_v8 = vmax.f32 %v1209_v61, 0.0 }
 0x555   :  { %2039 = vmatpush.bf16.msrb.mxu0 %v2778_v17 }
 0x556   :  { %v4970_v7 = vmin.f32 %v1237_v8, 6.0  ;;  %v2831_v8 = vld [vmem:[%s5304_s8 + $0x10] sm:$0xff] }
 0x558   :  { %2049 = vmatpush.bf16.msrb.mxu1 %v2814_v40 }
 0x559   :  { %2040 = vmatpush.bf16.msrb.mxu0 %v2770_v46  ;;  %v2072_v44 = vpop.permute.xlu1 %2071  ;;  %v2089_v16 = vpop.permute.xlu0 %2088 }
 0x55b   :  { %2758 = vmatmul.msk.f32.gmra.mxu1 %vm428_vm8, %v2754_v48 }
 0x55c   :  { %2050 = vmatpush.bf16.msrb.mxu1 %v2806_v20  ;;  %v1232_v20 = vadd.f32 %v1231_v53, %v1178_v45  ;;  %v1183_v10 = vpop.permute.xlu2 %1182 }
 0x55d   :  { %2041 = vmatpush.bf16.msrb.mxu0 %v2762_v43  ;;  %v1212_v14 = vadd.f32 %v4737_v54, %v1183_v10  ;;  %v1235_v35 = vadd.f32 %v1234_v47, %v1183_v10 }
 0x55f   :  { %v1239_v59 = vmax.f32 %v1212_v14, 0.0 }
 0x560   :  { %2051 = vmatpush.bf16.msrb.mxu1 %v2798_v32  ;;  %v1238_v32 = vmax.f32 %v1232_v20, 0.0 }
 0x561   :  { %v4978_v54 = vmin.f32 %v1239_v59, 6.0  ;;  %v2084_v62 = vpop.permute.xlu1 %2083 }
 0x562   :  { %v4972_v49 = vmin.f32 %v1238_v32, 6.0 }
 0x564   :  { %2052 = vmatpush.bf16.msrb.mxu1 %v2790_v51  ;;  %v1240_v51 = vmax.f32 %v1235_v35, 0.0 }
 0x566   :  { %v4976_v17 = vmin.f32 %v1240_v51, 6.0 }
 0x568   :  { %2053 = vmatpush.bf16.msrb.mxu1 %v2782_v36 }
 0x56c   :  { %2054 = vmatpush.bf16.msrb.mxu1 %v2774_v2 }
 0x570   :  { %2055 = vmatpush.bf16.msrb.mxu1 %v2766_v11 }
 0x576   :  { %v2067_v1 = vpop.permute.xlu2 %2066 }
 0x5d0   :  { %v1927_v37 = vpop.f32.mrf.mxu1 }
 0x5d1   :  { %v1928_v33 = vadd.f32 %v1927_v37, %v1897_v31 }
 0x5d3   :  { %v1933_v48 = vmax.f32 %v1928_v33, 0.0 }
 0x5d5   :  { %v1935_v41 = vmin.f32 %v1933_v48, 6.0  ;;  %v4995_v48 = vld [vmem:[%s5295_s3 + $0x50] sm:$0xff] }
 0x5d6   :  { %2382 = vperm.xlu0 %2986, %v4995_v48   ;;  %2395 = vperm.xlu1 %2987, %v4995_v48  }
 0x5d7   :  { %2427 = vperm.xlu2 %2991, %v4995_v48  }
 0x5d8   :  { %v1930_v40 = vpop.f32.mrf.mxu1 }
 0x5d9   :  { %v1931_v57 = vadd.f32 %v1930_v40, %v1902_v4  ;;  %v2099_v4 = vld [vmem:[%s5304_s8] sm:$0xff]  ;;  %v2100_v40 = vld [vmem:[%s5304_s8 + $0x8] sm:$0xff] }
 0x5db   :  { %v1934_v34 = vmax.f32 %v1931_v57, 0.0 }
 0x5dd   :  { %v1936_v28 = vmin.f32 %v1934_v34, 6.0 }
 0x5de   :  { %2989 = vset.pattern.permute.xlu0 %v5521_v5  ;;  %2990 = vset.pattern.permute.xlu1 %v5515_v27  ;;  %v2107_v27 = vpop.permute.xlu0 %2106  ;;  %v2112_v5 = vpop.permute.xlu2 %2111 }
 0x5df   :  { %v1937_v22 = vpack.c.bf16 %v1936_v28, %v1935_v41  ;;  %2411 = vperm.xlu0 %2989, %v4995_v48   ;;  %2431 = vperm.xlu1 %2990, %v4852_v60  }
 0x5e0   :  { %2996 = vset.pattern.permute.xlu2 %v5517_v29 }
 0x5e1   :  { %2042 = vmatmul.bf16.vlgmr.msrb.gmra.mxu0 %v1937_v22  ;;  %2056 = vmatmul.bf16.vlgmr.msrb.gmra.mxu1 %v1937_v22 }
 0x5e2   :  { %2495 = vperm.xlu2 %2996, %v4852_v60  }
 0x5e6   :  { %v5030_v32 = vpop.permute.xlu0 %2399 }
 0x5e7   :  { %2992 = vset.pattern.permute.xlu0 %v5518_v13  ;;  %2993 = vset.pattern.permute.xlu1 %v5516_v39 }
 0x5e8   :  { %2447 = vperm.xlu0 %2992, %v4852_v60   ;;  %2463 = vperm.xlu1 %2993, %v4852_v60  }
 0x5ea   :  { %2491 = vperm.xlu2 %2996, %v4995_v48  }
 0x5f0   :  { %2443 = vperm.xlu0 %2992, %v4995_v48   ;;  %2995 = vset.pattern.permute.xlu1 %v5520_v26  ;;  %v2832_v26 = vld [vmem:[%s5304_s8 + $0x18] sm:$0xff] }
 0x5f1   :  { %2479 = vperm.xlu1 %2995, %v4852_v60  }
 0x5f2   :  { %2999 = vset.pattern.permute.xlu2 %v5513_v50 }
 0x5f8   :  { %2994 = vset.pattern.permute.xlu0 %v5516_v39 }
 0x5f9   :  { %2475 = vperm.xlu1 %2995, %v4995_v48   ;;  %2459 = vperm.xlu0 %2994, %v4995_v48  }
 0x601   :  { %2997 = vset.pattern.permute.xlu0 %v5519_v15  ;;  %2998 = vset.pattern.permute.xlu1 %v5519_v15 }
 0x648   :  { %v5032_v35 = vpop.permute.xlu0 %2382 }
 0x651   :  { %v5034_v39 = vpop.permute.xlu0 %2411 }
 0x65a   :  { %v5036_v51 = vpop.permute.xlu0 %2447 }
 0x65e   :  { %v2043_v6 = vpop.f32.mrf.mxu0  ;;  %v2057_v42 = vpop.f32.mrf.mxu1 }
 0x65f   :  { %v2044_v21 = vadd.f32 %v2043_v6, %v4970_v7  ;;  %v2058_v63 = vadd.f32 %v2057_v42, %v4972_v49 }
 0x661   :  { %v2074_v25 = vmul.f32 %v2067_v1, %v2044_v21  ;;  %v2075_v23 = vmul.f32 %v2067_v1, %v2058_v63 }
 0x663   :  { %v2091_v55 = vadd.f32 %v2084_v62, %v2074_v25  ;;  %v2092_v11 = vadd.f32 %v2084_v62, %v2075_v23 }
 0x665   :  { %v2095_v31 = vmax.f32 %v2091_v55, 0.0  ;;  %v2096_v33 = vmax.f32 %v2092_v11, 0.0 }
 0x666   :  { %v2045_v36 = vpop.f32.mrf.mxu0  ;;  %v2059_v0 = vpop.f32.mrf.mxu1 }
 0x667   :  { %v2046_v46 = vadd.f32 %v2045_v36, %v4978_v54  ;;  %v2060_v30 = vadd.f32 %v2059_v0, %v4976_v17 }
 0x669   :  { %v2076_v2 = vmul.f32 %v2072_v44, %v2046_v46  ;;  %v2077_v53 = vmul.f32 %v2072_v44, %v2060_v30  ;;  %v2444_v30 = vpop.permute.xlu0 %2443 }
 0x66b   :  { %v2093_v18 = vadd.f32 %v2089_v16, %v2076_v2  ;;  %v2094_v43 = vadd.f32 %v2089_v16, %v2077_v53  ;;  %v5522_v2 = vld [vmem:[#allocation12_spill] sm:$0xff]  ;;  %v5523_v16 = vld [vmem:[#allocation13_spill] sm:$0xff] }
 0x66d   :  { %v2097_v47 = vmax.f32 %v2093_v18, 0.0  ;;  %v2098_v37 = vmax.f32 %v2094_v43, 0.0 }
 0x66f   :  { %2134 = vmatpush.msrb.mxu2 %v2097_v47  ;;  %2157 = vmatpush.msrb.mxu3 %v2098_v37 }
 0x671   :  { %2135 = vmatpush.msrb.mxu2 %v2095_v31  ;;  %2158 = vmatpush.msrb.mxu3 %v2096_v33 }
 0x672   :  { %2827 = vmatmul.msk.f32.vlgmr.msrb.gmra.mxu2 %vm428_vm8, %v2099_v4  ;;  %2829 = vmatmul.msk.f32.vlgmr.msrb.gmra.mxu3 %vm428_vm8, %v2099_v4 }
 0x67a   :  { %2828 = vmatmul.msk.f32.gmra.mxu2 %vm428_vm8, %v2100_v40  ;;  %2830 = vmatmul.msk.f32.gmra.mxu3 %vm428_vm8, %v2100_v40 }
 0x6f5   :  { %v2137_v57 = vpop.f32.mrf.mxu2  ;;  %v2160_v34 = vpop.f32.mrf.mxu3 }
 0x6f6   :  { %v2138_v22 = vadd.f32 %v2137_v57, %v2107_v27  ;;  %v2161_v29 = vadd.f32 %v2160_v34, %v2107_v27  ;;  %v5073_v57 = vpop.permute.xlu2 %2387  ;;  %v2396_v27 = vpop.permute.xlu1 %2395 }
 0x6f8   :  { %v2166_v13 = vmax.f32 %v2138_v22, 0.0  ;;  %v2167_v14 = vmax.f32 %v2161_v29, 0.0 }
 0x6fd   :  { %v2140_v41 = vpop.f32.mrf.mxu2  ;;  %v2163_v28 = vpop.f32.mrf.mxu3 }
 0x6fe   :  { %v2141_v45 = vadd.f32 %v2140_v41, %v2112_v5  ;;  %v2164_v61 = vadd.f32 %v2163_v28, %v2112_v5  ;;  %v5079_v34 = vpop.permute.xlu2 %2415  ;;  %v5098_v5 = vpop.permute.xlu1 %2431 }
 0x700   :  { %v2168_v20 = vmax.f32 %v2141_v45, 0.0  ;;  %v2169_v10 = vmax.f32 %v2164_v61, 0.0  ;;  %v2840_v61 = vld [vmem:[%s5296_s4 + $0x58] sm:$0xff] }
 0x702   :  { %2193 = vmatpush.msra.mxu2 %v2168_v20  ;;  %2216 = vmatpush.msra.mxu3 %v2169_v10  ;;  %v2460_v20 = vpop.permute.xlu0 %2459 }
 0x704   :  { %2194 = vmatpush.msra.mxu2 %v2166_v13  ;;  %2217 = vmatpush.msra.mxu3 %v2167_v14  ;;  %v2843_v14 = vld [vmem:[%s5297_s6 + $0x50] sm:$0xff] }
 0x705   :  { %2833 = vmatmul.msk.f32.vlgmr.msra.gmra.mxu2 %vm428_vm8, %v2831_v8  ;;  %2835 = vmatmul.msk.f32.vlgmr.msra.gmra.mxu3 %vm428_vm8, %v2831_v8  ;;  %v2839_v8 = vld [vmem:[%s5296_s4 + $0x50] sm:$0xff] }
 0x706   :  { %v5106_v28 = vpop.permute.xlu1 %2463 }
 0x70d   :  { %2834 = vmatmul.msk.f32.gmra.mxu2 %vm428_vm8, %v2832_v26  ;;  %2836 = vmatmul.msk.f32.gmra.mxu3 %vm428_vm8, %v2832_v26 }
 0x70e   :  { %v5112_v29 = vpop.permute.xlu1 %2479 }
 0x716   :  { %v2476_v10 = vpop.permute.xlu1 %2475 }
 0x788   :  { %v2196_v6 = vpop.f32.mrf.mxu2  ;;  %v2219_v42 = vpop.f32.mrf.mxu3 }
 0x789   :  { %v2225_v44 = vmul.f32 0.5, %v2196_v6  ;;  %v2226_v59 = vmul.f32 0.5, %v2219_v42 }
 0x78b   :  { %3011 = vtanh.f32 %v2225_v44 }
 0x78c   :  { %3013 = vtanh.f32 %v2226_v59 }
 0x790   :  { %v2199_v46 = vpop.f32.mrf.mxu2  ;;  %v2222_v11 = vpop.f32.mrf.mxu3 }
 0x791   :  { %v3012_v21 = vpop.eup %3011  ;;  %v2227_v18 = vmul.f32 0.5, %v2199_v46  ;;  %v2228_v47 = vmul.f32 0.5, %v2222_v11 }
 0x792   :  { %v3014_v63 = vpop.eup %3013  ;;  %v2233_v1 = vmul.f32 0.5, %v3012_v21 }
 0x793   :  { %v2234_v36 = vmul.f32 0.5, %v3014_v63  ;;  %3015 = vtanh.f32 %v2227_v18 }
 0x794   :  { %v2237_v0 = vadd.f32 1.5, %v2233_v1  ;;  %3017 = vtanh.f32 %v2228_v47 }
 0x795   :  { %v2238_v15 = vadd.f32 1.5, %v2234_v36 }
 0x796   :  { %v2241_v25 = vmul.f32 %v2237_v0, %v4970_v7 }
 0x797   :  { %v2242_v23 = vmul.f32 %v2238_v15, %v4972_v49 }
 0x798   :  { %2261 = vrot.lane.b32.xlu2 %v2241_v25, %s3021_s21  ;;  %2245 = vrot.lane.b32.xlu1 %v2241_v25, %s3022_s22  ;;  %v2309_v53 = vmul.f32 %v2241_v25, %v5522_v2 }
 0x799   :  { %2249 = vrot.lane.b32.xlu0 %v2242_v23, %s3022_s22  ;;  %v2310_v62 = vmul.f32 %v2242_v23, %v5523_v16  ;;  %v3016_v7 = vpop.eup %3015 }
 0x79a   :  { %v5045_v43 = vmul.f32 %v2444_v30, %v2309_v53  ;;  %v2235_v49 = vmul.f32 0.5, %v3016_v7  ;;  %v3018_v33 = vpop.eup %3017 }
 0x79b   :  { %v5047_v55 = vmul.f32 %v2444_v30, %v2310_v62  ;;  %v2236_v4 = vmul.f32 0.5, %v3018_v33 }
 0x79c   :  { %v2239_v37 = vadd.f32 1.5, %v2235_v49 }
 0x79d   :  { %v2240_v40 = vadd.f32 1.5, %v2236_v4 }
 0x79e   :  { %v5056_v31 = vmul.f32 %v2239_v37, %v4978_v54 }
 0x79f   :  { %v5067_v54 = vmul.f32 %v2240_v40, %v4976_v17  ;;  %v5086_v17 = vpop.permute.xlu2 %2427 }
 0x7a0   :  { %2281 = vrot.lane.b32.xlu2 %v2242_v23, %s3024_s0  ;;  %2265 = vrot.lane.b32.xlu1 %v2242_v23, %s3021_s21 }
 0x7a1   :  { %2333 = vrot.lane.b32.xlu0 %v2242_v23, %s3030_s14 }
 0x7a8   :  { %2297 = vrot.lane.b32.xlu2 %v2242_v23, %s3025_s29  ;;  %2277 = vrot.lane.b32.xlu1 %v2241_v25, %s3024_s0 }
 0x7a9   :  { %2361 = vrot.lane.b32.xlu0 %v2241_v25, %s3033_s16 }
 0x7b0   :  { %2317 = vrot.lane.b32.xlu2 %v2242_v23, %s3027_s13  ;;  %2293 = vrot.lane.b32.xlu1 %v2241_v25, %s3025_s29 }
 0x7b1   :  { %2263 = vrot.lane.b32.xlu0 %v5056_v31, %s3021_s21 }
 0x7b8   :  { %2329 = vrot.lane.b32.xlu2 %v2241_v25, %s3030_s14  ;;  %2313 = vrot.lane.b32.xlu1 %v2241_v25, %s3027_s13 }
 0x7b9   :  { %2279 = vrot.lane.b32.xlu0 %v5056_v31, %s3024_s0 }
 0x7c0   :  { %2345 = vrot.lane.b32.xlu2 %v2241_v25, %s3032_s15  ;;  %2349 = vrot.lane.b32.xlu1 %v2242_v23, %s3032_s15 }
 0x7c1   :  { %2367 = vrot.lane.b32.xlu0 %v5067_v54, %s3033_s16 }
 0x7c8   :  { %2365 = vrot.lane.b32.xlu1 %v2242_v23, %s3033_s16  ;;  %2247 = vrot.lane.b32.xlu2 %v5056_v31, %s3022_s22 }
 0x7c9   :  { %2511 = vperm.xlu0 %2997, %v4852_v60   ;;  %v5092_v60 = vpop.permute.xlu2 %2495 }
 0x7d0   :  { %2251 = vrot.lane.b32.xlu1 %v5067_v54, %s3022_s22  ;;  %2267 = vrot.lane.b32.xlu2 %v5067_v54, %s3021_s21 }
 0x7d1   :  { %3001 = vset.pattern.permute.xlu0 %v5513_v50  ;;  %v5104_v41 = vpop.permute.xlu2 %2491 }
 0x7d8   :  { %2283 = vrot.lane.b32.xlu1 %v5067_v54, %s3024_s0  ;;  %2299 = vrot.lane.b32.xlu2 %v5067_v54, %s3025_s29 }
 0x7e0   :  { %2295 = vrot.lane.b32.xlu1 %v5056_v31, %s3025_s29  ;;  %2315 = vrot.lane.b32.xlu2 %v5056_v31, %s3027_s13 }
 0x7e8   :  { %2319 = vrot.lane.b32.xlu1 %v5067_v54, %s3027_s13  ;;  %2335 = vrot.lane.b32.xlu2 %v5067_v54, %s3030_s14 }
 0x7f0   :  { %2331 = vrot.lane.b32.xlu1 %v5056_v31, %s3030_s14  ;;  %2351 = vrot.lane.b32.xlu2 %v5067_v54, %s3032_s15 }
 0x7f2   :  { %v2262_v22 = vpop.permute.xlu2 %2261 }
 0x7f8   :  { %2347 = vrot.lane.b32.xlu1 %v5056_v31, %s3032_s15  ;;  %2363 = vrot.lane.b32.xlu2 %v5056_v31, %s3033_s16 }
 0x7fa   :  { %v2282_v45 = vpop.permute.xlu2 %2281 }
 0x800   :  { %2507 = vperm.xlu1 %2998, %v4995_v48   ;;  %2532 = vperm.xlu2 %2999, %v2840_v61  }
 0x802   :  { %v2298_v13 = vpop.permute.xlu2 %2297 }
 0x808   :  { %3000 = vset.pattern.permute.xlu1 %v5513_v50  ;;  %2555 = vperm.xlu2 %2999, %v2843_v14   ;;  %v5524_v14 = vld [vmem:[#allocation8_spill] sm:$0xff] }
 0x809   :  { %2527 = vperm.xlu1 %3000, %v2839_v8  }
 0x80a   :  { %v2318_v26 = vpop.permute.xlu2 %2317  ;;  %v2246_v6 = vpop.permute.xlu1 %2245 }
 0x80b   :  { %v2250_v42 = vpop.permute.xlu0 %2249 }
 0x80c   :  { %v2253_v48 = vsel %vm52_vm0, %v2246_v6, %v2250_v42  ;;  %v2255_v44 = vsel %vm52_vm0, %v2250_v42, %v2246_v6 }
 0x80d   :  { %v2257_v59 = vmul.f32 %v2255_v44, %v5485_v12  ;;  %v2258_v21 = vmul.f32 %v2253_v48, %v5486_v58 }
 0x80f   :  { %v2390_v62 = vmul.f32 %v5032_v35, %v2257_v59  ;;  %v2391_v18 = vmul.f32 %v5032_v35, %v2258_v21  ;;  %v5525_v21 = vld [vmem:[#allocation11_spill] sm:$0xff] }
 0x812   :  { %v2330_v63 = vpop.permute.xlu2 %2329  ;;  %v2266_v1 = vpop.permute.xlu1 %2265 }
 0x813   :  { %v2334_v36 = vpop.permute.xlu0 %2333  ;;  %v2269_v50 = vsel %vm75_vm1, %v2262_v22, %v2266_v1  ;;  %v2271_v0 = vsel %vm75_vm1, %v2266_v1, %v2262_v22 }
 0x814   :  { %v2337_v15 = vsel %vm182_vm5, %v2330_v63, %v2334_v36  ;;  %v2339_v25 = vsel %vm182_vm5, %v2334_v36, %v2330_v63  ;;  %v2273_v23 = vmul.f32 %v2271_v0, %v5483_v9  ;;  %v2274_v46 = vmul.f32 %v2269_v50, %v5484_v38 }
 0x815   :  { %v2341_v30 = vmul.f32 %v2337_v15, %v3409_v19  ;;  %v2342_v53 = vmul.f32 %v2339_v25, %v5420_v24 }
 0x816   :  { %v2402_v7 = vmul.f32 %v2396_v27, %v2273_v23  ;;  %v2403_v49 = vmul.f32 %v2396_v27, %v2274_v46 }
 0x817   :  { %v2482_v11 = vmul.f32 %v2476_v10, %v2341_v30  ;;  %v2483_v47 = vmul.f32 %v2476_v10, %v2342_v53  ;;  %v5526_v30 = vld [vmem:[#allocation14_spill] sm:$0xff] }
 0x818   :  { %v2406_v37 = vadd.f32 %v2402_v7, %v2390_v62  ;;  %v2407_v33 = vadd.f32 %v2403_v49, %v2391_v18  ;;  %v5527_v62 = vld [vmem:[#allocation15_spill] sm:$0xff] }
 0x81a   :  { %v2278_v4 = vpop.permute.xlu1 %2277  ;;  %v2346_v27 = vpop.permute.xlu2 %2345 }
 0x81b   :  { %v2285_v40 = vsel %vm99_vm2, %v2278_v4, %v2282_v45  ;;  %v2287_v22 = vsel %vm99_vm2, %v2282_v45, %v2278_v4 }
 0x81c   :  { %v2289_v61 = vmul.f32 %v2287_v22, %v5487_v3  ;;  %v2290_v8 = vmul.f32 %v2285_v40, %v5524_v14 }
 0x81e   :  { %v2418_v6 = vmul.f32 %v5034_v39, %v2289_v61  ;;  %v2419_v35 = vmul.f32 %v5034_v39, %v2290_v8  ;;  %v5528_v61 = vld [vmem:[#allocation17_spill] sm:$0xff]  ;;  %v5529_v8 = vld [vmem:[#allocation18_spill] sm:$0xff] }
 0x820   :  { %v2422_v42 = vadd.f32 %v2418_v6, %v2406_v37  ;;  %v2423_v10 = vadd.f32 %v2419_v35, %v2407_v33 }
 0x822   :  { %v2294_v48 = vpop.permute.xlu1 %2293  ;;  %v2248_v0 = vpop.permute.xlu2 %2247 }
 0x823   :  { %v2301_v44 = vsel %vm123_vm3, %v2294_v48, %v2298_v13  ;;  %v2303_v59 = vsel %vm123_vm3, %v2298_v13, %v2294_v48 }
 0x824   :  { %v2305_v45 = vmul.f32 %v2303_v59, %v5491_v56  ;;  %v2306_v63 = vmul.f32 %v2301_v44, %v5525_v21  ;;  %v5187_v44 = vpop.permute.xlu0 %2361 }
 0x826   :  { %v2434_v1 = vmul.f32 %v5086_v17, %v2305_v45  ;;  %v2435_v36 = vmul.f32 %v5086_v17, %v2306_v63 }
 0x828   :  { %v2438_v50 = vadd.f32 %v2434_v1, %v2422_v42  ;;  %v2439_v39 = vadd.f32 %v2435_v36, %v2423_v10 }
 0x82a   :  { %v2455_v15 = vadd.f32 %v5047_v55, %v2439_v39  ;;  %v2314_v25 = vpop.permute.xlu1 %2313  ;;  %v2454_v23 = vadd.f32 %v5045_v43, %v2438_v50  ;;  %v2268_v40 = vpop.permute.xlu2 %2267 }
 0x82b   :  { %v2321_v46 = vsel %vm158_vm4, %v2314_v25, %v2318_v26  ;;  %v2323_v13 = vsel %vm158_vm4, %v2318_v26, %v2314_v25 }
 0x82c   :  { %v2325_v53 = vmul.f32 %v2321_v46, %v5526_v30  ;;  %v2326_v18 = vmul.f32 %v2323_v13, %v5527_v62  ;;  %v2264_v45 = vpop.permute.xlu0 %2263 }
 0x82d   :  { %v2270_v39 = vsel %vm75_vm1, %v2264_v45, %v2268_v40 }
 0x82e   :  { %v2466_v7 = vmul.f32 %v2460_v20, %v2325_v53  ;;  %v2467_v17 = vmul.f32 %v2460_v20, %v2326_v18 }
 0x830   :  { %v2470_v49 = vadd.f32 %v2466_v7, %v2454_v23  ;;  %v2471_v37 = vadd.f32 %v2467_v17, %v2455_v15  ;;  %v2272_v15 = vsel %vm75_vm1, %v2268_v40, %v2264_v45 }
 0x831   :  { %v2275_v17 = vmul.f32 %v2272_v15, %v5483_v9  ;;  %v5530_v15 = vld [vmem:[#allocation20_spill] sm:$0xff] }
 0x832   :  { %v2350_v33 = vpop.permute.xlu1 %2349  ;;  %v2486_v4 = vadd.f32 %v2482_v11, %v2470_v49  ;;  %v2487_v55 = vadd.f32 %v2483_v47, %v2471_v37  ;;  %v2300_v47 = vpop.permute.xlu2 %2299  ;;  %v2276_v49 = vmul.f32 %v2270_v39, %v5484_v38 }
 0x833   :  { %v2353_v43 = vsel %vm206_vm6, %v2346_v27, %v2350_v33  ;;  %v2355_v22 = vsel %vm206_vm6, %v2350_v33, %v2346_v27  ;;  %v2404_v40 = vmul.f32 %v5030_v32, %v2275_v17 }
 0x834   :  { %v2357_v26 = vmul.f32 %v2353_v43, %v5528_v61  ;;  %v2358_v6 = vmul.f32 %v2355_v22, %v5529_v8  ;;  %v2280_v50 = vpop.permute.xlu0 %2279  ;;  %v2405_v43 = vmul.f32 %v5030_v32, %v2276_v49  ;;  %v2311_v32 = vmul.f32 %v5056_v31, %v5522_v2 }
 0x836   :  { %v2498_v35 = vmul.f32 %v5104_v41, %v2357_v26  ;;  %v2499_v20 = vmul.f32 %v5104_v41, %v2358_v6  ;;  %v2312_v6 = vmul.f32 %v5067_v54, %v5523_v16  ;;  %v2452_v31 = vmul.f32 %v5036_v51, %v2311_v32 }
 0x838   :  { %v5181_v42 = vadd.f32 %v2498_v35, %v2486_v4  ;;  %v5183_v10 = vadd.f32 %v2499_v20, %v2487_v55  ;;  %v2453_v54 = vmul.f32 %v5036_v51, %v2312_v6  ;;  %v5531_v51 = vld [vmem:[#allocation21_spill] sm:$0xff] }
 0x83a   :  { %v5185_v11 = vpop.permute.xlu1 %2365  ;;  %v2316_v59 = vpop.permute.xlu2 %2315 }
 0x842   :  { %v2252_v48 = vpop.permute.xlu1 %2251  ;;  %v2336_v63 = vpop.permute.xlu2 %2335 }
 0x843   :  { %v2254_v36 = vsel %vm52_vm0, %v2248_v0, %v2252_v48  ;;  %v2256_v41 = vsel %vm52_vm0, %v2252_v48, %v2248_v0 }
 0x844   :  { %v2259_v46 = vmul.f32 %v2256_v41, %v5485_v12  ;;  %v2260_v13 = vmul.f32 %v2254_v36, %v5486_v58 }
 0x846   :  { %v2392_v12 = vmul.f32 %v5073_v57, %v2259_v46  ;;  %v2393_v58 = vmul.f32 %v5073_v57, %v2260_v13 }
 0x848   :  { %v2408_v22 = vadd.f32 %v2404_v40, %v2392_v12  ;;  %v2409_v57 = vadd.f32 %v2405_v43, %v2393_v58  ;;  %v2369_v40 = vsel %vm230_vm7, %v5187_v44, %v5185_v11 }
 0x84a   :  { %v2284_v27 = vpop.permute.xlu1 %2283  ;;  %v2352_v18 = vpop.permute.xlu2 %2351 }
 0x84b   :  { %v2286_v25 = vsel %vm99_vm2, %v2280_v50, %v2284_v27  ;;  %v2288_v23 = vsel %vm99_vm2, %v2284_v27, %v2280_v50 }
 0x84c   :  { %v2291_v37 = vmul.f32 %v2288_v23, %v5487_v3  ;;  %v2292_v33 = vmul.f32 %v2286_v25, %v5524_v14 }
 0x84e   :  { %v2420_v9 = vmul.f32 %v5079_v34, %v2291_v37  ;;  %v2421_v38 = vmul.f32 %v5079_v34, %v2292_v33 }
 0x850   :  { %v2424_v20 = vadd.f32 %v2420_v9, %v2408_v22 }
 0x852   :  { %v2296_v1 = vpop.permute.xlu1 %2295  ;;  %v2364_v27 = vpop.permute.xlu2 %2363 }
 0x853   :  { %v2302_v0 = vsel %vm123_vm3, %v2296_v1, %v2300_v47  ;;  %v2304_v7 = vsel %vm123_vm3, %v2300_v47, %v2296_v1  ;;  %v2425_v47 = vadd.f32 %v2421_v38, %v2409_v57 }
 0x854   :  { %v2307_v4 = vmul.f32 %v2304_v7, %v5491_v56  ;;  %v2308_v55 = vmul.f32 %v2302_v0, %v5525_v21 }
 0x856   :  { %v2436_v56 = vmul.f32 %v5098_v5, %v2307_v4  ;;  %v2437_v21 = vmul.f32 %v5098_v5, %v2308_v55  ;;  %v2368_v5 = vpop.permute.xlu0 %2367 }
 0x858   :  { %v2440_v45 = vadd.f32 %v2436_v56, %v2424_v20  ;;  %v2441_v1 = vadd.f32 %v2437_v21, %v2425_v47 }
 0x85a   :  { %v2320_v53 = vpop.permute.xlu1 %2319  ;;  %v2456_v41 = vadd.f32 %v2452_v31, %v2440_v45  ;;  %v2457_v50 = vadd.f32 %v2453_v54, %v2441_v1  ;;  %v2533_v38 = vpop.permute.xlu2 %2532 }
 0x85b   :  { %v2322_v3 = vsel %vm158_vm4, %v2316_v59, %v2320_v53  ;;  %v2324_v14 = vsel %vm158_vm4, %v2320_v53, %v2316_v59 }
 0x85c   :  { %v2327_v48 = vmul.f32 %v2322_v3, %v5526_v30  ;;  %v2328_v59 = vmul.f32 %v2324_v14, %v5527_v62  ;;  %v2372_v30 = vsel %vm230_vm7, %v2368_v5, %v2364_v27 }
 0x85d   :  { %v2376_v23 = vmul.f32 %v2372_v30, %v5531_v51 }
 0x85e   :  { %v2468_v62 = vmul.f32 %v5106_v28, %v2327_v48  ;;  %v2469_v36 = vmul.f32 %v5106_v28, %v2328_v59  ;;  %v2844_v28 = vld [vmem:[%s5297_s6 + $0x58] sm:$0xff]  ;;  %v2512_v17 = vpop.permute.xlu0 %2511 }
 0x85f   :  { %2560 = vperm.xlu0 %3001, %v2844_v28  }
 0x860   :  { %v2472_v53 = vadd.f32 %v2468_v62, %v2456_v41  ;;  %v2473_v0 = vadd.f32 %v2469_v36, %v2457_v50 }
 0x862   :  { %v2332_v26 = vpop.permute.xlu1 %2331 }
 0x863   :  { %v2338_v34 = vsel %vm182_vm5, %v2332_v26, %v2336_v63  ;;  %v2340_v35 = vsel %vm182_vm5, %v2336_v63, %v2332_v26  ;;  %v2370_v63 = vsel %vm230_vm7, %v2364_v27, %v2368_v5  ;;  %v2841_v5 = vld [vmem:[%s5299_s5 + $0x50] sm:$0xff] }
 0x864   :  { %v2343_v2 = vmul.f32 %v2338_v34, %v3409_v19  ;;  %v2344_v16 = vmul.f32 %v2340_v35, %v5420_v24  ;;  %v2375_v25 = vmul.f32 %v2370_v63, %v5530_v15 }
 0x866   :  { %v2484_v19 = vmul.f32 %v5112_v29, %v2343_v2  ;;  %v2485_v24 = vmul.f32 %v5112_v29, %v2344_v16  ;;  %v2516_v58 = vmul.f32 %v2512_v17, %v2375_v25 }
 0x868   :  { %v2488_v49 = vadd.f32 %v2484_v19, %v2472_v53  ;;  %v2489_v37 = vadd.f32 %v2485_v24, %v2473_v0 }
 0x86a   :  { %v2348_v39 = vpop.permute.xlu1 %2347 }
 0x86b   :  { %v2354_v46 = vsel %vm206_vm6, %v2348_v39, %v2352_v18  ;;  %v2356_v13 = vsel %vm206_vm6, %v2352_v18, %v2348_v39  ;;  %v2517_v18 = vmul.f32 %v2512_v17, %v2376_v23 }
 0x86c   :  { %v2359_v7 = vmul.f32 %v2354_v46, %v5528_v61  ;;  %v2360_v29 = vmul.f32 %v2356_v13, %v5529_v8  ;;  %v2371_v61 = vsel %vm230_vm7, %v5185_v11, %v5187_v44 }
 0x86d   :  { %v2374_v3 = vmul.f32 %v2371_v61, %v5531_v51 }
 0x86e   :  { %v2500_v33 = vmul.f32 %v5092_v60, %v2359_v7  ;;  %v2501_v12 = vmul.f32 %v5092_v60, %v2360_v29  ;;  %v2373_v60 = vmul.f32 %v2369_v40, %v5530_v15 }
 0x870   :  { %v2505_v4 = vadd.f32 %v2501_v12, %v2489_v37  ;;  %v2504_v55 = vadd.f32 %v2500_v33, %v2488_v49 }
 0x872   :  { %v2521_v8 = vadd.f32 %v2517_v18, %v2505_v4  ;;  %v2520_v43 = vadd.f32 %v2516_v58, %v2504_v55  ;;  %v2508_v9 = vpop.permute.xlu1 %2507 }
 0x873   :  { %v2514_v21 = vmul.f32 %v2508_v9, %v2373_v60  ;;  %v2515_v26 = vmul.f32 %v2508_v9, %v2374_v3 }
 0x874   :  { %v2537_v14 = vadd.f32 %v2533_v38, %v2520_v43  ;;  %v2538_v22 = vadd.f32 %v2533_v38, %v2521_v8 }
 0x875   :  { %v2518_v52 = vadd.f32 %v2514_v21, %v5181_v42  ;;  %v2519_v11 = vadd.f32 %v2515_v26, %v5183_v10  ;;  %v2842_v42 = vld [vmem:[%s5299_s5 + $0x58] sm:$0xff]  ;;  %v2556_v10 = vpop.permute.xlu2 %2555 }
 0x876   :  { %v2541_v57 = vmax.f32 %v2537_v14, 0.0  ;;  %v2542_v56 = vmax.f32 %v2538_v22, 0.0 }
 0x878   :  { %v2545_v32 = vmin.f32 %v2541_v57, 6.0  ;;  %v2546_v6 = vmin.f32 %v2542_v56, 6.0 }
 0x87a   :  { %2583 = vmatpush.msra.mxu0 %v2545_v32  ;;  %2606 = vmatpush.msra.mxu1 %v2546_v6 }
 0x87b   :  { %v2528_v44 = vpop.permute.xlu1 %2527 }
 0x87c   :  { %v2535_v34 = vadd.f32 %v2528_v44, %v2518_v52  ;;  %v2536_v35 = vadd.f32 %v2528_v44, %v2519_v11 }
 0x87e   :  { %v2539_v20 = vmax.f32 %v2535_v34, 0.0  ;;  %v2540_v47 = vmax.f32 %v2536_v35, 0.0 }
 0x880   :  { %v2543_v48 = vmin.f32 %v2539_v20, 6.0  ;;  %v2544_v59 = vmin.f32 %v2540_v47, 6.0 }
 0x882   :  { %2584 = vmatpush.msra.mxu0 %v2543_v48  ;;  %2607 = vmatpush.msra.mxu1 %v2544_v59 }
 0x883   :  { %2845 = vmatmul.msk.f32.vlgmr.msra.gmra.mxu0 %vm428_vm8, %v2841_v5  ;;  %2847 = vmatmul.msk.f32.vlgmr.msra.gmra.mxu1 %vm428_vm8, %v2841_v5 }
 0x88b   :  { %2846 = vmatmul.msk.f32.gmra.mxu0 %vm428_vm8, %v2842_v42  ;;  %2848 = vmatmul.msk.f32.gmra.mxu1 %vm428_vm8, %v2842_v42 }
 0x8d1   :  { %v2561_v30 = vpop.permute.xlu0 %2560 }
 0x900   :  { %v2586_v27 = vpop.f32.mrf.mxu0  ;;  %v2609_v45 = vpop.f32.mrf.mxu1 }
 0x901   :  { %v2587_v1 = vadd.f32 %v2586_v27, %v2556_v10  ;;  %v2610_v2 = vadd.f32 %v2609_v45, %v2556_v10 }
 0x903   :  { %v2615_v16 = vmax.f32 %v2587_v1, 0.0  ;;  %v2616_v31 = vmax.f32 %v2610_v2, 0.0 }
 0x905   :  { %v2619_v54 = vmin.f32 %v2615_v16, 6.0  ;;  %v2620_v63 = vmin.f32 %v2616_v31, 6.0 }
 0x907   :  { %2623 = vst [vmem:[%s5305_s11] sm:$0xff] %v2619_v54 }
 0x908   :  { %2624 = vst [vmem:[%s5305_s11 + $0x8] sm:$0xff] %v2620_v63  ;;  %v2589_v62 = vpop.f32.mrf.mxu0  ;;  %v2612_v36 = vpop.f32.mrf.mxu1 }
 0x909   :  { %v2590_v41 = vadd.f32 %v2589_v62, %v2561_v30  ;;  %v2613_v50 = vadd.f32 %v2612_v36, %v2561_v30 }
 0x90b   :  { %v2617_v19 = vmax.f32 %v2590_v41, 0.0  ;;  %v2618_v24 = vmax.f32 %v2613_v50, 0.0 }
 0x90d   :  { %v2621_v39 = vmin.f32 %v2617_v19, 6.0  ;;  %v2622_v15 = vmin.f32 %v2618_v24, 6.0 }
 0x90f   :  { %2625 = vst [vmem:[%s5305_s11 + $0x10] sm:$0xff] %v2621_v39 }
 0x910   :  { %2626 = vst [vmem:[%s5305_s11 + $0x18] sm:$0xff] %v2622_v15 }

</bundles_post_ra>
